<compile_context>
chip_gen: v6e
topology: v6e:2x2x1
jax: 0.10.0
libtpu: 0.0.40
codegen_flags: <defaults>
</compile_context>

<pallas_src>
import jax
import jax.numpy as jnp
from jax import lax
from jax.experimental import pallas as pl
from jax.experimental.pallas import tpu as pltpu


# ----------------------------------------------------------------------------
# Fused Pallas kernel: (conv3x3 + bias + ReLU) x 2, one batch element per step
# ----------------------------------------------------------------------------
def _vgg_block_kernel(x_ref, w1_ref, b1_ref, w2_ref, b2_ref, o_ref, mid_ref):
    # x_ref  : (1, Cin, H+2, W+2)  bf16, zero-padded input (CHW layout)
    # w1_ref : (Cmid, 9*Cin)       bf16, BN-folded, K index = (dy*3+dx)*Cin + c
    # b1_ref : (Cmid, 1)           f32
    # w2_ref : (Cout, 9*Cmid)      bf16
    # b2_ref : (Cout, 1)           f32
    # o_ref  : (1, Cout, H*W)      f32  (lane-dense store: last dim = H*W)
    # mid_ref: (Cmid, H+2, W+2)    f32 VMEM scratch (padded stage-1 activation)
    Cin = x_ref.shape[1]
    Hp, Wp = x_ref.shape[2], x_ref.shape[3]
    H, W = Hp - 2, Wp - 2
    Cmid = w1_ref.shape[0]

    def im2col(img, c):
        # img: (c, H+2, W+2) -> (9*c, H*W); row index = (dy*3+dx)*c + channel
        cols = []
        for dy in range(3):
            for dx in range(3):
                cols.append(img[:, dy:dy + H, dx:dx + W].reshape(c, H * W))
        return jnp.concatenate(cols, axis=0)

    # ---- stage 1: conv1 + bn1 + relu (single MXU matmul, f32 accumulate) ----
    p1 = im2col(x_ref[0], Cin)                                      # (9*Cin, H*W) bf16
    a1 = jnp.dot(w1_ref[...], p1, preferred_element_type=jnp.float32)
    a1 = jnp.maximum(a1 + b1_ref[...], 0.0)                         # f32 epilogue

    # Stage-1 result stays on-chip: write interior of the padded VMEM scratch.
    mid_ref[...] = jnp.zeros(mid_ref.shape, jnp.float32)
    mid_ref[:, 1:1 + H, 1:1 + W] = a1.reshape(Cmid, H, W)

    # ---- stage 2: conv2 + bn2 + relu ----
    m = mid_ref[...].astype(jnp.bfloat16)                           # bf16 MXU input
    p2 = im2col(m, Cmid)                                            # (9*Cmid, H*W)
    a2 = jnp.dot(w2_ref[...], p2, preferred_element_type=jnp.float32)
    a2 = jnp.maximum(a2 + b2_ref[...], 0.0)
    o_ref[0] = a2.astype(o_ref.dtype)                               # unmasked lane-dense store


def vgg_block_forward(x_nchw, w1t, b1, w2t, b2):
    """x_nchw: (N,Cin,H,W) f32; w1t:(Cmid,9*Cin) bf16; w2t:(Cout,9*Cmid) bf16."""
    N, Cin, H, W = x_nchw.shape
    Cmid = w1t.shape[0]
    Cout = w2t.shape[0]
    Hp, Wp = H + 2, W + 2

    x_pad = jnp.pad(x_nchw, ((0, 0), (0, 0), (1, 1), (1, 1))).astype(jnp.bfloat16)
    b1c = b1.reshape(Cmid, 1).astype(jnp.float32)
    b2c = b2.reshape(Cout, 1).astype(jnp.float32)

    out = pl.pallas_call(
        _vgg_block_kernel,
        out_shape=jax.ShapeDtypeStruct((N, Cout, H * W), jnp.float32),
        grid=(N,),
        in_specs=[
            pl.BlockSpec((1, Cin, Hp, Wp), lambda n: (n, 0, 0, 0)),
            pl.BlockSpec((Cmid, 9 * Cin), lambda n: (0, 0)),
            pl.BlockSpec((Cmid, 1), lambda n: (0, 0)),
            pl.BlockSpec((Cout, 9 * Cmid), lambda n: (0, 0)),
            pl.BlockSpec((Cout, 1), lambda n: (0, 0)),
        ],
        out_specs=pl.BlockSpec((1, Cout, H * W), lambda n: (n, 0, 0)),
        scratch_shapes=[pltpu.VMEM((Cmid, Hp, Wp), jnp.float32)],
        compiler_params=pltpu.CompilerParams(dimension_semantics=("parallel",)),
    )(x_pad, w1t, b1c, w2t, b2c)

    # (N, Cout, H*W) -> NCHW; pure reshape, no transpose needed.
    return out.reshape(N, Cout, H, W)


# ----------------------------------------------------------------------------
# BN folding + module wrapper
# ----------------------------------------------------------------------------
def fold_bn(w_hwio, bias, gamma, beta, mean, var, eps=1e-5):
    """Fold inference-mode BatchNorm2d into conv weights/bias (f32)."""
    scale = gamma / jnp.sqrt(var + eps)
    return w_hwio * scale[None, None, None, :], (bias - mean) * scale + beta


class VGGBlock:
    """Pallas port of VGGBlock(in_channels, middle_channels, out_channels)."""

    def __init__(self, in_channels, middle_channels, out_channels, key):
        ks = jax.random.split(key, 12)

        def conv_w(k, cin, cout):
            fan_in = 9.0 * cin
            return jax.random.normal(k, (3, 3, cin, cout), jnp.float32) / jnp.sqrt(fan_in)

        # conv1 / bn1
        self.w1 = conv_w(ks[0], in_channels, middle_channels)
        self.b1 = 0.01 * jax.random.normal(ks[1], (middle_channels,), jnp.float32)
        self.g1 = 1.0 + 0.1 * jax.random.normal(ks[2], (middle_channels,), jnp.float32)
        self.be1 = 0.1 * jax.random.normal(ks[3], (middle_channels,), jnp.float32)
        self.m1 = 0.1 * jax.random.normal(ks[4], (middle_channels,), jnp.float32)
        self.v1 = jnp.abs(jax.random.normal(ks[5], (middle_channels,), jnp.float32)) + 0.5
        # conv2 / bn2
        self.w2 = conv_w(ks[6], middle_channels, out_channels)
        self.b2 = 0.01 * jax.random.normal(ks[7], (out_channels,), jnp.float32)
        self.g2 = 1.0 + 0.1 * jax.random.normal(ks[8], (out_channels,), jnp.float32)
        self.be2 = 0.1 * jax.random.normal(ks[9], (out_channels,), jnp.float32)
        self.m2 = 0.1 * jax.random.normal(ks[10], (out_channels,), jnp.float32)
        self.v2 = jnp.abs(jax.random.normal(ks[11], (out_channels,), jnp.float32)) + 0.5

    def _folded(self):
        w1f, b1f = fold_bn(self.w1, self.b1, self.g1, self.be1, self.m1, self.v1)
        w2f, b2f = fold_bn(self.w2, self.b2, self.g2, self.be2, self.m2, self.v2)
        return w1f, b1f, w2f, b2f

    def __call__(self, x_nchw):
        w1f, b1f, w2f, b2f = self._folded()
        Cin, Cmid = w1f.shape[2], w1f.shape[3]
        Cout = w2f.shape[3]
        # (3,3,Ci,Co) -> (Co, 9*Ci) with K index (dy*3+dx)*Ci + c; bf16 MXU weights.
        w1t = jnp.transpose(w1f, (3, 0, 1, 2)).reshape(Cmid, 9 * Cin).astype(jnp.bfloat16)
        w2t = jnp.transpose(w2f, (3, 0, 1, 2)).reshape(Cout, 9 * Cmid).astype(jnp.bfloat16)
        return vgg_block_forward(x_nchw, w1t, b1f, w2t, b2f)

    # Pure-JAX reference (lax.conv, same bf16 matmul inputs / f32 accumulation).
    def reference(self, x_nchw):
        w1f, b1f, w2f, b2f = self._folded()

        def conv_bn_relu(x, w, b):
            y = lax.conv_general_dilated(
                x.astype(jnp.bfloat16), w.astype(jnp.bfloat16),
                window_strides=(1, 1), padding="SAME",
                dimension_numbers=("NCHW", "HWIO", "NCHW"),
                preferred_element_type=jnp.float32)
            return jnp.maximum(y + b[None, :, None, None], 0.0)

        return conv_bn_relu(conv_bn_relu(x_nchw, w1f, b1f), w2f, b2f)


if __name__ == "__main__":
    key = jax.random.PRNGKey(0)
    k_params, k_x = jax.random.split(key)

    N, Cin, Cmid, Cout, H, W = 2, 4, 8, 4, 16, 16
    x = jax.random.normal(k_x, (N, Cin, H, W), jnp.float32)

    block = VGGBlock(Cin, Cmid, Cout, k_params)

    out = block(x)
    jax.block_until_ready(out)

    ref = block.reference(x)
    jax.block_until_ready(ref)

    assert out.shape == (N, Cout, H, W), out.shape
    err = float(jnp.max(jnp.abs(out - ref)))
    assert err < 2e-2, f"max abs err {err}"

    print("KERNEL_OK")
</pallas_src>

<mosaic_0001>
module attributes {stable_mosaic.version = 11 : i64} {
  func.func @_vgg_block_kernel(%arg0: i32, %arg1: memref<1x4x18x18xbf16, #tpu.memory_space<vmem>>, %arg2: memref<8x36xbf16, #tpu.memory_space<vmem>>, %arg3: memref<8x1xf32, #tpu.memory_space<vmem>>, %arg4: memref<4x72xbf16, #tpu.memory_space<vmem>>, %arg5: memref<4x1xf32, #tpu.memory_space<vmem>>, %arg6: memref<1x4x256xf32, #tpu.memory_space<vmem>>, %arg7: memref<8x18x18xf32, #tpu.memory_space<vmem>>) attributes {dimension_semantics = [#tpu.dimension_semantics<parallel>], iteration_bounds = array<i64: 2>, scalar_prefetch = 0 : i64, scratch_operands = 1 : i64, tpu.core_type = #tpu.core_type<tc>, window_params = [{transform_indices = @transform_0, window_bounds = array<i64: 1, 4, 18, 18>}, {pipeline_mode = #tpu.pipeline_mode<synchronous>, transform_indices = @transform_1, window_bounds = array<i64: 8, 36>}, {pipeline_mode = #tpu.pipeline_mode<synchronous>, transform_indices = @transform_2, window_bounds = array<i64: 8, 1>}, {pipeline_mode = #tpu.pipeline_mode<synchronous>, transform_indices = @transform_3, window_bounds = array<i64: 4, 72>}, {pipeline_mode = #tpu.pipeline_mode<synchronous>, transform_indices = @transform_4, window_bounds = array<i64: 4, 1>}, {transform_indices = @transform_5, window_bounds = array<i64: 1, 4, 256>}]} {
    %c0 = arith.constant 0 : index
    %c0_0 = arith.constant 0 : index
    %c0_1 = arith.constant 0 : index
    %c0_2 = arith.constant 0 : index
    %0 = vector.load %arg1[%c0, %c0_0, %c0_1, %c0_2] : memref<1x4x18x18xbf16, #tpu.memory_space<vmem>>, vector<1x4x18x18xbf16>
    %1 = vector.shape_cast %0 : vector<1x4x18x18xbf16> to vector<4x18x18xbf16>
    %2 = vector.extract_strided_slice %1 {offsets = [0, 0, 0], sizes = [4, 16, 16], strides = [1, 1, 1]} : vector<4x18x18xbf16> to vector<4x16x16xbf16>
    %3 = vector.shape_cast %2 : vector<4x16x16xbf16> to vector<4x256xbf16>
    %4 = vector.extract_strided_slice %1 {offsets = [0, 0, 1], sizes = [4, 16, 16], strides = [1, 1, 1]} : vector<4x18x18xbf16> to vector<4x16x16xbf16>
    %5 = vector.shape_cast %4 : vector<4x16x16xbf16> to vector<4x256xbf16>
    %6 = vector.extract_strided_slice %1 {offsets = [0, 0, 2], sizes = [4, 16, 16], strides = [1, 1, 1]} : vector<4x18x18xbf16> to vector<4x16x16xbf16>
    %7 = vector.shape_cast %6 : vector<4x16x16xbf16> to vector<4x256xbf16>
    %8 = vector.extract_strided_slice %1 {offsets = [0, 1, 0], sizes = [4, 16, 16], strides = [1, 1, 1]} : vector<4x18x18xbf16> to vector<4x16x16xbf16>
    %9 = vector.shape_cast %8 : vector<4x16x16xbf16> to vector<4x256xbf16>
    %10 = vector.extract_strided_slice %1 {offsets = [0, 1, 1], sizes = [4, 16, 16], strides = [1, 1, 1]} : vector<4x18x18xbf16> to vector<4x16x16xbf16>
    %11 = vector.shape_cast %10 : vector<4x16x16xbf16> to vector<4x256xbf16>
    %12 = vector.extract_strided_slice %1 {offsets = [0, 1, 2], sizes = [4, 16, 16], strides = [1, 1, 1]} : vector<4x18x18xbf16> to vector<4x16x16xbf16>
    %13 = vector.shape_cast %12 : vector<4x16x16xbf16> to vector<4x256xbf16>
    %14 = vector.extract_strided_slice %1 {offsets = [0, 2, 0], sizes = [4, 16, 16], strides = [1, 1, 1]} : vector<4x18x18xbf16> to vector<4x16x16xbf16>
    %15 = vector.shape_cast %14 : vector<4x16x16xbf16> to vector<4x256xbf16>
    %16 = vector.extract_strided_slice %1 {offsets = [0, 2, 1], sizes = [4, 16, 16], strides = [1, 1, 1]} : vector<4x18x18xbf16> to vector<4x16x16xbf16>
    %17 = vector.shape_cast %16 : vector<4x16x16xbf16> to vector<4x256xbf16>
    %18 = vector.extract_strided_slice %1 {offsets = [0, 2, 2], sizes = [4, 16, 16], strides = [1, 1, 1]} : vector<4x18x18xbf16> to vector<4x16x16xbf16>
    %19 = vector.shape_cast %18 : vector<4x16x16xbf16> to vector<4x256xbf16>
    %20 = tpu.concatenate %3, %5, %7, %9, %11, %13, %15, %17, %19 in 0 : vector<4x256xbf16>, vector<4x256xbf16>, vector<4x256xbf16>, vector<4x256xbf16>, vector<4x256xbf16>, vector<4x256xbf16>, vector<4x256xbf16>, vector<4x256xbf16>, vector<4x256xbf16> -> vector<36x256xbf16>
    %c0_3 = arith.constant 0 : index
    %c0_4 = arith.constant 0 : index
    %21 = vector.load %arg2[%c0_3, %c0_4] : memref<8x36xbf16, #tpu.memory_space<vmem>>, vector<8x36xbf16>
    %cst = arith.constant dense<0.000000e+00> : vector<8x256xf32>
    %22 = tpu.matmul %21, %20, %cst {dimension_numbers = #tpu.dot_dimension_numbers<[1], [0], [0], [1], [0, 0, 1, 1], [], []>} : vector<8x36xbf16>, vector<36x256xbf16>, vector<8x256xf32> -> vector<8x256xf32>
    %c0_5 = arith.constant 0 : index
    %c0_6 = arith.constant 0 : index
    %23 = vector.load %arg3[%c0_5, %c0_6] : memref<8x1xf32, #tpu.memory_space<vmem>>, vector<8x1xf32>
    %24 = vector.broadcast %23 : vector<8x1xf32> to vector<8x256xf32>
    %25 = arith.addf %22, %24 : vector<8x256xf32>
    %cst_7 = arith.constant 0.000000e+00 : f32
    %26 = vector.broadcast %cst_7 : f32 to vector<8x256xf32>
    %27 = arith.maximumf %25, %26 : vector<8x256xf32>
    %cst_8 = arith.constant 0.000000e+00 : f32
    %28 = vector.broadcast %cst_8 : f32 to vector<8x18x18xf32>
    %c0_9 = arith.constant 0 : index
    %c0_10 = arith.constant 0 : index
    %c0_11 = arith.constant 0 : index
    %29 = vector.load %arg7[%c0_9, %c0_10, %c0_11] : memref<8x18x18xf32, #tpu.memory_space<vmem>>, vector<8x18x18xf32>
    tpu.vector_store %arg7[%c0_9, %c0_10, %c0_11], %28 {strides = array<i32>} : memref<8x18x18xf32, #tpu.memory_space<vmem>>, vector<8x18x18xf32>,
    %30 = vector.shape_cast %27 : vector<8x256xf32> to vector<8x16x16xf32>
    %c0_12 = arith.constant 0 : index
    %c1 = arith.constant 1 : index
    %c1_13 = arith.constant 1 : index
    %31 = vector.load %arg7[%c0_12, %c1, %c1_13] : memref<8x18x18xf32, #tpu.memory_space<vmem>>, vector<8x16x16xf32>
    tpu.vector_store %arg7[%c0_12, %c1, %c1_13], %30 {strides = array<i32>} : memref<8x18x18xf32, #tpu.memory_space<vmem>>, vector<8x16x16xf32>,
    %c0_14 = arith.constant 0 : index
    %c0_15 = arith.constant 0 : index
    %c0_16 = arith.constant 0 : index
    %32 = vector.load %arg7[%c0_14, %c0_15, %c0_16] : memref<8x18x18xf32, #tpu.memory_space<vmem>>, vector<8x18x18xf32>
    %33 = arith.truncf %32 : vector<8x18x18xf32> to vector<8x18x18xbf16>
    %34 = vector.extract_strided_slice %33 {offsets = [0, 0, 0], sizes = [8, 16, 16], strides = [1, 1, 1]} : vector<8x18x18xbf16> to vector<8x16x16xbf16>
    %35 = vector.shape_cast %34 : vector<8x16x16xbf16> to vector<8x256xbf16>
    %36 = vector.extract_strided_slice %33 {offsets = [0, 0, 1], sizes = [8, 16, 16], strides = [1, 1, 1]} : vector<8x18x18xbf16> to vector<8x16x16xbf16>
    %37 = vector.shape_cast %36 : vector<8x16x16xbf16> to vector<8x256xbf16>
    %38 = vector.extract_strided_slice %33 {offsets = [0, 0, 2], sizes = [8, 16, 16], strides = [1, 1, 1]} : vector<8x18x18xbf16> to vector<8x16x16xbf16>
    %39 = vector.shape_cast %38 : vector<8x16x16xbf16> to vector<8x256xbf16>
    %40 = vector.extract_strided_slice %33 {offsets = [0, 1, 0], sizes = [8, 16, 16], strides = [1, 1, 1]} : vector<8x18x18xbf16> to vector<8x16x16xbf16>
    %41 = vector.shape_cast %40 : vector<8x16x16xbf16> to vector<8x256xbf16>
    %42 = vector.extract_strided_slice %33 {offsets = [0, 1, 1], sizes = [8, 16, 16], strides = [1, 1, 1]} : vector<8x18x18xbf16> to vector<8x16x16xbf16>
    %43 = vector.shape_cast %42 : vector<8x16x16xbf16> to vector<8x256xbf16>
    %44 = vector.extract_strided_slice %33 {offsets = [0, 1, 2], sizes = [8, 16, 16], strides = [1, 1, 1]} : vector<8x18x18xbf16> to vector<8x16x16xbf16>
    %45 = vector.shape_cast %44 : vector<8x16x16xbf16> to vector<8x256xbf16>
    %46 = vector.extract_strided_slice %33 {offsets = [0, 2, 0], sizes = [8, 16, 16], strides = [1, 1, 1]} : vector<8x18x18xbf16> to vector<8x16x16xbf16>
    %47 = vector.shape_cast %46 : vector<8x16x16xbf16> to vector<8x256xbf16>
    %48 = vector.extract_strided_slice %33 {offsets = [0, 2, 1], sizes = [8, 16, 16], strides = [1, 1, 1]} : vector<8x18x18xbf16> to vector<8x16x16xbf16>
    %49 = vector.shape_cast %48 : vector<8x16x16xbf16> to vector<8x256xbf16>
    %50 = vector.extract_strided_slice %33 {offsets = [0, 2, 2], sizes = [8, 16, 16], strides = [1, 1, 1]} : vector<8x18x18xbf16> to vector<8x16x16xbf16>
    %51 = vector.shape_cast %50 : vector<8x16x16xbf16> to vector<8x256xbf16>
    %52 = tpu.concatenate %35, %37, %39, %41, %43, %45, %47, %49, %51 in 0 : vector<8x256xbf16>, vector<8x256xbf16>, vector<8x256xbf16>, vector<8x256xbf16>, vector<8x256xbf16>, vector<8x256xbf16>, vector<8x256xbf16>, vector<8x256xbf16>, vector<8x256xbf16> -> vector<72x256xbf16>
    %c0_17 = arith.constant 0 : index
    %c0_18 = arith.constant 0 : index
    %53 = vector.load %arg4[%c0_17, %c0_18] : memref<4x72xbf16, #tpu.memory_space<vmem>>, vector<4x72xbf16>
    %cst_19 = arith.constant dense<0.000000e+00> : vector<4x256xf32>
    %54 = tpu.matmul %53, %52, %cst_19 {dimension_numbers = #tpu.dot_dimension_numbers<[1], [0], [0], [1], [0, 0, 1, 1], [], []>} : vector<4x72xbf16>, vector<72x256xbf16>, vector<4x256xf32> -> vector<4x256xf32>
    %c0_20 = arith.constant 0 : index
    %c0_21 = arith.constant 0 : index
    %55 = vector.load %arg5[%c0_20, %c0_21] : memref<4x1xf32, #tpu.memory_space<vmem>>, vector<4x1xf32>
    %56 = vector.broadcast %55 : vector<4x1xf32> to vector<4x256xf32>
    %57 = arith.addf %54, %56 : vector<4x256xf32>
    %cst_22 = arith.constant 0.000000e+00 : f32
    %58 = vector.broadcast %cst_22 : f32 to vector<4x256xf32>
    %59 = arith.maximumf %57, %58 : vector<4x256xf32>
    %c0_23 = arith.constant 0 : index
    %c0_24 = arith.constant 0 : index
    %c0_25 = arith.constant 0 : index
    %60 = vector.load %arg6[%c0_23, %c0_24, %c0_25] : memref<1x4x256xf32, #tpu.memory_space<vmem>>, vector<1x4x256xf32>
    %61 = vector.shape_cast %60 : vector<1x4x256xf32> to vector<4x256xf32>
    %62 = vector.shape_cast %59 : vector<4x256xf32> to vector<1x4x256xf32>
    tpu.vector_store %arg6[%c0_23, %c0_24, %c0_25], %62 {strides = array<i32>} : memref<1x4x256xf32, #tpu.memory_space<vmem>>, vector<1x4x256xf32>,
    return
  }
  func.func @transform_0(%arg0: i32) -> (i32, i32, i32, i32) {
    %c0_i32 = arith.constant 0 : i32
    %c0_i32_0 = arith.constant 0 : i32
    %c0_i32_1 = arith.constant 0 : i32
    %c0_i32_2 = arith.constant 0 : i32
    return %arg0, %c0_i32, %c0_i32_0, %c0_i32_1 : i32, i32, i32, i32
  }
  func.func @transform_1(%arg0: i32) -> (i32, i32) {
    %c0_i32 = arith.constant 0 : i32
    %c0_i32_0 = arith.constant 0 : i32
    %c0_i32_1 = arith.constant 0 : i32
    return %c0_i32, %c0_i32_0 : i32, i32
  }
  func.func @transform_2(%arg0: i32) -> (i32, i32) {
    %c0_i32 = arith.constant 0 : i32
    %c0_i32_0 = arith.constant 0 : i32
    %c0_i32_1 = arith.constant 0 : i32
    return %c0_i32, %c0_i32_0 : i32, i32
  }
  func.func @transform_3(%arg0: i32) -> (i32, i32) {
    %c0_i32 = arith.constant 0 : i32
    %c0_i32_0 = arith.constant 0 : i32
    %c0_i32_1 = arith.constant 0 : i32
    return %c0_i32, %c0_i32_0 : i32, i32
  }
  func.func @transform_4(%arg0: i32) -> (i32, i32) {
    %c0_i32 = arith.constant 0 : i32
    %c0_i32_0 = arith.constant 0 : i32
    %c0_i32_1 = arith.constant 0 : i32
    return %c0_i32, %c0_i32_0 : i32, i32
  }
  func.func @transform_5(%arg0: i32) -> (i32, i32, i32) {
    %c0_i32 = arith.constant 0 : i32
    %c0_i32_0 = arith.constant 0 : i32
    %c0_i32_1 = arith.constant 0 : i32
    return %arg0, %c0_i32, %c0_i32_0 : i32, i32, i32
  }
}

</mosaic_0001>

<bundles_post_ra>
// kernel: tpu_custom_call.1
= control target key start
LH: loop header
LB: loop body
LE: loop exit
PB: predicated region body
PF: predicated region fallthrough
CT: control target
= control target key end

     0   :  { %10 = vsyncpa [#allocation4], 0  ;;  %s10060_s0 = inlined_call_operand.vmem [shape: bf16[2,4,18,18], index: 0, kind: input, shape index: {}]   ;;  %s10061_s1 = inlined_call_operand.vmem [shape: bf16[8,36], index: 1, kind: input, shape index: {}]   ;;  %s10062_s2 = inlined_call_operand.vmem [shape: f32[8,1], index: 2, kind: input, shape index: {}]   ;;  %s10063_s3 = inlined_call_operand.vmem [shape: bf16[4,72], index: 3, kind: input, shape index: {}]   ;;  %s10064_s4 = inlined_call_operand.vmem [shape: f32[4,1], index: 4, kind: input, shape index: {}]   ;;  %s10065_s5 = inlined_call_operand.hbm [shape: f32[2,4,256], index: 5, kind: output, shape index: {}]  }
   0x1   :  { %12 = vsyncpa [#allocation4 + $0x1], 0  ;;  %s6324_s18 = smov 0   ;;  %s6326_s19 = smov 0  }
   0x2   :  { %s6328_s20 = smov 0   ;;  %s6330_s21 = smov 0  }
   0x3 LB: > { %s6345_s22 = sadd.s32 4294967295, %s6277_s21   ;;  %s5936_s23 = sadd.s32 4294967294, %s6277_s21   ;;  %s6277_s21 = sphi %s6330_s21, %s10395_s21   ;;  %s6273_s20 = sphi %s6328_s20, %s10394_s20   ;;  %s6269_s19 = sphi %s6326_s19, %s10393_s19   ;;  %s6265_s18 = sphi %s6324_s18, %s10392_s18  }
   0x4   : > { %s6349_s24 = sadd.s32 1, %s6277_s21   ;;  %s135_s25 = sadd.s32 1, %s6273_s20 }
   0x5   : > { %s132_s26 = ssub.s32 %s6277_s21, %s6349_s24  ;;  %p145_p0 = scmp.ne.s32.totalorder %s6273_s20, %s6269_s19 }
   0x6   : > { %p133_p1 = scmp.eq.s32.totalorder %s132_s26, 0  ;;  %p146_p2 = scmp.eq.s32.totalorder %s6345_s22, 1 }
   0x7   : > { %p151_p3 = scmp.ne.s32.totalorder %s6269_s19, %s6265_s18  ;;  %p152_p4 = scmp.eq.s32.totalorder %s5936_s23, 1 }
   0x8   : > { %s6360_s27 = scalar_select %p133_p1, %s6273_s20, %s135_s25  }
   0x9   : > { %p6362_p5 = por %p146_p2, %p145_p0  ;;  %p6366_p6 = por %p152_p4, %p151_p3 }
   0xa   : > { %p5939_p7 = scmp.ge.s32.totalorder %s6277_s21, 1  ;;  %p190_p8 = scmp.lt.s32.totalorder %s6277_s21, 3 }
   0xc   : > { %p191_p9 = pnand %p5939_p7, %p190_p8 }
   0xe   : > { %194 = sbr.rel (%p191_p9) target bundleno = 1763 (0x6e3), region = 40 }
  0x13   : > { %p218_p10 = scmp.lt.s32.totalorder %s6345_s22, 1  ;;  %vm1962_vm0 = vcmask 1042432   ;;  %vm1963_vm1 = vcmask 1046532   ;;  %vm1063_vm3 = vsmask.f32 3328  ;;  %s6279_s10 = smov 126  }
  0x14   : > { %vm6379_vm2 = vmor %vm1962_vm0, %vm1963_vm1  ;;  %vm1064_vm4 = vsmask.f32 7440  ;;  %s6280_s11 = smov 127   ;;  %v6281_v0 = vmov 1983009808   ;;  %s6283_s12 = smov 16  }
  0x15   : > { %s219_s30 = scalar_select %p218_p10, %s6345_s22, 1  ;;  %vm6444_vm5 = vmor %vm1063_vm3, %vm1064_vm4  ;;  %vm466_vm6 = vcmask 130048   ;;  %vm470_vm7 = vcmask 261120   ;;  %vm476_vm8 = vcmask 523264   ;;  %vm473_vm9 = vcmask 392192  }
  0x16   : > { %s6284_s13 = smov 32   ;;  %s6285_s14 = smov 48   ;;  %vm479_vm10 = vcmask 654336   ;;  %vm482_vm11 = vcmask 785408   ;;  %vm485_vm12 = vcmask 916480   ;;  %vm2829_vm13 = vcmask 1041408  }
  0x17   : > { %s6154_s6 = smul.u32 48, %s219_s30  ;;  %s6286_s15 = smov 64   ;;  %vm2834_vm14 = vcmask 1043456   ;;  %vm2839_vm15 = vcmask 1045504   ;;  %vm2867_vm0 = vcmask 293888   ;;  %vm2918_vm1 = vcmask 146432  }
  0x18   : > { %s6287_s16 = smov 96   ;;  %s6288_s17 = smov 80   ;;  %vm3324_vm3 = vcmask 138248   ;;  %vm4982_vm4 = vcmask 1046528  }
  0x19   : > { %s6377_s9 = scalar_lea.vmem %s10060_s0, %s6154_s6  ;;  %s6289_s23 = smov 112  }
  0x1a   : > { %v6384_v1 = vld [vmem:[%s6377_s9 + $0x4] sm:$0xf]  ;;  %v226_v2 = vld [vmem:[%s6377_s9 + $0x8] sm:$0x1]  ;;  %v6388_v3 = vld [vmem:[%s6377_s9] sm:$0xf] }
  0x1b   : > { %10139 = vst [vmem:[#allocation6_spill] sm:$0xff] %v6384_v1  ;;  %v1967_v4 = vrot.slane %v6384_v1, 5  ;;  %v1970_v5 = vrot.slane %v226_v2, 5  ;;  %v6026_v6 = vrot.slane %v6388_v3, 9  ;;  %v6393_v7 = vld [vmem:[%s6377_s9 + $0x1c] sm:$0xf] }
  0x1c   : > { %10140 = vst [vmem:[#allocation7_spill] sm:$0xff] %v6393_v7  ;;  %v10069_v8 = vshrl.u32 %v6384_v1, 16  ;;  %v6397_v9 = vld [vmem:[%s6377_s9 + $0x20] sm:$0x1]  ;;  %v10067_v10 = vshrl.u32 %v6393_v7, 16  ;;  %v1113_v11 = vshll.u32 %v6393_v7, 16 }
  0x1d   : > { %v1073_v12 = vshll.u32 %v6384_v1, 16  ;;  %v1082_v13 = vshll.u32 %v226_v2, 16  ;;  %v1969_v14 = vrot.slane %v1967_v4, 4  ;;  %v6404_v15 = vsel %vm6379_vm2, %v6026_v6, %v1967_v4  ;;  %v6410_v18 = vld [vmem:[%s6377_s9 + $0x28] sm:$0xf]  ;;  %s6292_s7 = smov 1  }
  0x1e   : > { %v1122_v16 = vshll.u32 %v6397_v9, 16  ;;  %v1078_v17 = vrot.slane %v10069_v8, 4  ;;  %10141 = vst [vmem:[#allocation8_spill] sm:$0xff] %v6410_v18  ;;  %2529 = vrot.lane.b32.xlu0 %v6404_v15, %s6279_s10  ;;  %v6414_v19 = vrot.slane %v1113_v11, 5  ;;  %v1118_v20 = vrot.slane %v10067_v10, 4  ;;  %s6293_s6 = smov [#allocation3]  }
  0x1f   : > { %v6418_v21 = vrot.slane %v1073_v12, 5  ;;  %v6421_v22 = vld [vmem:[%s6377_s9 + $0x2c] sm:$0x1]  ;;  %v6425_v23 = vsel %vm6379_vm2, %v1969_v14, %v1970_v5  ;;  %v10066_v25 = vshrl.u32 %v6410_v18, 16  ;;  %v6429_v26 = vld [vmem:[%s6377_s9 + $0x10] sm:$0xf] }
  0x20   : > { %v1124_v24 = vrot.slane %v1122_v16, 5  ;;  %10142 = vst [vmem:[#allocation9_spill] sm:$0xff] %v6429_v26  ;;  %2531 = vrot.lane.b32.xlu1 %v6425_v23, %s6279_s10  ;;  %v1119_v27 = vor.u32 %v1118_v20, %v6414_v19  ;;  %v1084_v29 = vrot.slane %v1082_v13, 5  ;;  %v1133_v30 = vshll.u32 %v6410_v18, 16  ;;  %v6437_v31 = vld [vmem:[%s6377_s9 + $0x14] sm:$0x1] }
  0x21   : > { %v1079_v28 = vor.u32 %v1078_v17, %v6418_v21  ;;  %v6440_v32 = vld [vmem:[%s6377_s9 + $0xc] sm:$0xf]  ;;  %v1138_v34 = vrot.slane %v10066_v25, 4  ;;  %v1142_v35 = vshll.u32 %v6421_v22, 16  ;;  %v10068_v36 = vshrl.u32 %v6429_v26, 16 }
  0x22   : > { %v1093_v37 = vshll.u32 %v6429_v26, 16  ;;  %v1120_v38 = vrot.slane %v1119_v27, 4  ;;  %v6453_v40 = vrot.slane %v1133_v30, 5  ;;  %v1102_v41 = vshll.u32 %v6437_v31, 16  ;;  %v6469_v50 = vld [vmem:[%s6377_s9 + $0x24] sm:$0xf] }
  0x23   : > { %v1080_v39 = vrot.slane %v1079_v28, 4  ;;  %v1144_v42 = vrot.slane %v1142_v35, 5  ;;  %v1098_v44 = vrot.slane %v10068_v36, 4  ;;  %v240_v45 = vshrl.u32 %v6440_v32, 16  ;;  %v6472_v51 = vld [vmem:[%s6377_s9 + $0x18] sm:$0xf] }
  0x24   : > { %v1095_v43 = vrot.slane %v1093_v37, 5  ;;  %v6461_v46 = vsel %vm6444_vm5, %v1120_v38, %v1124_v24  ;;  %v1139_v48 = vor.u32 %v1138_v34, %v6453_v40  ;;  %v1104_v49 = vrot.slane %v1102_v41, 5 }
  0x25   : > { %v6465_v47 = vsel %vm6444_vm5, %v1080_v39, %v1084_v29  ;;  %v1167_v52 = vshrl.u32 %v6461_v46, 16  ;;  %1692 = vrot.lane.b32.xlu1 %v6461_v46, %s6279_s10  ;;  %v1087_v55 = vrot.slane %v240_v45, 4  ;;  %v1088_v57 = vshll.u32 %v6440_v32, 16 }
  0x26   : > { %v1161_v53 = vshrl.u32 %v6465_v47, 16  ;;  %1684 = vrot.lane.b32.xlu0 %v6465_v47, %s6279_s10  ;;  %v1099_v54 = vor.u32 %v1098_v44, %v1095_v43  ;;  %v1140_v56 = vrot.slane %v1139_v48, 4  ;;  %v239_v58 = vshrl.u32 %v6388_v3, 16 }
  0x27   : > { %v1068_v59 = vshll.u32 %v6388_v3, 16  ;;  %v246_v61 = vshrl.u32 %v6469_v50, 16  ;;  %v1128_v62 = vshll.u32 %v6469_v50, 16  ;;  %v245_v63 = vshrl.u32 %v6472_v51, 16 }
  0x28   : > { %v1100_v60 = vrot.slane %v1099_v54, 4  ;;  %v6488_v2 = vsel %vm6444_vm5, %v1140_v56, %v1144_v42  ;;  %v1090_v4 = vrot.slane %v1088_v57, 5  ;;  %v1067_v5 = vrot.slane %v239_v58, 4 }
  0x29   : > { %v1070_v6 = vrot.slane %v1068_v59, 5  ;;  %v1168_v12 = vshrl.u32 %v6488_v2, 16  ;;  %1696 = vrot.lane.b32.xlu1 %v6488_v2, %s6279_s10  ;;  %v6499_v14 = vpack.i.b16 %v240_v45, %v239_v58  ;;  %v1127_v28 = vrot.slane %v246_v61, 4 }
  0x2a   : > { %v6497_v13 = vsel %vm6444_vm5, %v1100_v60, %v1104_v49  ;;  %v1091_v20 = vor.u32 %v1090_v4, %v1087_v55  ;;  %v1130_v29 = vrot.slane %v1128_v62, 5  ;;  %v6510_v38 = vpack.i.b16 %v246_v61, %v245_v63 }
  0x2b   : > { %10145 = vst [vmem:[#allocation10_spill] sm:$0xff] %v6499_v14  ;;  %v1162_v17 = vshrl.u32 %v6497_v13, 16  ;;  %1688 = vrot.lane.b32.xlu0 %v6497_v13, %s6279_s10  ;;  %v1071_v24 = vor.u32 %v1070_v6, %v1067_v5  ;;  %v6506_v27 = vpack.i.b16 %v1168_v12, %v1167_v52  ;;  %v1107_v42 = vrot.slane %v245_v63, 4 }
  0x2c   : > { %v1092_v34 = vrot.slane %v1091_v20, 4  ;;  %v1131_v37 = vor.u32 %v1130_v29, %v1127_v28  ;;  %10146 = vst [vmem:[#allocation11_spill] sm:$0xff] %v6510_v38  ;;  %v1108_v44 = vshll.u32 %v6472_v51, 16  ;;  %v1981_v56 = vrot.slane %v6393_v7, 5 }
  0x2d   : > { %v6508_v30 = vpack.i.b16 %v1162_v17, %v1161_v53  ;;  %v1072_v35 = vrot.slane %v1071_v24, 4  ;;  %v1977_v53 = vrot.slane %v6437_v31, 5  ;;  %v2008_v59 = vshrl.u32 %v6425_v23, 16 }
  0x2e   : > { %v6514_v39 = vsel %vm6444_vm5, %v1092_v34, %v1095_v43  ;;  %v1132_v49 = vrot.slane %v1131_v37, 4  ;;  %v1110_v52 = vrot.slane %v1108_v44, 5  ;;  %v6027_v60 = vrot.slane %v6440_v32, 9 }
  0x2f   : > { %10147 = vst [vmem:[#allocation12_spill] sm:$0xff] %v6514_v39  ;;  %v6519_v41 = vsel %vm6444_vm5, %v1072_v35, %v6418_v21  ;;  %v1150_v45 = vshrl.u32 %v6514_v39, 16  ;;  %1686 = vrot.lane.b32.xlu1 %v6514_v39, %s6279_s10  ;;  %v1974_v21 = vrot.slane %v6429_v26, 5  ;;  %v1983_v62 = vrot.slane %v1981_v56, 4 }
  0x30   : > { %10148 = vst [vmem:[#allocation13_spill] sm:$0xff] %v6519_v41  ;;  %1682 = vrot.lane.b32.xlu0 %v6519_v41, %s6279_s10  ;;  %v1149_v48 = vshrl.u32 %v6519_v41, 16  ;;  %v6537_v55 = vsel %vm6444_vm5, %v1132_v49, %v6453_v40  ;;  %v1111_v57 = vor.u32 %v1110_v52, %v1107_v42  ;;  %v1984_v63 = vrot.slane %v6397_v9, 5 }
  0x31   : > { %10149 = vst [vmem:[#allocation14_spill] sm:$0xff] %v6537_v55  ;;  %v1976_v58 = vrot.slane %v1974_v21, 4  ;;  %v1156_v40 = vshrl.u32 %v6537_v55, 16  ;;  %v1988_v12 = vrot.slane %v6410_v18, 5  ;;  %v6565_v24 = vsel %vm6379_vm2, %v6027_v60, %v1974_v21 }
  0x32   : > { %v6532_v54 = vpack.i.b16 %v1150_v45, %v1149_v48  ;;  %v1112_v61 = vrot.slane %v1111_v57, 4  ;;  %v6028_v33 = vrot.slane %v6472_v51, 9  ;;  %v1991_v29 = vrot.slane %v6421_v22, 5 }
  0x33   : > { %1694 = vrot.lane.b32.xlu1 %v6537_v55, %s6279_s10  ;;  %v1978_v31 = vsel %vm6379_vm2, %v1976_v58, %v1977_v53  ;;  %v1990_v28 = vrot.slane %v1988_v12, 4  ;;  %v6029_v42 = vrot.slane %v6469_v50, 9  ;;  %v262_v44 = vunpack.c.l.s4 %v6281_v0 }
  0x34   : > { %v2009_v4 = vshrl.u32 %v1978_v31, 16  ;;  %v2007_v5 = vpack.i.b16 %v1978_v31, %v6425_v23  ;;  %v6552_v6 = vsel %vm6444_vm5, %v1112_v61, %v6414_v19  ;;  %v1985_v19 = vsel %vm6379_vm2, %v1983_v62, %v1984_v63 }
  0x35   : > { %10150 = vst [vmem:[#allocation15_spill] sm:$0xff] %v6552_v6  ;;  %v1155_v20 = vshrl.u32 %v6552_v6, 16  ;;  %1690 = vrot.lane.b32.xlu0 %v6552_v6, %s6279_s10  ;;  %v6578_v35 = vsel %vm6379_vm2, %v6028_v33, %v1981_v56  ;;  %v1992_v37 = vsel %vm6379_vm2, %v1990_v28, %v1991_v29  ;;  %v6588_v22 = vsel %vm6379_vm2, %v6029_v42, %v1988_v12 }
  0x36   : > { %v6561_v9 = vpack.i.b16 %v2009_v4, %v2008_v59  ;;  %v264_v45 = vlaneseq  ;;  %v263_v48 = vunpack.c.0.s8 %v262_v44  ;;  %v2013_v52 = vpack.i.b16 %v1992_v37, %v1985_v19 }
  0x37   : > { %2535 = vrot.lane.b32.xlu1 %v1978_v31, %s6279_s10  ;;  %v6571_v34 = vpack.i.b16 %v1156_v40, %v1155_v20  ;;  %v2014_v57 = vshrl.u32 %v1985_v19, 16  ;;  %v2015_v58 = vshrl.u32 %v1992_v37, 16  ;;  %v1996_v59 = vshrl.u32 %v6404_v15, 16 }
  0x38   : > { %v265_v49 = vshrl.u32 %v264_v45, 7  ;;  %v1997_v60 = vshrl.u32 %v6565_v24, 16  ;;  %v2002_v61 = vshrl.u32 %v6578_v35, 16  ;;  %v6282_v63 = vmov 1934713408  }
  0x39   : > { %2533 = vrot.lane.b32.xlu0 %v6565_v24, %s6279_s10  ;;  %v2016_v62 = vpack.i.b16 %v2015_v58, %v2014_v57  ;;  %v279_v40 = vunpack.c.l.s4 %v6282_v63  ;;  %v1995_v29 = vpack.i.b16 %v6565_v24, %v6404_v15  ;;  %vm2921_vm2 = vcmask 140288  }
  0x3a   : > { %v6607_v21 = vsub.s32 %v263_v48, %v265_v49  ;;  %v1998_v4 = vpack.i.b16 %v1997_v60, %v1996_v59  ;;  %vm4141_vm5 = vsmask.f32 7424 }
  0x3b   : > { %2539 = vrot.lane.b32.xlu1 %v1985_v19, %s6279_s10 }
  0x3c   : > { %10151 = vst [vmem:[#allocation16_spill] sm:$0xff] %v6607_v21  ;;  %v6617_v53 = vrot.slane %v2013_v52, %v6607_v21  ;;  %v6655_v12 = vrot.slane %v6561_v9, %v6607_v21  ;;  %v6658_v20 = vrot.slane %v2016_v62, %v6607_v21  ;;  %v6661_v33 = vrot.slane %v1998_v4, %v6607_v21 }
  0x3d   : > { %2537 = vrot.lane.b32.xlu0 %v6578_v35, %s6279_s10  ;;  %v6681_v44 = vrot.slane %v1995_v29, %v6607_v21 }
  0x3e   : > { %10152 = vst [vmem:[#allocation17_spill] sm:$0xff] %v6661_v33  ;;  %v2135_v9 = vcombine.low %v6655_v12, %v6658_v20 }
  0x3f   : > { %2543 = vrot.lane.b32.xlu1 %v1992_v37, %s6279_s10  ;;  %10155 = vst [vmem:[#allocation20_spill] sm:$0xff] %v6681_v44 }
  0x41   : > { %2541 = vrot.lane.b32.xlu0 %v6588_v22, %s6279_s10 }
  0x43   : > { %1412 = vrot.lane.b32.xlu1 %v6497_v13, %s6280_s11 }
  0x45   : > { %1408 = vrot.lane.b32.xlu0 %v6465_v47, %s6280_s11 }
  0x47   : > { %1420 = vrot.lane.b32.xlu1 %v6488_v2, %s6280_s11 }
  0x49   : > { %1416 = vrot.lane.b32.xlu0 %v6461_v46, %s6280_s11 }
  0x4b   : > { %2259 = vrot.lane.b32.xlu1 %v1978_v31, %s6280_s11  ;;  %v2003_v31 = vshrl.u32 %v6588_v22, 16 }
  0x4d   : > { %2255 = vrot.lane.b32.xlu0 %v6425_v23, %s6280_s11  ;;  %v6614_v23 = vrot.slane %v2007_v5, %v6607_v21  ;;  %v2004_v5 = vpack.i.b16 %v2003_v31, %v2002_v61 }
  0x4f   : > { %2267 = vrot.lane.b32.xlu1 %v1992_v37, %s6280_s11  ;;  %v2101_v56 = vcombine.low %v6614_v23, %v6617_v53  ;;  %v6664_v28 = vrot.slane %v2004_v5, %v6607_v21  ;;  %v2001_v37 = vpack.i.b16 %v6588_v22, %v6578_v35 }
  0x51   : > { %2263 = vrot.lane.b32.xlu0 %v1985_v19, %s6280_s11  ;;  %v280_v19 = vunpack.c.0.s8 %v279_v40  ;;  %10153 = vst [vmem:[#allocation18_spill] sm:$0xff] %v6664_v28  ;;  %v2067_v0 = vcombine.low %v6661_v33, %v6664_v28 }
  0x53   : > { %1410 = vrot.lane.b32.xlu1 %v6514_v39, %s6280_s11  ;;  %v6676_v42 = vsub.s32 %v280_v19, %v265_v49 }
  0x55   : > { %1406 = vrot.lane.b32.xlu0 %v6519_v41, %s6280_s11  ;;  %10154 = vst [vmem:[#allocation19_spill] sm:$0xff] %v6676_v42  ;;  %v6699_v45 = vrot.slane %v2101_v56, %v6676_v42 }
  0x57   : > { %1418 = vrot.lane.b32.xlu1 %v6537_v55, %s6280_s11  ;;  %10157 = vst [vmem:[#allocation22_spill] sm:$0xff] %v6699_v45 }
  0x59   : > { %1414 = vrot.lane.b32.xlu0 %v6552_v6, %s6280_s11 }
  0x5b   : > { %2257 = vrot.lane.b32.xlu1 %v6565_v24, %s6280_s11  ;;  %v2143_v24 = vrot.slane %v2135_v9, %v6676_v42 }
  0x5d   : > { %2253 = vrot.lane.b32.xlu0 %v6404_v15, %s6280_s11  ;;  %v6684_v15 = vrot.slane %v2001_v37, %v6607_v21  ;;  %v6134_v49 = vcombine.high %v2143_v24, %v2143_v24 }
  0x5f   : > { %2265 = vrot.lane.b32.xlu1 %v6588_v22, %s6280_s11  ;;  %10156 = vst [vmem:[#allocation21_spill] sm:$0xff] %v6684_v15  ;;  %v6037_v22 = vcombine.low %v2143_v24, %v2143_v24  ;;  %v2033_v48 = vcombine.low %v6681_v44, %v6684_v15 }
  0x61   : > { %2261 = vrot.lane.b32.xlu0 %v6578_v35, %s6280_s11  ;;  %v6692_v35 = vrot.slane %v2067_v0, %v6676_v42 }
  0x63   : > { %517 = vrot.lane.b32.xlu1 %v6429_v26, %s6280_s11 }
  0x65   : > { %513 = vrot.lane.b32.xlu0 %v6384_v1, %s6280_s11 }
  0x67   : > { %525 = vrot.lane.b32.xlu1 %v6410_v18, %s6280_s11 }
  0x69   : > { %521 = vrot.lane.b32.xlu0 %v6393_v7, %s6280_s11 }
  0x6b   : > { %515 = vrot.lane.b32.xlu1 %v6440_v32, %s6280_s11 }
  0x6d   : > { %511 = vrot.lane.b32.xlu0 %v6388_v3, %s6280_s11 }
  0x6f   : > { %523 = vrot.lane.b32.xlu1 %v6469_v50, %s6280_s11 }
  0x71   : > { %519 = vrot.lane.b32.xlu0 %v6472_v51, %s6280_s11 }
  0x73   : > { %793 = vrot.lane.b32.xlu1 %v6429_v26, %s6279_s10 }
  0x75   : > { %789 = vrot.lane.b32.xlu0 %v6384_v1, %s6279_s10 }
  0x77   : > { %801 = vrot.lane.b32.xlu1 %v6410_v18, %s6279_s10 }
  0x79   : > { %797 = vrot.lane.b32.xlu0 %v6393_v7, %s6279_s10 }
  0x7b   : > { %791 = vrot.lane.b32.xlu1 %v6440_v32, %s6279_s10  ;;  %v6030_v32 = vcombine.low %v6692_v35, %v6692_v35 }
  0x7d   : > { %787 = vrot.lane.b32.xlu0 %v6388_v3, %s6279_s10  ;;  %v6133_v3 = vcombine.high %v6699_v45, %v6699_v45 }
  0x7f   : > { %799 = vrot.lane.b32.xlu1 %v6469_v50, %s6279_s10  ;;  %v6711_v50 = vrot.slane %v2033_v48, %v6676_v42 }
  0x81   : > { %795 = vrot.lane.b32.xlu0 %v6472_v51, %s6279_s10  ;;  %10158 = vst [vmem:[#allocation23_spill] sm:$0xff] %v6711_v50  ;;  %v6129_v51 = vcombine.high %v6711_v50, %v6711_v50 }
  0x83   : > { %2191 = vrot.lane.b32.xlu1 %v6037_v22, %s6283_s12 }
  0x85   : > { %2196 = vrot.lane.b32.xlu0 %v6133_v3, %s6284_s13 }
  0x87   : > { %2156 = vrot.lane.b32.xlu1 %v6030_v32, %s6283_s12 }
  0x89   : > { %2161 = vrot.lane.b32.xlu0 %v6129_v51, %s6284_s13 }
  0x8b   : > { %2201 = vrot.lane.b32.xlu1 %v6134_v49, %s6285_s14 }
  0x90   : > { %v6719_v52 = vpop.permute.xlu0 %2529 }
  0x92   : > { %v2532_v56 = vpop.permute.xlu1 %2531 }
  0x93   : > { %v2560_v49 = vshrl.u32 %v2532_v56, 16 }
  0x97   : > { %v6721_v57 = vpop.permute.xlu1 %1692 }
  0x98   : > { %v6723_v58 = vpop.permute.xlu0 %1684 }
  0x9b   : > { %v6727_v60 = vpop.permute.xlu1 %1696 }
  0x9d   : > { %v6729_v61 = vpop.permute.xlu0 %1688 }
  0xa1   : > { %v6731_v31 = vpop.permute.xlu1 %1686 }
  0xa2   : > { %v6733_v62 = vpop.permute.xlu0 %1682  ;;  %v1702_v40 = vshrl.u32 %v6731_v31, 16 }
  0xa3   : > { %v1701_v4 = vshrl.u32 %v6733_v62, 16 }
  0xa5   : > { %v6735_v63 = vpop.permute.xlu1 %1694  ;;  %v1703_v37 = vpack.i.b16 %v1702_v40, %v1701_v4 }
  0xa6   : > { %v1708_v5 = vshrl.u32 %v6735_v63, 16 }
  0xa7   : > { %v6740_v19 = vpop.permute.xlu0 %1690  ;;  %v6746_v48 = vrot.slane %v1703_v37, %v6607_v21 }
  0xa8   : > { %v1707_v9 = vshrl.u32 %v6740_v19, 16 }
  0xa9   : > { %v2536_v29 = vpop.permute.xlu1 %2535 }
  0xaa   : > { %v1709_v0 = vpack.i.b16 %v1708_v5, %v1707_v9  ;;  %v2561_v3 = vshrl.u32 %v2536_v29, 16  ;;  %v2559_v51 = vpack.i.b16 %v2536_v29, %v2532_v56 }
  0xab   : > { %v6743_v24 = vpop.permute.xlu0 %2533 }
  0xac   : > { %v6749_v32 = vrot.slane %v1709_v0, %v6607_v21  ;;  %v2562_v4 = vpack.i.b16 %v2561_v3, %v2560_v49  ;;  %v6756_v10 = vrot.slane %v2559_v51, %v6607_v21 }
  0xad   : > { %v2540_v22 = vpop.permute.xlu1 %2539 }
  0xae   : > { %v2566_v5 = vshrl.u32 %v2540_v22, 16  ;;  %10159 = vst [vmem:[#allocation24_spill] sm:$0xff] %v6756_v10  ;;  %v6766_v29 = vrot.slane %v2562_v4, %v6607_v21 }
  0xaf   : > { %v6753_v43 = vpop.permute.xlu0 %2537 }
  0xb0   : > { %v2554_v51 = vshrl.u32 %v6753_v43, 16 }
  0xb1   : > { %v2544_v40 = vpop.permute.xlu1 %2543 }
  0xb2   : > { %v2565_v9 = vpack.i.b16 %v2544_v40, %v2540_v22  ;;  %v2567_v25 = vshrl.u32 %v2544_v40, 16 }
  0xb3   : > { %v6761_v36 = vpop.permute.xlu0 %2541 }
  0xb4   : > { %v2568_v37 = vpack.i.b16 %v2567_v25, %v2566_v5  ;;  %v6759_v0 = vrot.slane %v2565_v9, %v6607_v21  ;;  %v2549_v25 = vshrl.u32 %v6743_v24, 16  ;;  %v2555_v40 = vshrl.u32 %v6761_v36, 16 }
  0xb5   : > { %v6763_v56 = vpop.permute.xlu1 %1412  ;;  %v2548_v9 = vshrl.u32 %v6719_v52, 16 }
  0xb6   : > { %10160 = vst [vmem:[#allocation25_spill] sm:$0xff] %v6759_v0  ;;  %v2653_v3 = vcombine.low %v6756_v10, %v6759_v0  ;;  %v6773_v49 = vrot.slane %v2568_v37, %v6607_v21  ;;  %v2556_v8 = vpack.i.b16 %v2555_v40, %v2554_v51 }
  0xb7   : > { %v6784_v17 = vpop.permute.xlu0 %1408  ;;  %v2550_v37 = vpack.i.b16 %v2549_v25, %v2548_v9 }
  0xb8   : > { %v6779_v5 = vrot.slane %v2653_v3, %v6676_v42  ;;  %v6791_v16 = vrot.slane %v2556_v8, %v6607_v21  ;;  %v2687_v50 = vcombine.low %v6766_v29, %v6773_v49 }
  0xb9   : > { %v6786_v22 = vpop.permute.xlu1 %1420  ;;  %v6797_v4 = vrot.slane %v2550_v37, %v6607_v21 }
  0xba   : > { %10161 = vst [vmem:[#allocation26_spill] sm:$0xff] %v6779_v5  ;;  %v6149_v59 = vcombine.high %v6779_v5, %v6779_v5  ;;  %10162 = vst [vmem:[#allocation27_spill] sm:$0xff] %v6791_v16 }
  0xbb   : > { %v6793_v11 = vpop.permute.xlu0 %1416  ;;  %10163 = vst [vmem:[#allocation28_spill] sm:$0xff] %v6797_v4 }
  0xbc   : > { %2748 = vrot.lane.b32.xlu1 %v6149_v59, %s6284_s13 }
  0xbd   : > { %v2260_v3 = vpop.permute.xlu1 %2259 }
  0xbe   : > { %v2285_v25 = vshrl.u32 %v2260_v3, 16 }
  0xbf   : > { %v2256_v51 = vpop.permute.xlu0 %2255 }
  0xc0   : > { %v2284_v9 = vshrl.u32 %v2256_v51, 16  ;;  %v2283_v45 = vpack.i.b16 %v2260_v3, %v2256_v51 }
  0xc1   : > { %v2268_v40 = vpop.permute.xlu1 %2267 }
  0xc2   : > { %v2291_v5 = vshrl.u32 %v2268_v40, 16  ;;  %v2286_v55 = vpack.i.b16 %v2285_v25, %v2284_v9  ;;  %v6802_v59 = vrot.slane %v2283_v45, %v6607_v21  ;;  %v10167_v9 = vpack.i.b16 %v6488_v2, %v6461_v46 }
  0xc3   : > { %v2264_v6 = vpop.permute.xlu0 %2263  ;;  %v1700_v2 = vpack.i.b16 %v6731_v31, %v6733_v62 }
  0xc4   : > { %v2289_v41 = vpack.i.b16 %v2268_v40, %v2264_v6  ;;  %v2290_v39 = vshrl.u32 %v2264_v6, 16  ;;  %v6810_v3 = vrot.slane %v2286_v55, %v6607_v21  ;;  %v6830_v6 = vrot.slane %v10167_v9, %v6607_v21 }
  0xc5   : > { %v1411_v8 = vpop.permute.xlu1 %1410 }
  0xc6   : > { %v2292_v38 = vpack.i.b16 %v2291_v5, %v2290_v39  ;;  %v6805_v37 = vrot.slane %v2289_v41, %v6607_v21  ;;  %v1426_v14 = vshrl.u32 %v1411_v8, 16  ;;  %10164 = vst [vmem:[#allocation29_spill] sm:$0xff] %v6810_v3  ;;  %v1706_v41 = vpack.i.b16 %v6735_v63, %v6740_v19 }
  0xc7   : > { %v1407_v33 = vpop.permute.xlu0 %1406 }
  0xc8   : > { %v2377_v51 = vcombine.low %v6802_v59, %v6805_v37  ;;  %v6817_v39 = vrot.slane %v2292_v38, %v6607_v21  ;;  %v1425_v45 = vshrl.u32 %v1407_v33, 16  ;;  %v1424_v40 = vpack.i.b16 %v1411_v8, %v1407_v33 }
  0xc9   : > { %v1419_v28 = vpop.permute.xlu1 %1418  ;;  %v10168_v38 = vpack.i.b16 %v6497_v13, %v6465_v47  ;;  %v2695_v33 = vrot.slane %v2687_v50, %v6676_v42  ;;  %v6846_v47 = vrot.slane %v1706_v41, %v6607_v21 }
  0xca   : > { %10165 = vst [vmem:[#allocation30_spill] sm:$0xff] %v6817_v39  ;;  %v1432_v25 = vshrl.u32 %v1419_v28, 16  ;;  %v6824_v55 = vrot.slane %v2377_v51, %v6676_v42  ;;  %v2411_v8 = vcombine.low %v6810_v3, %v6817_v39  ;;  %v1427_v51 = vpack.i.b16 %v1426_v14, %v1425_v45 }
  0xcb   : > { %v6836_v63 = vrot.slane %v10168_v38, %v6607_v21  ;;  %v1415_v19 = vpop.permute.xlu0 %1414  ;;  %v6849_v13 = vrot.slane %v1424_v40, %v6607_v21  ;;  %v1442_v14 = vpack.i.b16 %v6786_v22, %v6793_v11  ;;  %v6065_v38 = vcombine.low %v2695_v33, %v2695_v33 }
  0xcc   : > { %10166 = vst [vmem:[#allocation31_spill] sm:$0xff] %v6824_v55  ;;  %v1430_v5 = vpack.i.b16 %v1419_v28, %v1415_v19  ;;  %v1431_v7 = vshrl.u32 %v1415_v19, 16  ;;  %v6141_v46 = vcombine.high %v6824_v55, %v6824_v55  ;;  %v6860_v62 = vrot.slane %v1427_v51, %v6607_v21 }
  0xcd   : > { %v2258_v18 = vpop.permute.xlu1 %2257  ;;  %10169 = vst [vmem:[#allocation32_spill] sm:$0xff] %v6849_v13  ;;  %v6871_v40 = vrot.slane %v1700_v2, %v6607_v21  ;;  %v1718_v51 = vpack.i.b16 %v6727_v60, %v6721_v57  ;;  %v6885_v55 = vrot.slane %v1442_v14, %v6607_v21 }
  0xce   : > { %v1433_v9 = vpack.i.b16 %v1432_v25, %v1431_v7  ;;  %v6852_v50 = vrot.slane %v1430_v5, %v6607_v21  ;;  %2472 = vrot.lane.b32.xlu1 %v6141_v46, %s6284_s13  ;;  %v2273_v28 = vshrl.u32 %v2258_v18, 16  ;;  %v6868_v5 = vrot.slane %v2411_v8, %v6676_v42 }
  0xcf   : > { %v2254_v45 = vpop.permute.xlu0 %2253  ;;  %v1436_v25 = vpack.i.b16 %v6763_v56, %v6784_v17  ;;  %v1712_v8 = vpack.i.b16 %v6729_v61, %v6723_v58  ;;  %v1738_v2 = vcombine.low %v6871_v40, %v6846_v47 }
  0xd0   : > { %10170 = vst [vmem:[#allocation33_spill] sm:$0xff] %v6852_v50  ;;  %v6865_v41 = vrot.slane %v1433_v9, %v6607_v21  ;;  %10171 = vst [vmem:[#allocation34_spill] sm:$0xff] %v6868_v5  ;;  %v2272_v46 = vshrl.u32 %v2254_v45, 16  ;;  %v2271_v7 = vpack.i.b16 %v2258_v18, %v2254_v45  ;;  %v6051_v18 = vcombine.low %v6868_v5, %v6868_v5 }
  0xd1   : > { %v2266_v19 = vpop.permute.xlu1 %2265  ;;  %v6892_v45 = vrot.slane %v1436_v25, %v6607_v21  ;;  %v6150_v25 = vcombine.high %v2695_v33, %v2695_v33 }
  0xd2   : > { %2743 = vrot.lane.b32.xlu1 %v6065_v38, %s6283_s12  ;;  %v2279_v9 = vshrl.u32 %v2266_v19, 16  ;;  %v2274_v26 = vpack.i.b16 %v2273_v28, %v2272_v46  ;;  %v6895_v38 = vrot.slane %v1718_v51, %v6607_v21  ;;  %v6898_v31 = vrot.slane %v2271_v7, %v6607_v21 }
  0xd3   : > { %v2262_v39 = vpop.permute.xlu0 %2261  ;;  %v1530_v28 = vcombine.low %v6892_v45, %v6885_v55  ;;  %v6914_v7 = vrot.slane %v1738_v2, %v6676_v42 }
  0xd4   : > { %v2277_v1 = vpack.i.b16 %v2266_v19, %v2262_v39  ;;  %v2278_v44 = vshrl.u32 %v2262_v39, 16  ;;  %v6905_v39 = vrot.slane %v1712_v8, %v6607_v21  ;;  %v2553_v8 = vpack.i.b16 %v6761_v36, %v6753_v43 }
  0xd5   : > { %v6887_v3 = vpop.permute.xlu1 %517  ;;  %10175 = vst [vmem:[#allocation38_spill] sm:$0xff] %v6914_v7  ;;  %v6939_v0 = vrot.slane %v1530_v28, %v6676_v42 }
  0xd6   : > { %10172 = vst [vmem:[#allocation35_spill] sm:$0xff] %v6887_v3  ;;  %v2280_v14 = vpack.i.b16 %v2279_v9, %v2278_v44  ;;  %v6901_v15 = vrot.slane %v2277_v1, %v6607_v21  ;;  %2467 = vrot.lane.b32.xlu1 %v6051_v18, %s6283_s12  ;;  %v6917_v44 = vrot.slane %v2274_v26, %v6607_v21  ;;  %v543_v9 = vshrl.u32 %v6887_v3, 16 }
  0xd7   : > { %v6909_v19 = vpop.permute.xlu0 %513  ;;  %v1807_v18 = vcombine.high %v6905_v39, %v6895_v38  ;;  %10179 = vst [vmem:[#allocation42_spill] sm:$0xff] %v6939_v0  ;;  %v6945_v2 = vrot.slane %v2553_v8, %v6607_v21  ;;  %v6117_v28 = vcombine.high %v6939_v0, %v6939_v0  ;;  %v6968_v0 = vrot.slane %v6532_v54, %v6607_v21 }
  0xd8   : > { %10173 = vst [vmem:[#allocation36_spill] sm:$0xff] %v6909_v19  ;;  %10176 = vst [vmem:[#allocation39_spill] sm:$0xff] %v6917_v44  ;;  %v6922_v51 = vrot.slane %v2280_v14, %v6607_v21  ;;  %v542_v33 = vshrl.u32 %v6909_v19, 16  ;;  %v2547_v14 = vpack.i.b16 %v6743_v24, %v6719_v52  ;;  %v1462_v24 = vcombine.low %v6849_v13, %v6852_v50 }
  0xd9   : > { %v6911_v46 = vpop.permute.xlu1 %525  ;;  %v1772_v54 = vcombine.low %v6746_v48, %v6749_v32 }
  0xda   : > { %10174 = vst [vmem:[#allocation37_spill] sm:$0xff] %v6911_v46  ;;  %10177 = vst [vmem:[#allocation40_spill] sm:$0xff] %v6922_v51  ;;  %2753 = vrot.lane.b32.xlu1 %v6150_v25, %s6285_s14  ;;  %v549_v26 = vshrl.u32 %v6911_v46, 16  ;;  %v544_v43 = vpack.i.b16 %v543_v9, %v542_v33  ;;  %v6121_v25 = vcombine.high %v6914_v7, %v6914_v7 }
  0xdb   : > { %v6936_v1 = vpop.permute.xlu0 %521  ;;  %v6949_v52 = vrot.slane %v2547_v14, %v6607_v21  ;;  %v6956_v9 = vrot.slane %v1807_v18, %v6676_v42  ;;  %v6978_v13 = vrot.slane %v1462_v24, %v6676_v42  ;;  %v6990_v46 = vrot.slane %v6571_v34, %v6607_v21 }
  0xdc   : > { %10178 = vst [vmem:[#allocation41_spill] sm:$0xff] %v6936_v1  ;;  %v548_v10 = vshrl.u32 %v6936_v1, 16  ;;  %v6959_v8 = vrot.slane %v544_v43, %v6607_v21  ;;  %v1719_v24 = vshrl.u32 %v6721_v57, 16  ;;  %v1720_v57 = vshrl.u32 %v6727_v60, 16 }
  0xdd   : > { %v516_v36 = vpop.permute.xlu1 %515  ;;  %10182 = vst [vmem:[#allocation45_spill] sm:$0xff] %v6978_v13 }
  0xde   : > { %v550_v5 = vpack.i.b16 %v549_v26, %v548_v10  ;;  %1866 = vrot.lane.b32.xlu1 %v6121_v25, %s6284_s13  ;;  %10180 = vst [vmem:[#allocation43_spill] sm:$0xff] %v6959_v8  ;;  %v531_v26 = vshrl.u32 %v516_v36, 16  ;;  %v2585_v25 = vcombine.low %v6949_v52, %v6945_v2 }
  0xdf   : > { %v512_v33 = vpop.permute.xlu0 %511 }
  0xe0   : > { %v6962_v10 = vrot.slane %v550_v5, %v6607_v21  ;;  %v529_v14 = vpack.i.b16 %v516_v36, %v512_v33  ;;  %v530_v50 = vshrl.u32 %v512_v33, 16  ;;  %v6022_v36 = vcombine.low %v6956_v9, %v6956_v9 }
  0xe1   : > { %v524_v7 = vpop.permute.xlu1 %523  ;;  %v6996_v1 = vrot.slane %v2585_v25, %v6676_v42 }
  0xe2   : > { %10181 = vst [vmem:[#allocation44_spill] sm:$0xff] %v6962_v10  ;;  %1625 = vrot.lane.b32.xlu1 %v6117_v28, %s6284_s13  ;;  %v669_v43 = vcombine.low %v6959_v8, %v6962_v10  ;;  %v537_v5 = vshrl.u32 %v524_v7, 16  ;;  %v6981_v33 = vrot.slane %v529_v14, %v6607_v21  ;;  %v532_v19 = vpack.i.b16 %v531_v26, %v530_v50 }
  0xe3   : > { %v520_v3 = vpop.permute.xlu0 %519  ;;  %v1739_v14 = vcombine.high %v6871_v40, %v6846_v47  ;;  %10184 = vst [vmem:[#allocation47_spill] sm:$0xff] %v6996_v1  ;;  %v6113_v47 = vcombine.high %v6978_v13, %v6978_v13  ;;  %v7010_v40 = vrot.slane %v1772_v54, %v6676_v42  ;;  %v6145_v54 = vcombine.high %v6996_v1, %v6996_v1 }
  0xe4   : > { %v6986_v28 = vrot.slane %v669_v43, %v6676_v42  ;;  %v535_v10 = vpack.i.b16 %v524_v7, %v520_v3  ;;  %v536_v8 = vshrl.u32 %v520_v3, 16  ;;  %v2619_v3 = vcombine.low %v6797_v4, %v6791_v16 }
  0xe5   : > { %v794_v18 = vpop.permute.xlu1 %793  ;;  %v7025_v13 = vrot.slane %v1739_v14, %v6676_v42  ;;  %v6012_v1 = vcombine.low %v7010_v40, %v7010_v40  ;;  %v6130_v14 = vcombine.high %v6692_v35, %v6692_v35 }
  0xe6   : > { %10183 = vst [vmem:[#allocation46_spill] sm:$0xff] %v6986_v28  ;;  %1911 = vrot.lane.b32.xlu1 %v6022_v36, %s6286_s15  ;;  %v5963_v50 = vcombine.low %v6986_v28, %v6986_v28  ;;  %v538_v7 = vpack.i.b16 %v537_v5, %v536_v8  ;;  %v7004_v34 = vrot.slane %v535_v10, %v6607_v21  ;;  %v819_v26 = vshrl.u32 %v794_v18, 16 }
  0xe7   : > { %v790_v25 = vpop.permute.xlu0 %789  ;;  %v7014_v36 = vrot.slane %v532_v19, %v6607_v21  ;;  %v1714_v5 = vshrl.u32 %v6729_v61, 16  ;;  %v2627_v19 = vrot.slane %v2619_v3, %v6676_v42  ;;  %v1713_v61 = vshrl.u32 %v6723_v58, 16 }
  0xe8   : > { %725 = vrot.lane.b32.xlu0 %v5963_v50, %s6283_s12  ;;  %v7019_v10 = vrot.slane %v538_v7, %v6607_v21  ;;  %v817_v60 = vpack.i.b16 %v794_v18, %v790_v25  ;;  %v818_v28 = vshrl.u32 %v790_v25, 16  ;;  %v2343_v7 = vcombine.low %v6917_v44, %v6922_v51 }
  0xe9   : > { %v802_v43 = vpop.permute.xlu1 %801  ;;  %v1721_v8 = vpack.i.b16 %v1720_v57, %v1719_v24  ;;  %v1715_v16 = vpack.i.b16 %v1714_v5, %v1713_v61  ;;  %v1444_v58 = vshrl.u32 %v6786_v22, 16  ;;  %v1443_v24 = vshrl.u32 %v6793_v11, 16 }
  0xea   : > { %1590 = vrot.lane.b32.xlu1 %v6113_v47, %s6284_s13  ;;  %v825_v18 = vshrl.u32 %v802_v43, 16  ;;  %v820_v3 = vpack.i.b16 %v819_v26, %v818_v28  ;;  %v7042_v50 = vrot.slane %v817_v60, %v6607_v21  ;;  %v6015_v57 = vcombine.low %v7025_v13, %v7025_v13 }
  0xeb   : > { %v798_v25 = vpop.permute.xlu0 %797  ;;  %v6058_v35 = vcombine.low %v2627_v19, %v2627_v19  ;;  %v7050_v4 = vrot.slane %v2343_v7, %v6676_v42  ;;  %v1437_v60 = vshrl.u32 %v6784_v17, 16  ;;  %v2309_v11 = vcombine.low %v6898_v31, %v6901_v15 }
  0xec   : > { %2713 = vrot.lane.b32.xlu0 %v6145_v54, %s6284_s13  ;;  %v823_v51 = vpack.i.b16 %v802_v43, %v798_v25  ;;  %v824_v44 = vshrl.u32 %v798_v25, 16  ;;  %v1438_v43 = vshrl.u32 %v6763_v56, 16  ;;  %v7076_v54 = vrot.slane %v1721_v8, %v6607_v21 }
  0xed   : > { %v7038_v47 = vpop.permute.xlu1 %791  ;;  %v1806_v7 = vcombine.low %v6905_v39, %v6895_v38  ;;  %v1445_v25 = vpack.i.b16 %v1444_v58, %v1443_v24  ;;  %v7096_v39 = vrot.slane %v2309_v11, %v6676_v42 }
  0xee   : > { %1861 = vrot.lane.b32.xlu1 %v6012_v1, %s6283_s12  ;;  %v826_v28 = vpack.i.b16 %v825_v18, %v824_v44  ;;  %v7053_v26 = vrot.slane %v823_v51, %v6607_v21  ;;  %v7067_v44 = vrot.slane %v820_v3, %v6607_v21  ;;  %v807_v51 = vshrl.u32 %v7038_v47, 16 }
  0xef   : > { %v7059_v22 = vpop.permute.xlu0 %787  ;;  %v7081_v18 = vrot.slane %v1715_v16, %v6607_v21  ;;  %v6044_v3 = vcombine.low %v7050_v4, %v7050_v4  ;;  %v1439_v16 = vpack.i.b16 %v1438_v43, %v1437_v60  ;;  %10185 = vst [vmem:[#allocation48_spill] sm:$0xff] %v7096_v39 }
  0xf0   : > { %2708 = vrot.lane.b32.xlu0 %v6058_v35, %s6283_s12  ;;  %v7072_v17 = vrot.slane %v826_v28, %v6607_v21  ;;  %v806_v61 = vshrl.u32 %v7059_v22, 16  ;;  %v2586_v28 = vcombine.high %v6949_v52, %v6945_v2  ;;  %v7105_v35 = vrot.slane %v1445_v25, %v6607_v21 }
  0xf1   : > { %v7061_v5 = vpop.permute.xlu1 %799  ;;  %v1840_v56 = vcombine.low %v7081_v18, %v7076_v54  ;;  %v6146_v2 = vcombine.high %v2627_v19, %v2627_v19  ;;  %v601_v52 = vcombine.low %v7014_v36, %v7019_v10  ;;  %v7114_v11 = vrot.slane %v1439_v16, %v6607_v21 }
  0xf2   : > { %1876 = vrot.lane.b32.xlu1 %v6015_v57, %s6286_s15  ;;  %v813_v8 = vshrl.u32 %v7061_v5, 16  ;;  %v808_v58 = vpack.i.b16 %v807_v51, %v806_v61  ;;  %v7100_v57 = vrot.slane %v1806_v7, %v6676_v42  ;;  %v7111_v60 = vrot.slane %v2586_v28, %v6676_v42 }
  0xf3   : > { %v7092_v38 = vpop.permute.xlu0 %795  ;;  %v6137_v51 = vcombine.high %v7096_v39, %v7096_v39  ;;  %v1848_v61 = vrot.slane %v1840_v56, %v6676_v42  ;;  %v7130_v25 = vrot.slane %v601_v52, %v6676_v42  ;;  %v1531_v52 = vcombine.high %v6892_v45, %v6885_v55 }
  0xf4   : > { %2432 = vrot.lane.b32.xlu0 %v6044_v3, %s6283_s12  ;;  %v812_v24 = vshrl.u32 %v7092_v38, 16  ;;  %10186 = vst [vmem:[#allocation49_spill] sm:$0xff] %v7100_v57  ;;  %v7120_v7 = vrot.slane %v808_v58, %v6607_v21  ;;  %v1564_v3 = vcombine.low %v7114_v11, %v7105_v35  ;;  %v6061_v16 = vcombine.low %v7111_v60, %v7111_v60 }
  0xf5   : > { %v6019_v56 = vcombine.low %v1848_v61, %v1848_v61  ;;  %v5956_v58 = vcombine.low %v7130_v25, %v7130_v25  ;;  %v2136_v45 = vcombine.high %v6655_v12, %v6658_v20  ;;  %v6127_v12 = vcombine.high %v6956_v9, %v6956_v9 }
  0xf6   : > { %2166 = vrot.lane.b32.xlu1 %v6130_v14, %s6285_s14  ;;  %v814_v43 = vpack.i.b16 %v813_v8, %v812_v24  ;;  %v6125_v14 = vcombine.high %v7100_v57, %v7100_v57  ;;  %v945_v8 = vcombine.low %v7067_v44, %v7072_v17  ;;  %v1572_v24 = vrot.slane %v1564_v3, %v6676_v42 }
  0xf7   : > { %v7158_v3 = vrot.slane %v1531_v52, %v6676_v42  ;;  %v6122_v20 = vcombine.high %v7010_v40, %v7010_v40 }
  0xf8   : > { %2718 = vrot.lane.b32.xlu0 %v6146_v2, %s6285_s14  ;;  %v7123_v19 = vrot.slane %v814_v43, %v6607_v21  ;;  %v7146_v2 = vrot.slane %v945_v8, %v6676_v42  ;;  %v6005_v43 = vcombine.low %v1572_v24, %v1572_v24  ;;  %v6126_v8 = vcombine.high %v1848_v61, %v1848_v61 }
  0xf9   : > { %v7175_v61 = vrot.slane %v2136_v45, %v6676_v42  ;;  %v6118_v9 = vcombine.high %v1572_v24, %v1572_v24  ;;  %v7215_v45 = vrot.slane %v6506_v27, %v6607_v21 }
  0xfa   : > { %2437 = vrot.lane.b32.xlu1 %v6137_v51, %s6284_s13  ;;  %v5977_v51 = vcombine.low %v7146_v2, %v7146_v2 }
  0xfb   : > { %v6041_v52 = vcombine.low %v7175_v61, %v7175_v61 }
  0xfc   : > { %1901 = vrot.lane.b32.xlu0 %v6125_v14, %s6284_s13  ;;  %v1496_v14 = vcombine.low %v6860_v62, %v6865_v41 }
  0xfe   : > { %2723 = vrot.lane.b32.xlu1 %v6061_v16, %s6286_s15  ;;  %v7162_v55 = vrot.slane %v1496_v14, %v6676_v42  ;;  %v6212_v16 = vld [vmem:[%s6377_s9 + $0x28] sm:$0xf] }
 0x100   : > { %1896 = vrot.lane.b32.xlu0 %v6019_v56, %s6283_s12  ;;  %v6008_v56 = vcombine.low %v7158_v3, %v7158_v3 }
 0x102   : > { %690 = vrot.lane.b32.xlu1 %v5956_v58, %s6283_s12  ;;  %v5998_v58 = vcombine.low %v7162_v55, %v7162_v55 }
 0x104   : > { %1620 = vrot.lane.b32.xlu0 %v6005_v43, %s6283_s12  ;;  %v1841_v43 = vcombine.high %v7081_v18, %v7076_v54  ;;  %v10189_v18 = vcombine.high %v6614_v23, %v6617_v53  ;;  %v10192_v23 = vld [vmem:[#allocation36_spill] sm:$0xff]  ;;  %v10193_v53 = vld [vmem:[#allocation35_spill] sm:$0xff] }
 0x106   : > { %1001 = vrot.lane.b32.xlu1 %v5977_v51, %s6283_s12  ;;  %v10187_v51 = vcombine.high %v6802_v59, %v6805_v37  ;;  %v1855_v40 = vrot.slane %v1841_v43, %v6676_v42  ;;  %v10188_v59 = vcombine.high %v6766_v29, %v6773_v49  ;;  %v7211_v24 = vrot.slane %v10189_v18, %v6676_v42 }
 0x107   : > { %v877_v29 = vcombine.low %v7120_v7, %v7123_v19 }
 0x108   : > { %1906 = vrot.lane.b32.xlu0 %v6126_v8, %s6285_s14  ;;  %v7192_v14 = vrot.slane %v10187_v51, %v6676_v42  ;;  %v567_v8 = vcombine.low %v6981_v33, %v7004_v34  ;;  %v7205_v37 = vrot.slane %v10188_v59, %v6676_v42  ;;  %v6023_v49 = vcombine.low %v1855_v40, %v1855_v40 }
 0x10a   : > { %1635 = vrot.lane.b32.xlu1 %v6008_v56, %s6286_s15  ;;  %v6054_v54 = vcombine.low %v7192_v14, %v7192_v14  ;;  %v7219_v56 = vrot.slane %v6508_v30, %v6607_v21  ;;  %v6069_v27 = vcombine.low %v7205_v37, %v7205_v37  ;;  %v6040_v30 = vcombine.low %v7211_v24, %v7211_v24 }
 0x10b   : > { %v7234_v43 = vrot.slane %v567_v8, %v6676_v42 }
 0x10c   : > { %1585 = vrot.lane.b32.xlu0 %v5998_v58, %s6283_s12  ;;  %v10190_v58 = vld [vmem:[#allocation41_spill] sm:$0xff]  ;;  %v1288_v51 = vcombine.low %v7219_v56, %v7215_v45 }
 0x10d   : > { %10194 = vst [vmem:[#allocation41_spill] sm:$0xff] %v7234_v43  ;;  %v6089_v8 = vcombine.high %v7234_v43, %v7234_v43  ;;  %v10206_v43 = vld [vmem:[#allocation9_spill] sm:$0xff] }
 0x10e   : > { %1921 = vrot.lane.b32.xlu1 %v6127_v12, %s6287_s16  ;;  %v10191_v12 = vld [vmem:[#allocation37_spill] sm:$0xff]  ;;  %v7252_v18 = vrot.slane %v1288_v51, %v6676_v42 }
 0x110   : > { %1871 = vrot.lane.b32.xlu0 %v6122_v20, %s6285_s14  ;;  %v547_v20 = vpack.i.b16 %v10191_v12, %v10190_v58  ;;  %v10195_v12 = vld [vmem:[#allocation34_spill] sm:$0xff]  ;;  %v5991_v51 = vcombine.low %v7252_v18, %v7252_v18 }
 0x112   : > { %2211 = vrot.lane.b32.xlu1 %v6041_v52, %s6288_s17  ;;  %v541_v52 = vpack.i.b16 %v10193_v53, %v10192_v23  ;;  %v10197_v23 = vld [vmem:[#allocation25_spill] sm:$0xff] }
 0x114   : > { %1630 = vrot.lane.b32.xlu0 %v6118_v9, %s6285_s14  ;;  %v7239_v9 = vrot.slane %v547_v20, %v6607_v21  ;;  %v7246_v59 = vrot.slane %v541_v52, %v6607_v21  ;;  %v6142_v20 = vcombine.high %v10195_v12, %v10195_v12 }
 0x116   : > { %2482 = vrot.lane.b32.xlu1 %v6054_v54, %s6286_s15  ;;  %v7243_v54 = vrot.slane %v877_v29, %v6676_v42  ;;  %v635_v58 = vcombine.low %v7246_v59, %v7239_v9 }
 0x118   : > { %1916 = vrot.lane.b32.xlu0 %v6023_v49, %s6288_s17  ;;  %v5970_v29 = vcombine.low %v7243_v54, %v7243_v54  ;;  %v10196_v49 = vld [vmem:[#allocation24_spill] sm:$0xff] }
 0x119   : > { %v10198_v53 = vcombine.high %v10196_v49, %v10197_v23  ;;  %v7288_v23 = vpop.permute.xlu1 %2191 }
 0x11a   : > { %2763 = vrot.lane.b32.xlu1 %v6069_v27, %s6288_s17  ;;  %v1565_v27 = vcombine.high %v7114_v11, %v7105_v35  ;;  %10202 = vst [vmem:[#allocation36_spill] sm:$0xff] %v7288_v23  ;;  %v6211_v11 = vld [vmem:[%s6377_s9 + $0x1c] sm:$0xf] }
 0x11b   : > { %v2668_v52 = vrot.slane %v10198_v53, %v6676_v42  ;;  %v6114_v53 = vcombine.high %v7162_v55, %v7162_v55  ;;  %v256_v1 = vpack.i.b16 %v6212_v16, %v6211_v11 }
 0x11c   : > { %2206 = vrot.lane.b32.xlu0 %v6040_v30, %s6286_s15  ;;  %v7276_v12 = vrot.slane %v1565_v27, %v6676_v42  ;;  %v10203_v27 = vcombine.high %v6746_v48, %v6749_v32  ;;  %v10208_v48 = vld [vmem:[#allocation7_spill] sm:$0xff] }
 0x11d   : > { %v6068_v30 = vcombine.low %v2668_v52, %v2668_v52  ;;  %v10209_v32 = vshrl.u32 %v10208_v48, 16  ;;  %v10218_v48 = vld [vmem:[#allocation27_spill] sm:$0xff] }
 0x11e   : > { %695 = vrot.lane.b32.xlu1 %v6089_v8, %s6284_s13  ;;  %v7272_v8 = vrot.slane %v635_v58, %v6676_v42  ;;  %v6009_v58 = vcombine.low %v7276_v12, %v7276_v12 }
 0x120   : > { %2477 = vrot.lane.b32.xlu0 %v6142_v20, %s6285_s14  ;;  %10199 = vst [vmem:[#allocation37_spill] sm:$0xff] %v7272_v8  ;;  %v6093_v35 = vcombine.high %v7272_v8, %v7272_v8  ;;  %v10200_v20 = vld [vmem:[#allocation21_spill] sm:$0xff]  ;;  %v10207_v8 = vshrl.u32 %v10206_v43, 16  ;;  %v7324_v43 = vrot.slane %v256_v1, %v6607_v21 }
 0x122   : > { %966 = vrot.lane.b32.xlu1 %v5970_v29, %s6283_s12  ;;  %v10201_v29 = vld [vmem:[#allocation20_spill] sm:$0xff] }
 0x123   : > { %v2034_v49 = vcombine.high %v10201_v29, %v10200_v20  ;;  %v6128_v20 = vcombine.high %v1855_v40, %v1855_v40  ;;  %v10204_v29 = vld [vmem:[#allocation6_spill] sm:$0xff]  ;;  %v6135_v40 = vcombine.high %v7211_v24, %v7211_v24 }
 0x124   : > { %2758 = vrot.lane.b32.xlu0 %v6068_v30, %s6286_s15  ;;  %v7297_v30 = vrot.slane %v10203_v27, %v6676_v42  ;;  %v10205_v55 = vshrl.u32 %v10204_v29, 16  ;;  %v10210_v27 = vld [vmem:[#allocation8_spill] sm:$0xff] }
 0x125   : > { %v10211_v23 = vshrl.u32 %v10210_v27, 16 }
 0x126   : > { %1344 = vrot.lane.b32.xlu1 %v5991_v51, %s6283_s12  ;;  %v6209_v51 = vld [vmem:[%s6377_s9 + $0x4] sm:$0xf]  ;;  %v253_v39 = vpack.i.b16 %v10207_v8, %v10205_v55  ;;  %v6016_v16 = vcombine.low %v7297_v30, %v7297_v30  ;;  %v7326_v8 = vpop.permute.xlu1 %2156 }
 0x127   : > { %v259_v57 = vpack.i.b16 %v10211_v23, %v10209_v32  ;;  %10212 = vst [vmem:[#allocation35_spill] sm:$0xff] %v7326_v8  ;;  %v10213_v23 = vld [vmem:[#allocation29_spill] sm:$0xff] }
 0x128   : > { %730 = vrot.lane.b32.xlu0 %v6093_v35, %s6284_s13  ;;  %v6210_v35 = vld [vmem:[%s6377_s9 + $0x10] sm:$0xf]  ;;  %v7338_v24 = vrot.slane %v253_v39, %v6607_v21  ;;  %v6138_v39 = vcombine.high %v7050_v4, %v7050_v4 }
 0x129   : > { %v250_v28 = vpack.i.b16 %v6210_v35, %v6209_v51 }
 0x12a   : > { %1640 = vrot.lane.b32.xlu1 %v6009_v58, %s6288_s17  ;;  %v7305_v58 = vrot.slane %v2034_v49, %v6676_v42  ;;  %v7351_v55 = vpop.permute.xlu1 %2201 }
 0x12b   : > { %v7321_v11 = vrot.slane %v250_v28, %v6607_v21  ;;  %v7341_v28 = vrot.slane %v259_v57, %v6607_v21  ;;  %10216 = vst [vmem:[#allocation34_spill] sm:$0xff] %v7351_v55  ;;  %v10217_v57 = vld [vmem:[#allocation28_spill] sm:$0xff] }
 0x12c   : > { %1595 = vrot.lane.b32.xlu0 %v6114_v53, %s6285_s14  ;;  %v6033_v49 = vcombine.low %v7305_v58, %v7305_v58  ;;  %v10214_v53 = vld [vmem:[#allocation30_spill] sm:$0xff]  ;;  %v10219_v32 = vcombine.high %v10217_v57, %v10218_v48  ;;  %v10224_v48 = vcombine.low %v6836_v63, %v6830_v6  ;;  %v6215_v55 = vld [vmem:[%s6377_s9 + $0x24] sm:$0xf] }
 0x12d   : > { %v10215_v51 = vcombine.high %v10213_v23, %v10214_v53  ;;  %v344_v1 = vcombine.low %v7321_v11, %v7324_v43  ;;  %v378_v29 = vcombine.low %v7338_v24, %v7341_v28 }
 0x12e   : > { %1926 = vrot.lane.b32.xlu1 %v6128_v20, %s6289_s23  ;;  %v7360_v27 = vrot.slane %v10219_v32, %v6676_v42  ;;  %v7402_v32 = vrot.slane %v10224_v48, %v6676_v42 }
 0x12f   : > { %v7335_v35 = vrot.slane %v10215_v51, %v6676_v42  ;;  %v7369_v23 = vrot.slane %v378_v29, %v6676_v42  ;;  %v7376_v51 = vpop.permute.xlu1 %2748  ;;  %v10222_v29 = vld [vmem:[#allocation46_spill] sm:$0xff] }
 0x130   : > { %1881 = vrot.lane.b32.xlu0 %v6016_v16, %s6288_s17  ;;  %v7363_v16 = vrot.slane %v344_v1, %v6676_v42  ;;  %v6062_v4 = vcombine.low %v7360_v27, %v7360_v27  ;;  %10225 = vst [vmem:[#allocation20_spill] sm:$0xff] %v7402_v32 }
 0x131   : > { %v6055_v20 = vcombine.low %v7335_v35, %v7335_v35 }
 0x132   : > { %2216 = vrot.lane.b32.xlu1 %v6135_v40, %s6287_s16  ;;  %10220 = vst [vmem:[#allocation24_spill] sm:$0xff] %v7363_v16  ;;  %v636_v40 = vcombine.high %v7246_v59, %v7239_v9  ;;  %v6085_v53 = vcombine.high %v7363_v16, %v7363_v16  ;;  %v5949_v9 = vcombine.low %v7369_v23, %v7369_v23 }
 0x134   : > { %2171 = vrot.lane.b32.xlu0 %v6033_v49, %s6286_s15  ;;  %v6151_v49 = vcombine.high %v2668_v52, %v2668_v52  ;;  %v7382_v59 = vrot.slane %v636_v40, %v6676_v42  ;;  %v911_v52 = vcombine.low %v7042_v50, %v7053_v26 }
 0x136   : > { %2487 = vrot.lane.b32.xlu1 %v6055_v20, %s6288_s17  ;;  %v5966_v20 = vcombine.low %v7382_v59, %v7382_v59  ;;  %v7396_v57 = vrot.slane %v911_v52, %v6676_v42  ;;  %v10227_v52 = vld [vmem:[#allocation33_spill] sm:$0xff] }
 0x138   : > { %2442 = vrot.lane.b32.xlu0 %v6138_v39, %s6285_s14  ;;  %v6094_v39 = vcombine.high %v10222_v29, %v10222_v29  ;;  %10223 = vst [vmem:[#allocation21_spill] sm:$0xff] %v7396_v57 }
 0x13a   : > { %2768 = vrot.lane.b32.xlu1 %v6151_v49, %s6287_s16  ;;  %v6102_v49 = vcombine.high %v7146_v2, %v7146_v2  ;;  %v10231_v2 = vld [vmem:[#allocation17_spill] sm:$0xff] }
 0x13c   : > { %2728 = vrot.lane.b32.xlu0 %v6062_v4, %s6288_s17  ;;  %v6101_v4 = vcombine.high %v7396_v57, %v7396_v57  ;;  %v6213_v57 = vld [vmem:[%s6377_s9] sm:$0xf] }
 0x13e   : > { %439 = vrot.lane.b32.xlu1 %v6085_v53, %s6284_s13  ;;  %v6109_v53 = vcombine.high %v7402_v32, %v7402_v32  ;;  %v6214_v32 = vld [vmem:[%s6377_s9 + $0xc] sm:$0xf] }
 0x13f   : > { %v238_v8 = vpack.i.b16 %v6214_v32, %v6213_v57  ;;  %v6131_v57 = vcombine.high %v7305_v58, %v7305_v58  ;;  %v7445_v32 = vpop.permute.xlu0 %2196 }
 0x140   : > { %v7387_v1 = vpop.permute.xlu1 %2472  ;;  %434 = vrot.lane.b32.xlu0 %v5949_v9, %s6283_s12  ;;  %v10226_v9 = vld [vmem:[#allocation32_spill] sm:$0xff]  ;;  %10232 = vst [vmem:[#allocation9_spill] sm:$0xff] %v7445_v32 }
 0x141   : > { %10221 = vst [vmem:[#allocation25_spill] sm:$0xff] %v7387_v1  ;;  %v6216_v1 = vld [vmem:[%s6377_s9 + $0x18] sm:$0xf] }
 0x142   : > { %740 = vrot.lane.b32.xlu1 %v5966_v20, %s6286_s15  ;;  %v10228_v20 = vcombine.high %v10226_v9, %v10227_v52  ;;  %v244_v9 = vpack.i.b16 %v6215_v55, %v6216_v1  ;;  %v7448_v55 = vrot.slane %v238_v8, %v6607_v21 }
 0x144   : > { %v7404_v40 = vpop.permute.xlu1 %2743  ;;  %735 = vrot.lane.b32.xlu0 %v6094_v39, %s6285_s14  ;;  %v7418_v29 = vrot.slane %v10228_v20, %v6676_v42  ;;  %v10230_v39 = vld [vmem:[#allocation18_spill] sm:$0xff]  ;;  %v7451_v1 = vrot.slane %v244_v9, %v6607_v21  ;;  %v10238_v9 = vld [vmem:[#allocation11_spill] sm:$0xff] }
 0x145   : > { %v2068_v16 = vcombine.high %v10231_v2, %v10230_v39  ;;  %v10235_v39 = vld [vmem:[#allocation40_spill] sm:$0xff] }
 0x146   : > { %1011 = vrot.lane.b32.xlu1 %v6102_v49, %s6285_s14  ;;  %v6001_v49 = vcombine.low %v7418_v29, %v7418_v29 }
 0x147   : > { %v7438_v20 = vrot.slane %v2068_v16, %v6676_v42 }
 0x148   : > { %v7420_v48 = vpop.permute.xlu1 %2467  ;;  %1006 = vrot.lane.b32.xlu0 %v6101_v4, %s6284_s13  ;;  %v6119_v4 = vcombine.high %v7158_v3, %v7158_v3 }
 0x149   : > { %10229 = vst [vmem:[#allocation6_spill] sm:$0xff] %v7420_v48  ;;  %v6034_v16 = vcombine.low %v7438_v20, %v7438_v20 }
 0x14a   : > { %1349 = vrot.lane.b32.xlu1 %v6109_v53, %s6284_s13  ;;  %v6123_v53 = vcombine.high %v7025_v13, %v7025_v13  ;;  %v10234_v13 = vld [vmem:[#allocation39_spill] sm:$0xff] }
 0x14b   : > { %v10236_v2 = vcombine.high %v10234_v13, %v10235_v39  ;;  %v276_v13 = vcombine.low %v7448_v55, %v7451_v1 }
 0x14c   : > { %v7432_v52 = vpop.permute.xlu1 %2753  ;;  %1600 = vrot.lane.b32.xlu0 %v6001_v49, %s6286_s15  ;;  %v10237_v49 = vld [vmem:[#allocation10_spill] sm:$0xff] }
 0x14d   : > { %v7462_v58 = vrot.slane %v10236_v2, %v6676_v42  ;;  %v7466_v8 = vrot.slane %v10237_v49, %v6607_v21  ;;  %v7486_v49 = vpop.permute.xlu0 %2161 }
 0x14e   : > { %1645 = vrot.lane.b32.xlu1 %v6119_v4, %s6287_s16  ;;  %v7470_v4 = vrot.slane %v10238_v9, %v6607_v21  ;;  %10241 = vst [vmem:[#allocation29_spill] sm:$0xff] %v7486_v49  ;;  %v6148_v49 = vcombine.high %v7360_v27, %v7360_v27 }
 0x14f   : > { %v6048_v2 = vcombine.low %v7462_v58, %v7462_v58 }
 0x150   : > { %v7453_v3 = vpop.permute.xlu1 %1866  ;;  %1886 = vrot.lane.b32.xlu0 %v6123_v53, %s6287_s16  ;;  %v10239_v53 = vcombine.high %v6898_v31, %v6901_v15  ;;  %v805_v15 = vpack.i.b16 %v7038_v47, %v7059_v22  ;;  %v811_v31 = vpack.i.b16 %v7061_v5, %v7092_v38  ;;  %v10243_v22 = vld [vmem:[#allocation12_spill] sm:$0xff]  ;;  %v10244_v5 = vld [vmem:[#allocation13_spill] sm:$0xff] }
 0x151   : > { %10233 = vst [vmem:[#allocation7_spill] sm:$0xff] %v7453_v3  ;;  %v10245_v38 = vpack.i.b16 %v10243_v22, %v10244_v5  ;;  %v6147_v22 = vcombine.high %v7111_v60, %v7111_v60 }
 0x152   : > { %2181 = vrot.lane.b32.xlu1 %v6131_v57, %s6287_s16  ;;  %v7477_v3 = vrot.slane %v10239_v53, %v6676_v42  ;;  %v310_v57 = vcombine.low %v7466_v8, %v7470_v4  ;;  %v7524_v27 = vrot.slane %v811_v31, %v6607_v21 }
 0x154   : > { %v7481_v39 = vpop.permute.xlu1 %1625  ;;  %2176 = vrot.lane.b32.xlu0 %v6034_v16, %s6288_s17  ;;  %v6047_v9 = vcombine.low %v7477_v3, %v7477_v3  ;;  %v7498_v16 = vrot.slane %v276_v13, %v6676_v42  ;;  %v7506_v47 = vrot.slane %v310_v57, %v6676_v42  ;;  %v10247_v13 = vld [vmem:[#allocation15_spill] sm:$0xff] }
 0x155   : > { %10240 = vst [vmem:[#allocation8_spill] sm:$0xff] %v7481_v39  ;;  %v10246_v39 = vld [vmem:[#allocation14_spill] sm:$0xff] }
 0x156   : > { %2452 = vrot.lane.b32.xlu1 %v6048_v2, %s6288_s17  ;;  %10242 = vst [vmem:[#allocation30_spill] sm:$0xff] %v7498_v16  ;;  %v7512_v2 = vrot.slane %v10245_v38, %v6607_v21  ;;  %v10248_v32 = vpack.i.b16 %v10246_v39, %v10247_v13  ;;  %v6081_v5 = vcombine.high %v7498_v16, %v7498_v16 }
 0x157   : > { %v10251_v39 = vcombine.high %v6981_v33, %v7004_v34  ;;  %v6090_v34 = vcombine.high %v7130_v25, %v7130_v25 }
 0x158   : > { %v7500_v53 = vpop.permute.xlu1 %1911  ;;  %2447 = vrot.lane.b32.xlu0 %v6047_v9, %s6286_s15  ;;  %v7518_v48 = vrot.slane %v10248_v32, %v6607_v21  ;;  %v7521_v9 = vrot.slane %v805_v15, %v6607_v21  ;;  %v5942_v32 = vcombine.low %v7506_v47, %v7506_v47 }
 0x15a   : > { %2738 = vrot.lane.b32.xlu1 %v6148_v49, %s6289_s23  ;;  %v7527_v57 = vpop.permute.xlu0 %725  ;;  %v7542_v49 = vrot.slane %v10251_v39, %v6676_v42  ;;  %v843_v15 = vcombine.low %v7521_v9, %v7524_v27  ;;  %v1186_v31 = vcombine.low %v7512_v2, %v7518_v48 }
 0x15b   : > { %10249 = vst [vmem:[#allocation28_spill] sm:$0xff] %v7527_v57 }
 0x15c   : > { %v7533_v38 = vpop.permute.xlu1 %1590  ;;  %2733 = vrot.lane.b32.xlu0 %v6147_v22, %s6287_s16  ;;  %v5959_v22 = vcombine.low %v7542_v49, %v7542_v49  ;;  %v7562_v39 = vrot.slane %v843_v15, %v6676_v42 }
 0x15d   : > { %10250 = vst [vmem:[#allocation27_spill] sm:$0xff] %v7533_v38 }
 0x15e   : > { %v7546_v60 = vpop.permute.xlu0 %2713  ;;  %404 = vrot.lane.b32.xlu1 %v6081_v5, %s6284_s13  ;;  %10252 = vst [vmem:[#allocation46_spill] sm:$0xff] %v7562_v39  ;;  %v7565_v5 = vrot.slane %v1186_v31, %v6676_v42  ;;  %v6097_v15 = vcombine.high %v7562_v39, %v7562_v39 }
 0x160   : > { %v7551_v13 = vpop.permute.xlu1 %1861  ;;  %399 = vrot.lane.b32.xlu0 %v5942_v32, %s6283_s12  ;;  %10253 = vst [vmem:[#allocation32_spill] sm:$0xff] %v7565_v5  ;;  %v6098_v32 = vcombine.high %v7243_v54, %v7243_v54  ;;  %v6105_v31 = vcombine.high %v7565_v5, %v7565_v5 }
 0x162   : > { %v7556_v33 = vpop.permute.xlu0 %2708  ;;  %705 = vrot.lane.b32.xlu1 %v5959_v22, %s6286_s15  ;;  %v10255_v22 = vcombine.low %v6968_v0, %v6990_v46 }
 0x164   : > { %v7567_v21 = vpop.permute.xlu1 %1876  ;;  %700 = vrot.lane.b32.xlu0 %v6090_v34, %s6285_s14  ;;  %v7576_v16 = vrot.slane %v10255_v22, %v6676_v42 }
 0x165   : > { %10254 = vst [vmem:[#allocation33_spill] sm:$0xff] %v7567_v21  ;;  %v6132_v21 = vcombine.high %v7438_v20, %v7438_v20 }
 0x166   : > { %v7578_v25 = vpop.permute.xlu0 %2432  ;;  %976 = vrot.lane.b32.xlu1 %v6098_v32, %s6285_s14  ;;  %v5984_v54 = vcombine.low %v7576_v16, %v7576_v16  ;;  %v10256_v32 = vcombine.high %v6860_v62, %v6865_v41  ;;  %v345_v62 = vcombine.high %v7321_v11, %v7324_v43  ;;  %v6144_v11 = vcombine.high %v7335_v35, %v7335_v35 }
 0x167   : > { %v6136_v43 = vcombine.high %v7175_v61, %v7175_v61  ;;  %v6143_v35 = vcombine.high %v7192_v14, %v7192_v14  ;;  %v6095_v61 = vcombine.high %v7382_v59, %v7382_v59  ;;  %v6152_v14 = vcombine.high %v7205_v37, %v7205_v37 }
 0x168   : > { %v7585_v34 = vpop.permute.xlu1 %2166  ;;  %971 = vrot.lane.b32.xlu0 %v6097_v15, %s6284_s13  ;;  %v7597_v22 = vrot.slane %v10256_v32, %v6676_v42  ;;  %v6115_v15 = vcombine.high %v7418_v29, %v7418_v29  ;;  %v6124_v29 = vcombine.high %v7297_v30, %v7297_v30  ;;  %v7622_v32 = vrot.slane %v345_v62, %v6676_v42 }
 0x16a   : > { %v7590_v57 = vpop.permute.xlu0 %2718  ;;  %1314 = vrot.lane.b32.xlu1 %v6105_v31, %s6284_s13  ;;  %v6002_v31 = vcombine.low %v7597_v22, %v7597_v22 }
 0x16c   : > { %v7599_v39 = vpop.permute.xlu1 %2437  ;;  %1309 = vrot.lane.b32.xlu0 %v5984_v54, %s6283_s12 }
 0x16e   : > { %v7604_v5 = vpop.permute.xlu0 %1901  ;;  %1610 = vrot.lane.b32.xlu1 %v6115_v15, %s6287_s16 }
 0x170   : > { %v7613_v41 = vpop.permute.xlu1 %2723  ;;  %1605 = vrot.lane.b32.xlu0 %v6002_v31, %s6288_s17 }
 0x172   : > { %v7616_v54 = vpop.permute.xlu0 %1896  ;;  %2186 = vrot.lane.b32.xlu1 %v6132_v21, %s6289_s23  ;;  %v5952_v21 = vcombine.low %v7622_v32, %v7622_v32 }
 0x174   : > { %v7624_v15 = vpop.permute.xlu1 %690  ;;  %1891 = vrot.lane.b32.xlu0 %v6124_v29, %s6289_s23  ;;  %v10259_v29 = vcombine.high %v7067_v44, %v7072_v17  ;;  %v6086_v17 = vcombine.high %v7369_v23, %v7369_v23 }
 0x175   : > { %10257 = vst [vmem:[#allocation18_spill] sm:$0xff] %v7624_v15 }
 0x176   : > { %v7631_v20 = vpop.permute.xlu0 %1620  ;;  %2497 = vrot.lane.b32.xlu1 %v6144_v11, %s6289_s23  ;;  %v7653_v11 = vrot.slane %v10259_v29, %v6676_v42 }
 0x178   : > { %v7636_v30 = vpop.permute.xlu1 %1001  ;;  %2221 = vrot.lane.b32.xlu0 %v6136_v43, %s6289_s23  ;;  %v5981_v44 = vcombine.low %v7653_v11, %v7653_v11 }
 0x179   : > { %10258 = vst [vmem:[#allocation17_spill] sm:$0xff] %v7636_v30  ;;  %v10264_v30 = vcombine.high %v7042_v50, %v7053_v26  ;;  %v6110_v26 = vcombine.high %v7252_v18, %v7252_v18 }
 0x17a   : > { %v7639_v31 = vpop.permute.xlu0 %1906  ;;  %449 = vrot.lane.b32.xlu1 %v5952_v21, %s6286_s15  ;;  %v10260_v21 = vcombine.high %v6836_v63, %v6830_v6  ;;  %v10261_v6 = vld [vmem:[#allocation43_spill] sm:$0xff]  ;;  %v10262_v63 = vld [vmem:[#allocation44_spill] sm:$0xff] }
 0x17b   : > { %v10263_v29 = vcombine.high %v10261_v6, %v10262_v63  ;;  %v926_v38 = vrot.slane %v10264_v30, %v6676_v42 }
 0x17c   : > { %v7644_v62 = vpop.permute.xlu1 %1635  ;;  %2492 = vrot.lane.b32.xlu0 %v6143_v35, %s6287_s16  ;;  %v7664_v35 = vrot.slane %v10260_v21, %v6676_v42 }
 0x17d   : > { %v684_v21 = vrot.slane %v10263_v29, %v6676_v42 }
 0x17e   : > { %v7655_v43 = vpop.permute.xlu0 %1585  ;;  %750 = vrot.lane.b32.xlu1 %v6095_v61, %s6287_s16  ;;  %v5994_v37 = vcombine.low %v7664_v35, %v7664_v35 }
 0x180   : > { %v7666_v59 = vpop.permute.xlu1 %1921  ;;  %2773 = vrot.lane.b32.xlu0 %v6152_v14, %s6289_s23  ;;  %v379_v14 = vcombine.high %v7338_v24, %v7341_v28  ;;  %v6140_v24 = vcombine.high %v7462_v58, %v7462_v58  ;;  %v1289_v58 = vcombine.high %v7219_v56, %v7215_v45  ;;  %v6139_v56 = vcombine.high %v7477_v3, %v7477_v3 }
 0x181   : > { %v10267_v3 = vcombine.high %v7014_v36, %v7019_v10  ;;  %v277_v10 = vcombine.high %v7448_v55, %v7451_v1 }
 0x182   : > { %v7673_v61 = vpop.permute.xlu0 %1871  ;;  %1021 = vrot.lane.b32.xlu1 %v5981_v44, %s6288_s17  ;;  %v5967_v44 = vcombine.low %v684_v21, %v684_v21  ;;  %v7695_v6 = vrot.slane %v379_v14, %v6676_v42  ;;  %v6096_v14 = vcombine.high %v684_v21, %v684_v21  ;;  %v1303_v18 = vrot.slane %v1289_v58, %v6676_v42 }
 0x184   : > { %v7684_v15 = vpop.permute.xlu1 %2211  ;;  %444 = vrot.lane.b32.xlu0 %v6086_v17, %s6285_s14  ;;  %v5980_v17 = vcombine.low %v926_v38, %v926_v38  ;;  %v5995_v21 = vcombine.low %v1303_v18, %v1303_v18 }
 0x186   : > { %v7687_v23 = vpop.permute.xlu0 %1630  ;;  %1359 = vrot.lane.b32.xlu1 %v5994_v37, %s6286_s15  ;;  %v5953_v37 = vcombine.low %v7695_v6, %v7695_v6 }
 0x188   : > { %v7697_v63 = vpop.permute.xlu1 %2482  ;;  %745 = vrot.lane.b32.xlu0 %v5967_v44, %s6288_s17 }
 0x18a   : > { %v7702_v28 = vpop.permute.xlu0 %1916  ;;  %2462 = vrot.lane.b32.xlu1 %v6140_v24, %s6289_s23  ;;  %v6120_v24 = vcombine.high %v7276_v12, %v7276_v12  ;;  %v6082_v12 = vcombine.high %v7506_v47, %v7506_v47 }
 0x18c   : > { %v7707_v50 = vpop.permute.xlu1 %2763  ;;  %1016 = vrot.lane.b32.xlu0 %v5980_v17, %s6286_s15 }
 0x18e   : > { %v7712_v30 = vpop.permute.xlu0 %2206  ;;  %454 = vrot.lane.b32.xlu1 %v5953_v37, %s6288_s17  ;;  %v6103_v37 = vcombine.high %v926_v38, %v926_v38  ;;  %v6087_v38 = vcombine.high %v7622_v32, %v7622_v32  ;;  %v10268_v32 = vcombine.high %v6968_v0, %v6990_v46  ;;  %v6106_v0 = vcombine.high %v7576_v16, %v7576_v16 }
 0x18f   : > { %v6116_v16 = vcombine.high %v7597_v22, %v7597_v22  ;;  %v6091_v22 = vcombine.high %v7542_v49, %v7542_v49 }
 0x190   : > { %v7717_v29 = vpop.permute.xlu1 %695  ;;  %1354 = vrot.lane.b32.xlu0 %v6110_v26, %s6285_s14  ;;  %v844_v26 = vcombine.high %v7521_v9, %v7524_v27  ;;  %v1235_v36 = vrot.slane %v10268_v32, %v6676_v42 }
 0x191   : > { %10265 = vst [vmem:[#allocation39_spill] sm:$0xff] %v7717_v29 }
 0x192   : > { %v7720_v44 = vpop.permute.xlu0 %2477  ;;  %755 = vrot.lane.b32.xlu1 %v6096_v14, %s6289_s23  ;;  %v858_v27 = vrot.slane %v844_v26, %v6676_v42 }
 0x194   : > { %v7726_v17 = vpop.permute.xlu1 %966  ;;  %1650 = vrot.lane.b32.xlu0 %v6120_v24, %s6289_s23  ;;  %v7750_v24 = vrot.slane %v10267_v3, %v6676_v42  ;;  %v291_v3 = vrot.slane %v277_v10, %v6676_v42 }
 0x195   : > { %10266 = vst [vmem:[#allocation40_spill] sm:$0xff] %v7726_v17 }
 0x196   : > { %v7729_v45 = vpop.permute.xlu0 %2758  ;;  %1026 = vrot.lane.b32.xlu1 %v6103_v37, %s6287_s16  ;;  %v5960_v37 = vcombine.low %v7750_v24, %v7750_v24  ;;  %v6083_v55 = vcombine.high %v291_v3, %v291_v3 }
 0x198   : > { %v7736_v14 = vpop.permute.xlu1 %1344  ;;  %2457 = vrot.lane.b32.xlu0 %v6139_v56, %s6287_s16 }
 0x19a   : > { %v7741_v58 = vpop.permute.xlu0 %730  ;;  %1364 = vrot.lane.b32.xlu1 %v5995_v21, %s6288_s17  ;;  %v6099_v21 = vcombine.high %v858_v27, %v858_v27 }
 0x19c   : > { %v7752_v9 = vpop.permute.xlu1 %1640  ;;  %409 = vrot.lane.b32.xlu0 %v6082_v12, %s6285_s14  ;;  %v5973_v12 = vcombine.low %v858_v27, %v858_v27  ;;  %v10269_v27 = vcombine.high %v7120_v7, %v7123_v19  ;;  %v1187_v19 = vcombine.high %v7512_v2, %v7518_v48 }
 0x19e   : > { %v7756_v47 = vpop.permute.xlu0 %1595  ;;  %459 = vrot.lane.b32.xlu1 %v6087_v38, %s6287_s16  ;;  %v5988_v38 = vcombine.low %v1235_v36, %v1235_v36 }
 0x1a0   : > { %v7767_v56 = vpop.permute.xlu1 %1926  ;;  %710 = vrot.lane.b32.xlu0 %v5960_v37, %s6288_s17  ;;  %v892_v37 = vrot.slane %v10269_v27, %v6676_v42 }
 0x1a2   : > { %v7770_v26 = vpop.permute.xlu0 %1881  ;;  %991 = vrot.lane.b32.xlu1 %v6099_v21, %s6287_s16  ;;  %v6100_v21 = vcombine.high %v892_v37, %v892_v37  ;;  %v5974_v48 = vcombine.low %v892_v37, %v892_v37 }
 0x1a4   : > { %v7774_v29 = vpop.permute.xlu1 %2216  ;;  %981 = vrot.lane.b32.xlu0 %v5973_v12, %s6286_s15  ;;  %v5945_v12 = vcombine.low %v291_v3, %v291_v3  ;;  %v6108_v3 = vcombine.high %v1235_v36, %v1235_v36 }
 0x1a6   : > { %v7779_v46 = vpop.permute.xlu0 %2171  ;;  %1329 = vrot.lane.b32.xlu1 %v5988_v38, %s6288_s17 }
 0x1a8   : > { %v7782_v1 = vpop.permute.xlu1 %2487  ;;  %1319 = vrot.lane.b32.xlu0 %v6106_v0, %s6285_s14  ;;  %v6112_v0 = vcombine.high %v1303_v18, %v1303_v18  ;;  %v1201_v18 = vrot.slane %v1187_v19, %v6676_v42 }
 0x1aa   : > { %v7789_v32 = vpop.permute.xlu0 %2442  ;;  %424 = vrot.lane.b32.xlu1 %v6083_v55, %s6287_s16  ;;  %v5987_v49 = vcombine.low %v1201_v18, %v1201_v18 }
 0x1ac   : > { %v7794_v10 = vpop.permute.xlu1 %2768  ;;  %1615 = vrot.lane.b32.xlu0 %v6116_v16, %s6289_s23  ;;  %v311_v16 = vcombine.high %v7466_v8, %v7470_v4 }
 0x1ae   : > { %v7797_v38 = vpop.permute.xlu0 %2728  ;;  %996 = vrot.lane.b32.xlu1 %v6100_v21, %s6289_s23  ;;  %v325_v36 = vrot.slane %v311_v16, %v6676_v42 }
 0x1b0   : > { %v7800_v7 = vpop.permute.xlu1 %439  ;;  %414 = vrot.lane.b32.xlu0 %v5945_v12, %s6286_s15  ;;  %v5946_v19 = vcombine.low %v325_v36, %v325_v36 }
 0x1b1   : > { %10270 = vst [vmem:[#allocation10_spill] sm:$0xff] %v7800_v7 }
 0x1b2   : > { %v7805_v55 = vpop.permute.xlu0 %434  ;;  %1374 = vrot.lane.b32.xlu1 %v6112_v0, %s6289_s23 }
 0x1b3   : > { %10271 = vst [vmem:[#allocation11_spill] sm:$0xff] %v7805_v55 }
 0x1b4   : > { %v7810_v27 = vpop.permute.xlu1 %740  ;;  %715 = vrot.lane.b32.xlu0 %v6091_v22, %s6287_s16  ;;  %v6092_v22 = vcombine.high %v7750_v24, %v7750_v24  ;;  %v6088_v24 = vcombine.high %v7695_v6, %v7695_v6  ;;  %v6084_v6 = vcombine.high %v325_v36, %v325_v36 }
 0x1b5   : > { %10272 = vst [vmem:[#allocation12_spill] sm:$0xff] %v7810_v27 }
 0x1b6   : > { %v7816_v21 = vpop.permute.xlu0 %735  ;;  %1339 = vrot.lane.b32.xlu1 %v6108_v3, %s6289_s23 }
 0x1b8   : > { %v7819_v2 = vpop.permute.xlu1 %1011  ;;  %986 = vrot.lane.b32.xlu0 %v5974_v48, %s6288_s17  ;;  %v6104_v48 = vcombine.high %v7653_v11, %v7653_v11  ;;  %v6107_v11 = vcombine.high %v1201_v18, %v1201_v18  ;;  %v2861_v18 = vld [vmem:[%s10062_s2] sm:$0xff] }
 0x1b9   : > { %10273 = vst [vmem:[#allocation13_spill] sm:$0xff] %v7819_v2  ;;  %v10122_v2 = vmov 0  }
 0x1ba   : > { %v7823_v12 = vpop.permute.xlu0 %1006  ;;  %2907 = vmatprep.mubr.bf16.mxu0 %v10122_v2  ;;  %6208 = vset.pattern.permute.xlu0 %v10122_v2 }
 0x1bb   : > { %5846 = vmatprep.mubr.bf16.mxu1 %v10122_v2 }
 0x1bc   : > { %v7825_v0 = vpop.permute.xlu1 %1349  ;;  %1324 = vrot.lane.b32.xlu0 %v5987_v49, %s6286_s15 }
 0x1bd   : > { %10274 = vst [vmem:[#allocation14_spill] sm:$0xff] %v7825_v0 }
 0x1be   : > { %v7828_v8 = vpop.permute.xlu0 %1600 }
 0x1c0   : > { %v7830_v4 = vpop.permute.xlu1 %1645  ;;  %419 = vrot.lane.b32.xlu0 %v5946_v19, %s6288_s17  ;;  %v6111_v19 = vcombine.high %v7664_v35, %v7664_v35 }
 0x1c2   : > { %v7833_v37 = vpop.permute.xlu0 %1886 }
 0x1c4   : > { %v7837_v3 = vpop.permute.xlu1 %2181  ;;  %720 = vrot.lane.b32.xlu0 %v6092_v22, %s6289_s23 }
 0x1c6   : > { %v7840_v16 = vpop.permute.xlu0 %2176 }
 0x1c8   : > { %v7844_v49 = vpop.permute.xlu1 %2452  ;;  %1031 = vrot.lane.b32.xlu0 %v6104_v48, %s6289_s23 }
 0x1ca   : > { %v7849_v42 = vpop.permute.xlu0 %2447 }
 0x1cc   : > { %v2739_v7 = vpop.permute.xlu1 %2738  ;;  %1369 = vrot.lane.b32.xlu0 %v6111_v19, %s6287_s16 }
 0x1ce   : > { %v2734_v22 = vpop.permute.xlu0 %2733 }
 0x1d0   : > { %464 = vrot.lane.b32.xlu0 %v6088_v24, %s6289_s23  ;;  %v7855_v17 = vpop.permute.xlu1 %404 }
 0x1d1   : > { %10275 = vst [vmem:[#allocation15_spill] sm:$0xff] %v7855_v17 }
 0x1d2   : > { %v7860_v35 = vpop.permute.xlu0 %399 }
 0x1d3   : > { %10276 = vst [vmem:[#allocation43_spill] sm:$0xff] %v7860_v35 }
 0x1d4   : > { %1334 = vrot.lane.b32.xlu0 %v6107_v11, %s6287_s16  ;;  %v7863_v48 = vpop.permute.xlu1 %705 }
 0x1d5   : > { %10277 = vst [vmem:[#allocation44_spill] sm:$0xff] %v7863_v48 }
 0x1d6   : > { %v7865_v19 = vpop.permute.xlu0 %700 }
 0x1d7   : > { %10278 = vst [vmem:[#allocation50_spill] sm:$0xff] %v7865_v19 }
 0x1d8   : > { %429 = vrot.lane.b32.xlu0 %v6084_v6, %s6289_s23  ;;  %v7868_v24 = vpop.permute.xlu1 %976 }
 0x1d9   : > { %10279 = vst [vmem:[#allocation51_spill] sm:$0xff] %v7868_v24  ;;  %v10283_v24 = vld [vmem:[#allocation47_spill] sm:$0xff] }
 0x1da   : > { %v7873_v17 = vpop.permute.xlu0 %971  ;;  %v2777_v19 = vsel %vm466_vm6, %v10283_v24, %v7556_v33 }
 0x1db   : > { %10280 = vst [vmem:[#allocation52_spill] sm:$0xff] %v7873_v17  ;;  %v10284_v17 = vld [vmem:[#allocation26_spill] sm:$0xff] }
 0x1dc   : > { %v7875_v2 = vpop.permute.xlu1 %1314  ;;  %2864 = vperm.xlu0 %6208, %v2861_v18   ;;  %v2792_v18 = vsel %vm466_vm6, %v10284_v17, %v7404_v40 }
 0x1dd   : > { %10281 = vst [vmem:[#allocation53_spill] sm:$0xff] %v7875_v2  ;;  %v2779_v2 = vsel %vm470_vm7, %v2777_v19, %v7546_v60  ;;  %v2794_v55 = vsel %vm470_vm7, %v2792_v18, %v7376_v51  ;;  %v10287_v18 = vld [vmem:[#allocation22_spill] sm:$0xff] }
 0x1de   : > { %v7877_v35 = vpop.permute.xlu0 %1309  ;;  %v2781_v0 = vsel %vm473_vm9, %v2779_v2, %v7590_v57  ;;  %v2796_v40 = vsel %vm473_vm9, %v2794_v55, %v7432_v52 }
 0x1df   : > { %10282 = vst [vmem:[#allocation54_spill] sm:$0xff] %v7877_v35  ;;  %v2783_v33 = vsel %vm476_vm8, %v2781_v0, %v7613_v41  ;;  %v2798_v17 = vsel %vm476_vm8, %v2796_v40, %v7729_v45  ;;  %v10288_v40 = vld [vmem:[#allocation6_spill] sm:$0xff] }
 0x1e0   : > { %v7879_v11 = vpop.permute.xlu1 %1610  ;;  %v2785_v60 = vsel %vm479_vm10, %v2783_v33, %v7797_v38  ;;  %v2800_v51 = vsel %vm479_vm10, %v2798_v17, %v7707_v50  ;;  %v10285_v50 = vld [vmem:[#allocation49_spill] sm:$0xff] }
 0x1e1   : > { %v2787_v57 = vsel %vm482_vm11, %v2785_v60, %v2734_v22  ;;  %v2802_v52 = vsel %vm482_vm11, %v2800_v51, %v7794_v10  ;;  %v1945_v19 = vsel %vm466_vm6, %v10285_v50, %v7616_v54  ;;  %v10289_v60 = vld [vmem:[#allocation31_spill] sm:$0xff] }
 0x1e2   : > { %v7881_v36 = vpop.permute.xlu0 %1605  ;;  %v2789_v41 = vsel %vm485_vm12, %v2787_v57, %v2739_v7  ;;  %v10286_v7 = vld [vmem:[#allocation36_spill] sm:$0xff]  ;;  %v2516_v17 = vsel %vm466_vm6, %v10289_v60, %v10288_v40  ;;  %v1947_v57 = vsel %vm470_vm7, %v1945_v19, %v7604_v5  ;;  %v10293_v19 = vld [vmem:[#allocation34_spill] sm:$0xff] }
 0x1e3   : > { %v2871_v45 = vsel %vm2829_vm13, %v2789_v41, 0  ;;  %v2240_v10 = vsel %vm466_vm6, %v10287_v18, %v10286_v7  ;;  %v10290_v41 = vld [vmem:[#allocation9_spill] sm:$0xff]  ;;  %v1949_v54 = vsel %vm473_vm9, %v1947_v57, %v7639_v31 }
 0x1e4   : > { %v7883_v48 = vpop.permute.xlu1 %2186  ;;  %v1951_v5 = vsel %vm476_vm8, %v1949_v54, %v7500_v53 }
 0x1e5   : > { %v1953_v31 = vsel %vm479_vm10, %v1951_v5, %v7702_v28 }
 0x1e6   : > { %v7885_v6 = vpop.permute.xlu0 %1891 }
 0x1e8   : > { %v2498_v27 = vpop.permute.xlu1 %2497 }
 0x1ea   : > { %v2222_v35 = vpop.permute.xlu0 %2221 }
 0x1ec   : > { %v7901_v24 = vpop.permute.xlu1 %449 }
 0x1ee   : > { %v2493_v2 = vpop.permute.xlu0 %2492 }
 0x1f0   : > { %v7915_v55 = vpop.permute.xlu1 %750 }
 0x1f2   : > { %v2774_v0 = vpop.permute.xlu0 %2773 }
 0x1f3   : > { %v2804_v38 = vsel %vm485_vm12, %v2802_v52, %v2774_v0  ;;  %v2242_v52 = vsel %vm470_vm7, %v2240_v10, %v10290_v41  ;;  %v10291_v0 = vld [vmem:[#allocation25_spill] sm:$0xff]  ;;  %v1955_v41 = vsel %vm482_vm11, %v1953_v31, %v7666_v59  ;;  %v10296_v31 = vld [vmem:[#allocation35_spill] sm:$0xff] }
 0x1f4   : > { %6072 = vmatprep.subr.msk.bf16.mxu0 %vm2829_vm13, %v2804_v38  ;;  %v7928_v33 = vpop.permute.xlu1 %1021  ;;  %v2518_v38 = vsel %vm470_vm7, %v2516_v17, %v10291_v0  ;;  %v2244_v18 = vsel %vm473_vm9, %v2242_v52, %v10293_v19  ;;  %v1957_v54 = vsel %vm485_vm12, %v1955_v41, %v7767_v56  ;;  %v10295_v19 = vld [vmem:[#allocation38_spill] sm:$0xff]  ;;  %v10299_v41 = vld [vmem:[#allocation7_spill] sm:$0xff] }
 0x1f5   : > { %2886 = vmatpush1.bf16.msra.mxu0 %v2871_v45  ;;  %v10292_v45 = vld [vmem:[#allocation42_spill] sm:$0xff]  ;;  %v2520_v7 = vsel %vm473_vm9, %v2518_v38, %v7720_v44  ;;  %v2246_v60 = vsel %vm476_vm8, %v2244_v18, %v7712_v30  ;;  %v1930_v18 = vsel %vm466_vm6, %v10295_v19, %v7551_v13  ;;  %v10301_v13 = vld [vmem:[#allocation45_spill] sm:$0xff] }
 0x1f6   : > { %v7920_v22 = vpop.permute.xlu0 %444  ;;  %v1669_v50 = vsel %vm466_vm6, %v10292_v45, %v7631_v20  ;;  %v10294_v20 = vld [vmem:[#allocation8_spill] sm:$0xff]  ;;  %v2522_v44 = vsel %vm476_vm8, %v2520_v7, %v7697_v63  ;;  %v2248_v28 = vsel %vm479_vm10, %v2246_v60, %v7684_v15  ;;  %v10297_v60 = vld [vmem:[#allocation23_spill] sm:$0xff] }
 0x1f7   : > { %v1671_v17 = vsel %vm470_vm7, %v1669_v50, %v10294_v20  ;;  %v2524_v57 = vsel %vm479_vm10, %v2522_v44, %v7782_v1  ;;  %v2250_v63 = vsel %vm482_vm11, %v2248_v28, %v7774_v29  ;;  %v2225_v20 = vsel %vm466_vm6, %v10297_v60, %v10296_v31  ;;  %v10298_v44 = vld [vmem:[#allocation48_spill] sm:$0xff] }
 0x1f8   : > { %v7952_v10 = vpop.permute.xlu1 %1359  ;;  %v1673_v53 = vsel %vm473_vm9, %v1671_v17, %v7687_v23  ;;  %v2526_v30 = vsel %vm482_vm11, %v2524_v57, %v2493_v2  ;;  %v2252_v1 = vsel %vm485_vm12, %v2250_v63, %v2222_v35  ;;  %v2820_v2 = vrot.slane %v1957_v54, 6 }
 0x1f9   : > { %v1675_v23 = vsel %vm476_vm8, %v1673_v53, %v7644_v62  ;;  %v2528_v15 = vsel %vm485_vm12, %v2526_v30, %v2498_v27  ;;  %v2824_v56 = vrot.slane %v2252_v1, 4  ;;  %v2501_v53 = vsel %vm466_vm6, %v10298_v44, %v7578_v25  ;;  %v10300_v30 = vld [vmem:[#allocation29_spill] sm:$0xff] }
 0x1fa   : > { %v7935_v51 = vpop.permute.xlu0 %745  ;;  %v1677_v59 = vsel %vm479_vm10, %v1675_v23, %v7752_v9  ;;  %v2828_v50 = vrot.slane %v2528_v15, 2  ;;  %v2503_v57 = vsel %vm470_vm7, %v2501_v53, %v7599_v39  ;;  %v1932_v28 = vsel %vm470_vm7, %v1930_v18, %v10299_v41 }
 0x1fb   : > { %v1679_v38 = vsel %vm482_vm11, %v1677_v59, %v7830_v4  ;;  %v2227_v54 = vsel %vm470_vm7, %v2225_v20, %v10300_v30  ;;  %v1654_v63 = vsel %vm466_vm6, %v10301_v13, %v7655_v43  ;;  %v1934_v23 = vsel %vm473_vm9, %v1932_v28, %v7673_v61  ;;  %v10302_v43 = vld [vmem:[#allocation27_spill] sm:$0xff]  ;;  %v10303_v61 = vld [vmem:[#allocation33_spill] sm:$0xff]  ;;  %v10304_v28 = vld [vmem:[#allocation28_spill] sm:$0xff] }
 0x1fc   : > { %v2463_v0 = vpop.permute.xlu1 %2462  ;;  %v2505_v1 = vsel %vm473_vm9, %v2503_v57, %v7789_v32  ;;  %v2229_v25 = vsel %vm473_vm9, %v2227_v54, %v7585_v34  ;;  %v10305_v30 = vld [vmem:[#allocation37_spill] sm:$0xff] }
 0x1fd   : > { %v2507_v39 = vsel %vm476_vm8, %v2505_v1, %v7849_v42  ;;  %v774_v54 = vsel %vm466_vm6, %v10305_v30, %v10304_v28  ;;  %v10306_v13 = vld [vmem:[#allocation17_spill] sm:$0xff]  ;;  %v10308_v1 = vld [vmem:[#allocation20_spill] sm:$0xff] }
 0x1fe   : > { %v7954_v40 = vpop.permute.xlu0 %1016 }
 0x200   : > { %v7990_v7 = vpop.permute.xlu1 %454 }
 0x202   : > { %v7973_v52 = vpop.permute.xlu0 %1354 }
 0x204   : > { %v7995_v4 = vpop.permute.xlu1 %755 }
 0x206   : > { %v1651_v45 = vpop.permute.xlu0 %1650 }
 0x207   : > { %v1681_v29 = vsel %vm485_vm12, %v1679_v38, %v1651_v45  ;;  %v1656_v38 = vsel %vm470_vm7, %v1654_v63, %v10302_v43  ;;  %v1936_v45 = vsel %vm476_vm8, %v1934_v23, %v10303_v61  ;;  %v10307_v63 = vld [vmem:[#allocation21_spill] sm:$0xff]  ;;  %v10309_v61 = vld [vmem:[#allocation11_spill] sm:$0xff] }
 0x208   : > { %v2849_v62 = vsel %vm2829_vm13, %v1681_v29, %v2820_v2  ;;  %v8025_v59 = vpop.permute.xlu1 %1026  ;;  %v2231_v2 = vsel %vm476_vm8, %v2229_v25, %v7779_v46  ;;  %v1658_v34 = vsel %vm473_vm9, %v1656_v38, %v7756_v47  ;;  %v1938_v42 = vsel %vm479_vm10, %v1936_v45, %v7770_v26  ;;  %v10310_v45 = vld [vmem:[#allocation24_spill] sm:$0xff] }
 0x209   : > { %v2853_v35 = vsel %vm2834_vm14, %v2849_v62, %v2824_v56  ;;  %v2233_v32 = vsel %vm479_vm10, %v2231_v2, %v7840_v16  ;;  %v2509_v56 = vsel %vm479_vm10, %v2507_v39, %v7844_v49  ;;  %v1660_v46 = vsel %vm476_vm8, %v1658_v34, %v7828_v8  ;;  %v10311_v34 = vld [vmem:[#allocation14_spill] sm:$0xff] }
 0x20a   : > { %v2458_v9 = vpop.permute.xlu0 %2457  ;;  %v2858_v27 = vsel %vm2839_vm15, %v2853_v35, %v2828_v50  ;;  %v1940_v29 = vsel %vm482_vm11, %v1938_v42, %v7833_v37  ;;  %v1662_v16 = vsel %vm479_vm10, %v1660_v46, %v7881_v36  ;;  %v2235_v47 = vsel %vm482_vm11, %v2233_v32, %v7837_v3  ;;  %v10313_v46 = vld [vmem:[#allocation13_spill] sm:$0xff] }
 0x20b   : > { %2887 = vmatprep.subr.bf16.mxu0 %v2858_v27  ;;  %v2511_v50 = vsel %vm482_vm11, %v2509_v56, %v2458_v9  ;;  %v1942_v26 = vsel %vm485_vm12, %v1940_v29, %v7885_v6  ;;  %v2237_v49 = vsel %vm485_vm12, %v2235_v47, %v7883_v48  ;;  %v1664_v9 = vsel %vm482_vm11, %v1662_v16, %v7879_v11  ;;  %v10312_v56 = vld [vmem:[#allocation12_spill] sm:$0xff]  ;;  %v10314_v47 = vld [vmem:[#allocation18_spill] sm:$0xff] }
 0x20c   : > { %v1365_v8 = vpop.permute.xlu1 %1364  ;;  %v2513_v35 = vsel %vm485_vm12, %v2511_v50, %v2463_v0  ;;  %v2819_v37 = vrot.slane %v1942_v26, 6  ;;  %v2823_v19 = vrot.slane %v2237_v49, 4  ;;  %v1050_v23 = vsel %vm466_vm6, %v10307_v63, %v10306_v13  ;;  %v10315_v26 = vld [vmem:[#allocation41_spill] sm:$0xff] }
 0x20d   : > { %v2827_v18 = vrot.slane %v2513_v35, 2  ;;  %v1393_v25 = vsel %vm466_vm6, %v10308_v1, %v7736_v14  ;;  %v776_v39 = vsel %vm470_vm7, %v774_v54, %v7741_v58  ;;  %v1052_v38 = vsel %vm470_vm7, %v1050_v23, %v7823_v12  ;;  %v10316_v35 = vld [vmem:[#allocation40_spill] sm:$0xff]  ;;  %v10323_v1 = vld [vmem:[#allocation43_spill] sm:$0xff] }
 0x20e   : > { %v7993_v5 = vpop.permute.xlu0 %409  ;;  %v778_v43 = vsel %vm473_vm9, %v776_v39, %v7816_v21  ;;  %v490_v32 = vsel %vm466_vm6, %v10310_v45, %v10309_v61  ;;  %v1395_v42 = vsel %vm470_vm7, %v1393_v25, %v10311_v34  ;;  %v1054_v58 = vsel %vm473_vm9, %v1052_v38, %v10313_v46  ;;  %v10324_v25 = vld [vmem:[#allocation30_spill] sm:$0xff] }
 0x20f   : > { %v780_v14 = vsel %vm476_vm8, %v778_v43, %v10312_v56  ;;  %v1397_v29 = vsel %vm473_vm9, %v1395_v42, %v7973_v52  ;;  %v1056_v16 = vsel %vm476_vm8, %v1054_v58, %v7954_v40  ;;  %v759_v49 = vsel %vm466_vm6, %v10315_v26, %v10314_v47  ;;  %v10319_v52 = vld [vmem:[#allocation39_spill] sm:$0xff] }
 0x210   : > { %v460_v6 = vpop.permute.xlu1 %459  ;;  %v782_v12 = vsel %vm479_vm10, %v780_v14, %v7935_v51  ;;  %v1058_v54 = vsel %vm479_vm10, %v1056_v16, %v7928_v33  ;;  %v10329_v16 = vld [vmem:[#allocation44_spill] sm:$0xff] }
 0x211   : > { %v784_v30 = vsel %vm482_vm11, %v782_v12, %v7915_v55  ;;  %v1060_v39 = vsel %vm482_vm11, %v1058_v54, %v8025_v59  ;;  %v10325_v55 = vld [vmem:[#allocation50_spill] sm:$0xff]  ;;  %v10327_v59 = vld [vmem:[#allocation53_spill] sm:$0xff] }
 0x212   : > { %v8003_v17 = vpop.permute.xlu0 %710 }
 0x214   : > { %v992_v20 = vpop.permute.xlu1 %991 }
 0x216   : > { %v8027_v15 = vpop.permute.xlu0 %981 }
 0x218   : > { %v8069_v53 = vpop.permute.xlu1 %1329 }
 0x21a   : > { %v8048_v62 = vpop.permute.xlu0 %1319 }
 0x21c   : > { %v8073_v41 = vpop.permute.xlu1 %424 }
 0x21e   : > { %v1616_v27 = vpop.permute.xlu0 %1615 }
 0x21f   : > { %v1666_v36 = vsel %vm485_vm12, %v1664_v9, %v1616_v27  ;;  %v10318_v9 = vld [vmem:[#allocation10_spill] sm:$0xff] }
 0x220   : > { %v2847_v3 = vsel %vm2829_vm13, %v1666_v36, %v2819_v37  ;;  %v997_v21 = vpop.permute.xlu1 %996  ;;  %v10317_v37 = vld [vmem:[#allocation46_spill] sm:$0xff]  ;;  %v761_v36 = vsel %vm470_vm7, %v759_v49, %v10319_v52 }
 0x221   : > { %v2851_v31 = vsel %vm2834_vm14, %v2847_v3, %v2823_v19  ;;  %v1035_v27 = vsel %vm466_vm6, %v10317_v37, %v10316_v35  ;;  %v492_v19 = vsel %vm470_vm7, %v490_v32, %v10318_v9  ;;  %v1399_v3 = vsel %vm476_vm8, %v1397_v29, %v7952_v10 }
 0x222   : > { %v8064_v60 = vpop.permute.xlu0 %414  ;;  %v2855_v48 = vsel %vm2839_vm15, %v2851_v31, %v2827_v18  ;;  %v10320_v18 = vld [vmem:[#allocation52_spill] sm:$0xff]  ;;  %v494_v40 = vsel %vm473_vm9, %v492_v19, %v7920_v22  ;;  %v10321_v31 = vld [vmem:[#allocation54_spill] sm:$0xff]  ;;  %v1401_v13 = vsel %vm479_vm10, %v1399_v3, %v1365_v8  ;;  %v469_v22 = vsel %vm466_vm6, %v10324_v25, %v10323_v1  ;;  %v10326_v8 = vld [vmem:[#allocation51_spill] sm:$0xff] }
 0x223   : > { %2888 = vmatpush1.bf16.msra.mxu0 %v2855_v48  ;;  %v1037_v51 = vsel %vm470_vm7, %v1035_v27, %v10320_v18  ;;  %v10322_v48 = vld [vmem:[#allocation32_spill] sm:$0xff]  ;;  %v786_v10 = vsel %vm485_vm12, %v784_v30, %v7995_v4  ;;  %v763_v38 = vsel %vm473_vm9, %v761_v36, %v10325_v55  ;;  %v496_v33 = vsel %vm476_vm8, %v494_v40, %v7901_v24 }
 0x224   : > { %v1378_v28 = vsel %vm466_vm6, %v10322_v48, %v10321_v31  ;;  %v1375_v23 = vpop.permute.xlu1 %1374  ;;  %v1039_v61 = vsel %vm473_vm9, %v1037_v51, %v10326_v8  ;;  %v498_v32 = vsel %vm479_vm10, %v496_v33, %v7990_v7  ;;  %v2808_v56 = vrot.slane %v786_v10, 6 }
 0x225   : > { %v1041_v4 = vsel %vm476_vm8, %v1039_v61, %v8027_v15  ;;  %v1380_v34 = vsel %vm470_vm7, %v1378_v28, %v10327_v59  ;;  %v500_v14 = vsel %vm482_vm11, %v498_v32, %v460_v6  ;;  %v10328_v15 = vld [vmem:[#allocation15_spill] sm:$0xff]  ;;  %v765_v47 = vsel %vm476_vm8, %v763_v38, %v10329_v16 }
 0x226   : > { %v8067_v0 = vpop.permute.xlu0 %715  ;;  %v1382_v24 = vsel %vm473_vm9, %v1380_v34, %v8048_v62  ;;  %v472_v12 = vsel %vm470_vm7, %v469_v22, %v10328_v15  ;;  %v6291_v25 = vmov 0.0  }
 0x227   : > { %v475_v62 = vsel %vm473_vm9, %v472_v12, %v7993_v5  ;;  %2919 = vst.msk [vmem:[#allocation2] sm:$0xff] %vm2918_vm1, %v6291_v25  ;;  %2920 = vst.msk [vmem:[#allocation2 + $0x8] sm:$0xff] %vm2918_vm1, %v6291_v25 }
 0x228   : > { %v478_v35 = vsel %vm476_vm8, %v475_v62, %v8064_v60  ;;  %v1340_v5 = vpop.permute.xlu1 %1339  ;;  %2923 = vst.msk [vmem:[#allocation2 + $0x18] sm:$0xff] %vm2918_vm1, %v6291_v25  ;;  %2924 = vst.msk [vmem:[#allocation2 + $0x20] sm:$0xff] %vm2918_vm1, %v6291_v25 }
 0x229   : > { %2926 = vst.msk [vmem:[#allocation2 + $0x30] sm:$0xff] %vm2918_vm1, %v6291_v25  ;;  %2927 = vst.msk [vmem:[#allocation2 + $0x38] sm:$0xff] %vm2918_vm1, %v6291_v25 }
 0x22a   : > { %v987_v44 = vpop.permute.xlu0 %986  ;;  %2929 = vst.msk [vmem:[#allocation2 + $0x48] sm:$0xff] %vm2918_vm1, %v6291_v25  ;;  %2930 = vst.msk [vmem:[#allocation2 + $0x50] sm:$0xff] %vm2918_vm1, %v6291_v25 }
 0x22b   : > { %v1043_v46 = vsel %vm479_vm10, %v1041_v4, %v987_v44  ;;  %v767_v44 = vsel %vm479_vm10, %v765_v47, %v8003_v17  ;;  %2932 = vst.msk [vmem:[#allocation2 + $0x60] sm:$0xff] %vm2918_vm1, %v6291_v25  ;;  %2933 = vst.msk [vmem:[#allocation2 + $0x68] sm:$0xff] %vm2918_vm1, %v6291_v25 }
 0x22c   : > { %v769_v37 = vsel %vm482_vm11, %v767_v44, %v8067_v0  ;;  %2935 = vst.msk [vmem:[#allocation2 + $0x78] sm:$0xff] %vm2918_vm1, %v6291_v25  ;;  %2936 = vst.msk [vmem:[#allocation2 + $0x80] sm:$0xff] %vm2918_vm1, %v6291_v25 }
 0x22d   : > { %2938 = vst.msk [vmem:[#allocation2 + $0x90] sm:$0xff] %vm2918_vm1, %v6291_v25  ;;  %2939 = vst.msk [vmem:[#allocation2 + $0x98] sm:$0xff] %vm2918_vm1, %v6291_v25 }
 0x22e   : > { %v1325_v11 = vpop.permute.xlu0 %1324  ;;  %2941 = vst.msk [vmem:[#allocation2 + $0xa8] sm:$0xff] %vm2918_vm1, %v6291_v25  ;;  %2942 = vst.msk [vmem:[#allocation2 + $0xb0] sm:$0xff] %vm2918_vm1, %v6291_v25 }
 0x22f   : > { %v1384_v29 = vsel %vm476_vm8, %v1382_v24, %v1325_v11  ;;  %v1045_v11 = vsel %vm482_vm11, %v1043_v46, %v992_v20  ;;  %2922 = vst.msk [vmem:[#allocation2 + $0x10] sm:$0x3] %vm2921_vm2, %v6291_v25  ;;  %2925 = vst.msk [vmem:[#allocation2 + $0x28] sm:$0x3] %vm2921_vm2, %v6291_v25 }
 0x230   : > { %v1386_v9 = vsel %vm479_vm10, %v1384_v29, %v8069_v53  ;;  %v1047_v60 = vsel %vm485_vm12, %v1045_v11, %v997_v21  ;;  %v2860_v21 = vld [vmem:[%s10061_s1] sm:$0xf]  ;;  %2928 = vst.msk [vmem:[#allocation2 + $0x40] sm:$0x3] %vm2921_vm2, %v6291_v25  ;;  %2931 = vst.msk [vmem:[#allocation2 + $0x58] sm:$0x3] %vm2921_vm2, %v6291_v25 }
 0x231   : > { %v2811_v51 = vrot.slane %v1047_v60, 4  ;;  %2934 = vst.msk [vmem:[#allocation2 + $0x70] sm:$0x3] %vm2921_vm2, %v6291_v25  ;;  %2937 = vst.msk [vmem:[#allocation2 + $0x88] sm:$0x3] %vm2921_vm2, %v6291_v25 }
 0x232   : > { %v8071_v57 = vpop.permute.xlu0 %419  ;;  %2940 = vst.msk [vmem:[#allocation2 + $0xa0] sm:$0x3] %vm2921_vm2, %v6291_v25  ;;  %2943 = vst.msk [vmem:[#allocation2 + $0xb8] sm:$0x3] %vm2921_vm2, %v6291_v25 }
 0x233   : > { %v481_v17 = vsel %vm479_vm10, %v478_v35, %v8071_v57 }
 0x234   : > { %v484_v53 = vsel %vm482_vm11, %v481_v17, %v8073_v41 }
 0x236   : > { %v721_v2 = vpop.permute.xlu0 %720 }
 0x237   : > { %v771_v20 = vsel %vm485_vm12, %v769_v37, %v721_v2 }
 0x238   : > { %v2807_v0 = vrot.slane %v771_v20, 6 }
 0x23a   : > { %v1032_v50 = vpop.permute.xlu0 %1031 }
 0x23b   : > { %v1062_v45 = vsel %vm485_vm12, %v1060_v39, %v1032_v50 }
 0x23c   : > { %v2812_v7 = vrot.slane %v1062_v45, 4  ;;  %v10330_v45 = vld [vmem:[#allocation16_spill] sm:$0xff] }
 0x23e   : > { %v1370_v63 = vpop.permute.xlu0 %1369 }
 0x23f   : > { %v1403_v43 = vsel %vm482_vm11, %v1401_v13, %v1370_v63 }
 0x240   : > { %v1405_v42 = vsel %vm485_vm12, %v1403_v43, %v1375_v23 }
 0x241   : > { %v2816_v26 = vrot.slane %v1405_v42, 2 }
 0x242   : > { %v465_v58 = vpop.permute.xlu0 %464 }
 0x243   : > { %v502_v50 = vsel %vm485_vm12, %v500_v14, %v465_v58 }
 0x244   : > { %v2833_v6 = vsel %vm2829_vm13, %v502_v50, %v2808_v56 }
 0x245   : > { %v2838_v49 = vsel %vm2834_vm14, %v2833_v6, %v2812_v7  ;;  %v10331_v7 = vld [vmem:[#allocation19_spill] sm:$0xff] }
 0x246   : > { %v1335_v27 = vpop.permute.xlu0 %1334  ;;  %v2844_v19 = vsel %vm2839_vm15, %v2838_v49, %v2816_v26 }
 0x247   : > { %v1388_v52 = vsel %vm482_vm11, %v1386_v9, %v1335_v27  ;;  %2889 = vmatprep.subr.bf16.mxu0 %v2844_v19 }
 0x248   : > { %v1390_v36 = vsel %vm485_vm12, %v1388_v52, %v1340_v5 }
 0x249   : > { %v2815_v3 = vrot.slane %v1390_v36, 2 }
 0x24a   : > { %v430_v18 = vpop.permute.xlu0 %429 }
 0x24b   : > { %v487_v40 = vsel %vm485_vm12, %v484_v53, %v430_v18 }
 0x24c   : > { %v2831_v57 = vsel %vm2829_vm13, %v487_v40, %v2807_v0 }
 0x24d   : > { %v2836_v2 = vsel %vm2834_vm14, %v2831_v57, %v2811_v51 }
 0x24e   : > { %v2841_v31 = vsel %vm2839_vm15, %v2836_v2, %v2815_v3 }
 0x24f   : > { %2890 = vmatpush1.bf16.msra.mxu0 %v2841_v31 }
 0x252   : > { %6073 = vmatmul.mubr.msk.bf16.vlgmr.msra.gmra.mxu0 %vm2867_vm0, %v2860_v21 }
 0x257   : > { %v2865_v48 = vpop.permute.xlu0 %2864 }
 0x312   : > { %v2909_v28 = vpop.f32.mrf.mxu0 }
 0x313   : > { %v2910_v41 = vadd.f32 %v2909_v28, %v2865_v48 }
 0x314   : > { %v2911_v30 = vpop.f32.mrf.mxu0 }
 0x315   : > { %v8190_v54 = vmax.f32 %v2910_v41, 0.0  ;;  %v2912_v23 = vadd.f32 %v2911_v30, %v2865_v48 }
 0x316   : > { %v2913_v13 = vpop.f32.mrf.mxu0 }
 0x317   : > { %2951 = vrot.lane.b32.xlu0 %v8190_v54, %s6288_s17  ;;  %2945 = vrot.lane.b32.xlu1 %v8190_v54, %s6289_s23  ;;  %v8204_v1 = vmax.f32 %v2912_v23, 0.0 }
 0x318   : > { %v2914_v63 = vpop.f32.mrf.mxu0 }
 0x31b   : > { %2957 = vrot.lane.b32.xlu0 %v8190_v54, %s6285_s14  ;;  %2948 = vrot.lane.b32.xlu1 %v8190_v54, %s6287_s16 }
 0x31f   : > { %2963 = vrot.lane.b32.xlu0 %v8190_v54, %s6283_s12  ;;  %2954 = vrot.lane.b32.xlu1 %v8190_v54, %s6286_s15 }
 0x323   : > { %2970 = vrot.lane.b32.xlu0 %v8204_v1, %s6287_s16  ;;  %2960 = vrot.lane.b32.xlu1 %v8190_v54, %s6284_s13 }
 0x327   : > { %2976 = vrot.lane.b32.xlu0 %v8204_v1, %s6286_s15  ;;  %2967 = vrot.lane.b32.xlu1 %v8204_v1, %s6289_s23 }
 0x32b   : > { %2982 = vrot.lane.b32.xlu0 %v8204_v1, %s6284_s13  ;;  %2973 = vrot.lane.b32.xlu1 %v8204_v1, %s6288_s17 }
 0x32f   : > { %2979 = vrot.lane.b32.xlu1 %v8204_v1, %s6285_s14 }
 0x333   : > { %2985 = vrot.lane.b32.xlu1 %v8204_v1, %s6283_s12 }
 0x389   : > { %v2952_v22 = vpop.permute.xlu0 %2951  ;;  %v2946_v10 = vpop.permute.xlu1 %2945 }
 0x38a   : > { %v3004_v8 = vcombine.low %v2946_v10, %v2952_v22  ;;  %v3005_v27 = vcombine.high %v2946_v10, %v2952_v22 }
 0x38c   : > { %v3012_v42 = vrot.slane %v3004_v8, %v10330_v45  ;;  %v3019_v51 = vrot.slane %v3005_v27, %v10330_v45 }
 0x38d   : > { %v2958_v39 = vpop.permute.xlu0 %2957  ;;  %v2949_v43 = vpop.permute.xlu1 %2948 }
 0x38e   : > { %v2988_v55 = vcombine.low %v8190_v54, %v2949_v43  ;;  %v2989_v62 = vcombine.high %v8190_v54, %v2949_v43 }
 0x390   : > { %v2996_v32 = vrot.slane %v2988_v55, %v10330_v45  ;;  %v3003_v52 = vrot.slane %v2989_v62, %v10330_v45 }
 0x391   : > { %v2964_v38 = vpop.permute.xlu0 %2963  ;;  %v2955_v33 = vpop.permute.xlu1 %2954 }
 0x392   : > { %v3036_v61 = vcombine.low %v2958_v39, %v2964_v38  ;;  %v3052_v24 = vcombine.low %v2996_v32, %v3012_v42  ;;  %v3053_v44 = vcombine.high %v2996_v32, %v3012_v42  ;;  %v3037_v11 = vcombine.high %v2958_v39, %v2964_v38 }
 0x393   : > { %v3068_v21 = vcombine.low %v3003_v52, %v3019_v51  ;;  %v3069_v38 = vcombine.high %v3003_v52, %v3019_v51 }
 0x394   : > { %v3044_v56 = vrot.slane %v3036_v61, %v10330_v45  ;;  %v3060_v12 = vrot.slane %v3052_v24, %v10331_v7  ;;  %v3051_v60 = vrot.slane %v3037_v11, %v10330_v45  ;;  %v3067_v0 = vrot.slane %v3053_v44, %v10331_v7 }
 0x395   : > { %v8256_v4 = vpop.permute.xlu0 %2970  ;;  %v2961_v59 = vpop.permute.xlu1 %2960  ;;  %v3076_v13 = vrot.slane %v3068_v21, %v10331_v7 }
 0x396   : > { %v3020_v34 = vcombine.low %v2955_v33, %v2961_v59  ;;  %v3021_v16 = vcombine.high %v2955_v33, %v2961_v59  ;;  %v3124_v37 = vcombine.low %v8204_v1, %v8256_v4  ;;  %v3125_v33 = vcombine.high %v8204_v1, %v8256_v4 }
 0x397   : > { %v3083_v1 = vrot.slane %v3069_v38, %v10331_v7 }
 0x398   : > { %v3028_v14 = vrot.slane %v3020_v34, %v10330_v45  ;;  %v3035_v9 = vrot.slane %v3021_v16, %v10330_v45  ;;  %v3132_v18 = vrot.slane %v3124_v37, %v10330_v45  ;;  %v3139_v4 = vrot.slane %v3125_v33, %v10330_v45 }
 0x399   : > { %v8261_v46 = vpop.permute.xlu1 %2967  ;;  %v8263_v29 = vpop.permute.xlu0 %2976 }
 0x39a   : > { %v3084_v58 = vcombine.low %v3028_v14, %v3044_v56  ;;  %v3085_v47 = vcombine.high %v3028_v14, %v3044_v56  ;;  %v3100_v40 = vcombine.low %v3035_v9, %v3051_v60  ;;  %v3101_v22 = vcombine.high %v3035_v9, %v3051_v60 }
 0x39c   : > { %v3092_v50 = vrot.slane %v3084_v58, %v10331_v7  ;;  %v3099_v5 = vrot.slane %v3085_v47, %v10331_v7  ;;  %v3108_v41 = vrot.slane %v3100_v40, %v10331_v7  ;;  %v3115_v34 = vrot.slane %v3101_v22, %v10331_v7 }
 0x39d   : > { %v8266_v15 = vpop.permute.xlu1 %2973  ;;  %v2983_v49 = vpop.permute.xlu0 %2982 }
 0x39e   : > { %v3116_v26 = vcombine.low %v3060_v12, %v3092_v50  ;;  %v3140_v6 = vcombine.low %v8261_v46, %v8266_v15  ;;  %v3117_v19 = vcombine.high %v3060_v12, %v3092_v50  ;;  %v3156_v17 = vcombine.low %v8263_v29, %v2983_v49 }
 0x39f   : > { %v3118_v3 = vcombine.low %v3067_v0, %v3099_v5  ;;  %v3119_v28 = vcombine.high %v3067_v0, %v3099_v5  ;;  %v3120_v10 = vcombine.low %v3076_v13, %v3108_v41  ;;  %v3157_v39 = vcombine.high %v8263_v29, %v2983_v49 }
 0x3a0   : > { %3276 = vrot.lane.b32.xlu0 %v3116_v26, %s6292_s7  ;;  %v3148_v20 = vrot.slane %v3140_v6, %v10330_v45  ;;  %v3164_v57 = vrot.slane %v3156_v17, %v10330_v45  ;;  %v3141_v43 = vcombine.high %v8261_v46, %v8266_v15  ;;  %v3121_v59 = vcombine.high %v3076_v13, %v3108_v41 }
 0x3a1   : > { %v2980_v35 = vpop.permute.xlu1 %2979  ;;  %v3171_v42 = vrot.slane %v3157_v39, %v10330_v45  ;;  %v3122_v58 = vcombine.low %v3083_v1, %v3115_v34  ;;  %v3123_v12 = vcombine.high %v3083_v1, %v3115_v34 }
 0x3a2   : > { %v3188_v2 = vcombine.low %v3132_v18, %v3148_v20  ;;  %v3189_v55 = vcombine.high %v3132_v18, %v3148_v20  ;;  %v3155_v56 = vrot.slane %v3141_v43, %v10330_v45 }
 0x3a4   : > { %3280 = vrot.lane.b32.xlu0 %v3117_v19, %s6292_s7  ;;  %v3196_v30 = vrot.slane %v3188_v2, %v10331_v7  ;;  %v3203_v14 = vrot.slane %v3189_v55, %v10331_v7  ;;  %v3204_v29 = vcombine.low %v3139_v4, %v3155_v56  ;;  %v3205_v6 = vcombine.high %v3139_v4, %v3155_v56 }
 0x3a5   : > { %v2986_v36 = vpop.permute.xlu1 %2985 }
 0x3a6   : > { %v3172_v53 = vcombine.low %v2980_v35, %v2986_v36  ;;  %v3173_v63 = vcombine.high %v2980_v35, %v2986_v36  ;;  %v3212_v16 = vrot.slane %v3204_v29, %v10331_v7  ;;  %v3219_v11 = vrot.slane %v3205_v6, %v10331_v7 }
 0x3a8   : > { %v3180_v31 = vrot.slane %v3172_v53, %v10330_v45  ;;  %3284 = vrot.lane.b32.xlu0 %v3118_v3, %s6292_s7  ;;  %v3187_v8 = vrot.slane %v3173_v63, %v10330_v45 }
 0x3aa   : > { %v3220_v48 = vcombine.low %v3164_v57, %v3180_v31  ;;  %v3221_v23 = vcombine.high %v3164_v57, %v3180_v31  ;;  %v3236_v24 = vcombine.low %v3171_v42, %v3187_v8  ;;  %v3237_v47 = vcombine.high %v3171_v42, %v3187_v8 }
 0x3ac   : > { %v3228_v54 = vrot.slane %v3220_v48, %v10331_v7  ;;  %3288 = vrot.lane.b32.xlu0 %v3119_v28, %s6292_s7  ;;  %v3235_v32 = vrot.slane %v3221_v23, %v10331_v7  ;;  %v3244_v15 = vrot.slane %v3236_v24, %v10331_v7  ;;  %v3251_v44 = vrot.slane %v3237_v47, %v10331_v7 }
 0x3ae   : > { %v3252_v25 = vcombine.low %v3196_v30, %v3228_v54  ;;  %v3253_v61 = vcombine.high %v3196_v30, %v3228_v54  ;;  %v3254_v46 = vcombine.low %v3203_v14, %v3235_v32  ;;  %v3255_v50 = vcombine.high %v3203_v14, %v3235_v32 }
 0x3af   : > { %v3256_v26 = vcombine.low %v3212_v16, %v3244_v15  ;;  %v3257_v62 = vcombine.high %v3212_v16, %v3244_v15  ;;  %v3258_v49 = vcombine.low %v3219_v11, %v3251_v44  ;;  %v3259_v35 = vcombine.high %v3219_v11, %v3251_v44 }
 0x3b0   : > { %3278 = vrot.lane.b32.xlu1 %v3252_v25, %s6292_s7  ;;  %3292 = vrot.lane.b32.xlu0 %v3120_v10, %s6292_s7 }
 0x3b4   : > { %3282 = vrot.lane.b32.xlu1 %v3253_v61, %s6292_s7  ;;  %3296 = vrot.lane.b32.xlu0 %v3121_v59, %s6292_s7 }
 0x3b8   : > { %3286 = vrot.lane.b32.xlu1 %v3254_v46, %s6292_s7  ;;  %3300 = vrot.lane.b32.xlu0 %v3122_v58, %s6292_s7 }
 0x3bc   : > { %3290 = vrot.lane.b32.xlu1 %v3255_v50, %s6292_s7  ;;  %3304 = vrot.lane.b32.xlu0 %v3123_v12, %s6292_s7 }
 0x3c0   : > { %3294 = vrot.lane.b32.xlu1 %v3256_v26, %s6292_s7 }
 0x3c4   : > { %3298 = vrot.lane.b32.xlu1 %v3257_v62, %s6292_s7 }
 0x3c8   : > { %3302 = vrot.lane.b32.xlu1 %v3258_v49, %s6292_s7 }
 0x3cc   : > { %3306 = vrot.lane.b32.xlu1 %v3259_v35, %s6292_s7 }
 0x412   : > { %v3277_v37 = vpop.permute.xlu0 %3276 }
 0x413   : > { %3325 = vst.msk [vmem:[#allocation2 + $0x1] sm:$0xff] %vm3324_vm3, %v3277_v37 }
 0x416   : > { %v3281_v27 = vpop.permute.xlu0 %3280 }
 0x417   : > { %3327 = vst.msk [vmem:[#allocation2 + $0x19] sm:$0xff] %vm3324_vm3, %v3281_v27 }
 0x41a   : > { %v3285_v9 = vpop.permute.xlu0 %3284  ;;  %v3341_v36 = vld [vmem:[#allocation2] sm:$0xff] }
 0x41b   : > { %3329 = vst.msk [vmem:[#allocation2 + $0x31] sm:$0xff] %vm3324_vm3, %v3285_v9 }
 0x41e   : > { %v3289_v19 = vpop.permute.xlu0 %3288  ;;  %v3344_v31 = vld [vmem:[#allocation2 + $0x18] sm:$0xff] }
 0x41f   : > { %3331 = vst.msk [vmem:[#allocation2 + $0x49] sm:$0xff] %vm3324_vm3, %v3289_v19 }
 0x422   : > { %v3279_v5 = vpop.permute.xlu1 %3278  ;;  %v3293_v17 = vpop.permute.xlu0 %3292  ;;  %v3347_v22 = vld [vmem:[#allocation2 + $0x30] sm:$0xff] }
 0x423   : > { %3326 = vst.msk [vmem:[#allocation2 + $0x9] sm:$0xff] %vm3324_vm3, %v3279_v5  ;;  %3333 = vst.msk [vmem:[#allocation2 + $0x61] sm:$0xff] %vm3324_vm3, %v3293_v17 }
 0x426   : > { %v3283_v20 = vpop.permute.xlu1 %3282  ;;  %v3297_v52 = vpop.permute.xlu0 %3296  ;;  %v3350_v1 = vld [vmem:[#allocation2 + $0x48] sm:$0xff] }
 0x427   : > { %3328 = vst.msk [vmem:[#allocation2 + $0x21] sm:$0xff] %vm3324_vm3, %v3283_v20  ;;  %3335 = vst.msk [vmem:[#allocation2 + $0x79] sm:$0xff] %vm3324_vm3, %v3297_v52 }
 0x42a   : > { %v3287_v60 = vpop.permute.xlu1 %3286  ;;  %v3342_v0 = vld [vmem:[#allocation2 + $0x8] sm:$0xff]  ;;  %v3343_v18 = vld [vmem:[#allocation2 + $0x10] sm:$0x3]  ;;  %v3301_v53 = vpop.permute.xlu0 %3300  ;;  %v3353_v26 = vld [vmem:[#allocation2 + $0x60] sm:$0xff] }
 0x42b   : > { %3330 = vst.msk [vmem:[#allocation2 + $0x39] sm:$0xff] %vm3324_vm3, %v3287_v60  ;;  %v8339_v51 = vpack.c.bf16 %v3342_v0, %v3341_v36  ;;  %v8341_v40 = vpack.c.bf16 %v3343_v18, %v3343_v18  ;;  %3337 = vst.msk [vmem:[#allocation2 + $0x91] sm:$0xff] %vm3324_vm3, %v3301_v53 }
 0x42d   : > { %3885 = vrot.lane.b32.xlu0 %v8339_v51, %s6279_s10  ;;  %v4983_v3 = vrot.slane %v8339_v51, 1  ;;  %v4984_v57 = vrot.slane %v8341_v40, 1  ;;  %v3385_v43 = vshrl.u32 %v8339_v51, 16  ;;  %v4143_v16 = vshll.u32 %v8339_v51, 16 }
 0x42e   : > { %v3291_v2 = vpop.permute.xlu1 %3290  ;;  %v3345_v21 = vld [vmem:[#allocation2 + $0x20] sm:$0xff]  ;;  %v3346_v48 = vld [vmem:[#allocation2 + $0x28] sm:$0x3]  ;;  %v3305_v28 = vpop.permute.xlu0 %3304  ;;  %v4148_v19 = vshll.u32 %v8341_v40, 16  ;;  %v3356_v0 = vld [vmem:[#allocation2 + $0x78] sm:$0xff] }
 0x42f   : > { %3332 = vst.msk [vmem:[#allocation2 + $0x51] sm:$0xff] %vm3324_vm3, %v3291_v2  ;;  %v8349_v41 = vpack.c.bf16 %v3345_v21, %v3344_v31  ;;  %v8351_v30 = vpack.c.bf16 %v3346_v48, %v3346_v48  ;;  %3339 = vst.msk [vmem:[#allocation2 + $0xa9] sm:$0xff] %vm3324_vm3, %v3305_v28  ;;  %v8357_v54 = vsel %vm4982_vm4, %v4983_v3, %v4984_v57  ;;  %v4145_v52 = vrot.slane %v4143_v16, 1 }
 0x430   : > { %v5011_v61 = vshrl.u32 %v8357_v54, 16  ;;  %v4150_v48 = vrot.slane %v4148_v19, 1 }
 0x431   : > { %3887 = vrot.lane.b32.xlu1 %v8349_v41, %s6279_s10  ;;  %v4986_v13 = vrot.slane %v8349_v41, 1  ;;  %v4987_v63 = vrot.slane %v8351_v30, 1  ;;  %v3386_v23 = vshrl.u32 %v8349_v41, 16  ;;  %v8365_v55 = vpack.i.b16 %v8349_v41, %v8339_v51 }
 0x432   : > { %v3295_v25 = vpop.permute.xlu1 %3294  ;;  %v3348_v10 = vld [vmem:[#allocation2 + $0x38] sm:$0xff]  ;;  %v3349_v39 = vld [vmem:[#allocation2 + $0x40] sm:$0x3]  ;;  %v4153_v60 = vshll.u32 %v8349_v41, 16 }
 0x433   : > { %3334 = vst.msk [vmem:[#allocation2 + $0x69] sm:$0xff] %vm3324_vm3, %v3295_v25  ;;  %v8368_v38 = vpack.c.bf16 %v3348_v10, %v3347_v22  ;;  %v8370_v33 = vpack.c.bf16 %v3349_v39, %v3349_v39  ;;  %v8373_v8 = vsel %vm4982_vm4, %v4986_v13, %v4987_v63  ;;  %v8385_v34 = vpack.i.b16 %v3386_v23, %v3385_v43  ;;  %v3359_v25 = vld [vmem:[#allocation2 + $0x90] sm:$0xff] }
 0x434   : > { %v8378_v32 = vpack.i.b16 %v8373_v8, %v8357_v54  ;;  %v5012_v59 = vshrl.u32 %v8373_v8, 16  ;;  %v4158_v13 = vshll.u32 %v8351_v30, 16 }
 0x435   : > { %3889 = vrot.lane.b32.xlu0 %v8368_v38, %s6279_s10  ;;  %v4989_v42 = vrot.slane %v8368_v38, 1  ;;  %v4990_v56 = vrot.slane %v8370_v33, 1  ;;  %v3393_v5 = vshrl.u32 %v8368_v38, 16  ;;  %v4163_v40 = vshll.u32 %v8368_v38, 16 }
 0x436   : > { %v3299_v14 = vpop.permute.xlu1 %3298  ;;  %v3351_v4 = vld [vmem:[#allocation2 + $0x50] sm:$0xff]  ;;  %v8391_v24 = vpack.i.b16 %v5012_v59, %v5011_v61  ;;  %v3352_v46 = vld [vmem:[#allocation2 + $0x58] sm:$0x3]  ;;  %v4168_v28 = vshll.u32 %v8370_v33, 16  ;;  %v4146_v33 = vor.u32 %v4145_v52, %v3385_v43 }
 0x437   : > { %3336 = vst.msk [vmem:[#allocation2 + $0x81] sm:$0xff] %vm3324_vm3, %v3299_v14  ;;  %v8394_v58 = vpack.c.bf16 %v3351_v4, %v3350_v1  ;;  %v8396_v29 = vpack.c.bf16 %v3352_v46, %v3352_v46  ;;  %v8401_v50 = vsel %vm4982_vm4, %v4989_v42, %v4990_v56  ;;  %v4165_v30 = vrot.slane %v4163_v40, 1 }
 0x438   : > { %v5019_v27 = vshrl.u32 %v8401_v50, 16  ;;  %v4155_v56 = vrot.slane %v4153_v60, 1 }
 0x439   : > { %3891 = vrot.lane.b32.xlu1 %v8394_v58, %s6279_s10  ;;  %v4992_v15 = vrot.slane %v8394_v58, 1  ;;  %v4993_v12 = vrot.slane %v8396_v29, 1  ;;  %v3394_v44 = vshrl.u32 %v8394_v58, 16  ;;  %v8409_v11 = vpack.i.b16 %v8394_v58, %v8368_v38 }
 0x43a   : > { %v3303_v47 = vpop.permute.xlu1 %3302  ;;  %v3354_v6 = vld [vmem:[#allocation2 + $0x68] sm:$0xff]  ;;  %v3355_v62 = vld [vmem:[#allocation2 + $0x70] sm:$0x3]  ;;  %v4166_v52 = vor.u32 %v4165_v30, %v3393_v5  ;;  %v4156_v60 = vor.u32 %v4155_v56, %v3386_v23 }
 0x43b   : > { %3338 = vst.msk [vmem:[#allocation2 + $0x99] sm:$0xff] %vm3324_vm3, %v3303_v47  ;;  %v8412_v49 = vpack.c.bf16 %v3354_v6, %v3353_v26  ;;  %v8414_v35 = vpack.c.bf16 %v3355_v62, %v3355_v62  ;;  %v8417_v37 = vsel %vm4982_vm4, %v4992_v15, %v4993_v12  ;;  %v8434_v2 = vpack.i.b16 %v3394_v44, %v3393_v5 }
 0x43c   : > { %v5020_v9 = vshrl.u32 %v8417_v37, 16  ;;  %v4170_v47 = vrot.slane %v4168_v28, 1  ;;  %v4160_v26 = vrot.slane %v4158_v13, 1 }
 0x43d   : > { %3893 = vrot.lane.b32.xlu0 %v8412_v49, %s6279_s10  ;;  %v4995_v17 = vrot.slane %v8412_v49, 1  ;;  %v4996_v20 = vrot.slane %v8414_v35, 1  ;;  %v4183_v57 = vshll.u32 %v8412_v49, 16  ;;  %v3401_v63 = vshrl.u32 %v8412_v49, 16 }
 0x43e   : > { %v3307_v36 = vpop.permute.xlu1 %3306  ;;  %v3357_v18 = vld [vmem:[#allocation2 + $0x80] sm:$0xff]  ;;  %v8428_v53 = vpack.i.b16 %v5020_v9, %v5019_v27  ;;  %v3358_v3 = vld [vmem:[#allocation2 + $0x88] sm:$0x3]  ;;  %v4188_v62 = vshll.u32 %v8414_v35, 16  ;;  %v4173_v27 = vshll.u32 %v8394_v58, 16  ;;  %v4178_v35 = vshll.u32 %v8396_v29, 16 }
 0x43f   : > { %3340 = vst.msk [vmem:[#allocation2 + $0xb1] sm:$0xff] %vm3324_vm3, %v3307_v36  ;;  %v8437_v31 = vpack.c.bf16 %v3357_v18, %v3356_v0  ;;  %v3376_v21 = vpack.c.bf16 %v3358_v3, %v3358_v3  ;;  %v8445_v22 = vsel %vm4982_vm4, %v4995_v17, %v4996_v20  ;;  %v4185_v14 = vrot.slane %v4183_v57, 1  ;;  %v3362_v9 = vld [vmem:[#allocation2 + $0xa8] sm:$0xff] }
 0x440   : > { %v5027_v12 = vshrl.u32 %v8445_v22, 16  ;;  %v4190_v13 = vrot.slane %v4188_v62, 1 }
 0x441   : > { %3895 = vrot.lane.b32.xlu1 %v8437_v31, %s6279_s10  ;;  %v4998_v10 = vrot.slane %v8437_v31, 1  ;;  %v4999_v39 = vrot.slane %v3376_v21, 1  ;;  %v3402_v61 = vshrl.u32 %v8437_v31, 16  ;;  %v4193_v36 = vshll.u32 %v8437_v31, 16 }
 0x442   : > { %v3360_v59 = vld [vmem:[#allocation2 + $0x98] sm:$0xff]  ;;  %v3361_v42 = vld [vmem:[#allocation2 + $0xa0] sm:$0x3]  ;;  %v4186_v3 = vor.u32 %v4185_v14, %v3401_v63  ;;  %v4198_v28 = vshll.u32 %v3376_v21, 16  ;;  %v8498_v21 = vsel %vm4141_vm5, %v4156_v60, %v4160_v26  ;;  %v3399_v26 = vpack.i.b16 %v8437_v31, %v8412_v49 }
 0x443   : > { %v8451_v1 = vpack.c.bf16 %v3360_v59, %v3359_v25  ;;  %v8453_v4 = vpack.c.bf16 %v3361_v42, %v3361_v42  ;;  %v8456_v46 = vsel %vm4982_vm4, %v4998_v10, %v4999_v39  ;;  %v8458_v15 = vpack.i.b16 %v3402_v61, %v3401_v63 }
 0x444   : > { %v5028_v16 = vshrl.u32 %v8456_v46, 16  ;;  %v4175_v63 = vrot.slane %v4173_v27, 1  ;;  %v8492_v25 = vsel %vm4141_vm5, %v4146_v33, %v4150_v48  ;;  %v8495_v10 = vsel %vm4141_vm5, %v4166_v52, %v4170_v47 }
 0x445   : > { %3897 = vrot.lane.b32.xlu0 %v8451_v1, %s6279_s10  ;;  %v5001_v43 = vrot.slane %v8451_v1, 1  ;;  %v5002_v6 = vrot.slane %v8453_v4, 1  ;;  %v4195_v39 = vrot.slane %v4193_v36, 1  ;;  %v8505_v42 = vsel %vm4141_vm5, %v4186_v3, %v4190_v13 }
 0x446   : > { %v3363_v19 = vld [vmem:[#allocation2 + $0xb0] sm:$0xff]  ;;  %v8468_v17 = vpack.i.b16 %v5028_v16, %v5027_v12  ;;  %v3364_v20 = vld [vmem:[#allocation2 + $0xb8] sm:$0x3]  ;;  %v4200_v56 = vrot.slane %v4198_v28, 1  ;;  %v4176_v12 = vor.u32 %v4175_v63, %v3394_v44  ;;  %v4180_v16 = vrot.slane %v4178_v35, 1 }
 0x447   : > { %v8473_v0 = vpack.c.bf16 %v3363_v19, %v3362_v9  ;;  %v8475_v18 = vpack.c.bf16 %v3364_v20, %v3364_v20  ;;  %v8479_v40 = vsel %vm4982_vm4, %v5001_v43, %v5002_v6  ;;  %v4196_v33 = vor.u32 %v4195_v39, %v3402_v61 }
 0x448   : > { %v5107_v57 = vcombine.low %v8391_v24, %v8468_v17  ;;  %v5108_v5 = vcombine.high %v8391_v24, %v8468_v17  ;;  %v4203_v47 = vshll.u32 %v8451_v1, 16  ;;  %v8521_v61 = vpack.i.b16 %v8456_v46, %v8445_v22 }
 0x449   : > { %3629 = vrot.lane.b32.xlu0 %v8339_v51, %s6280_s11  ;;  %3899 = vrot.lane.b32.xlu1 %v8473_v0, %s6279_s10  ;;  %v5004_v23 = vrot.slane %v8473_v0, 1  ;;  %v5005_v29 = vrot.slane %v8475_v18, 1  ;;  %v5035_v51 = vshrl.u32 %v8479_v40, 16  ;;  %v4213_v30 = vshll.u32 %v8473_v0, 16 }
 0x44a   : > { %v3410_v14 = vshrl.u32 %v8473_v0, 16  ;;  %v8527_v6 = vsel %vm4141_vm5, %v4196_v33, %v4200_v56  ;;  %v3407_v52 = vpack.i.b16 %v8473_v0, %v8451_v1  ;;  %v4205_v60 = vrot.slane %v4203_v47, 1 }
 0x44b   : > { %v8502_v59 = vsel %vm4982_vm4, %v5004_v23, %v5005_v29  ;;  %v8532_v44 = vpack.i.b16 %v8527_v6, %v8505_v42  ;;  %v4243_v62 = vshrl.u32 %v8527_v6, 16  ;;  %v4215_v27 = vrot.slane %v4213_v30, 1 }
 0x44c   : > { %v5036_v48 = vshrl.u32 %v8502_v59, 16  ;;  %v4208_v36 = vshll.u32 %v8453_v4, 16  ;;  %v4218_v35 = vshll.u32 %v8475_v18, 16  ;;  %v5017_v28 = vpack.i.b16 %v8417_v37, %v8401_v50 }
 0x44d   : > { %3633 = vrot.lane.b32.xlu0 %v8368_v38, %s6280_s11  ;;  %3631 = vrot.lane.b32.xlu1 %v8349_v41, %s6280_s11  ;;  %v3409_v38 = vshrl.u32 %v8451_v1, 16  ;;  %v4242_v41 = vshrl.u32 %v8505_v42, 16  ;;  %v3414_v23 = vcombine.high %v8365_v55, %v3399_v26  ;;  %v3430_v29 = vcombine.high %v8409_v11, %v3407_v52 }
 0x44e   : > { %v8523_v43 = vpack.i.b16 %v5036_v48, %v5035_v51  ;;  %v5033_v4 = vpack.i.b16 %v8502_v59, %v8479_v40  ;;  %v8560_v13 = vsel %vm4141_vm5, %v4176_v12, %v4180_v16  ;;  %v4216_v18 = vor.u32 %v4215_v27, %v3410_v14 }
 0x44f   : > { %v3411_v20 = vpack.i.b16 %v3410_v14, %v3409_v38  ;;  %v8546_v3 = vpack.i.b16 %v4243_v62, %v4242_v41  ;;  %v5040_v63 = vcombine.high %v8378_v32, %v8521_v61  ;;  %v8565_v39 = vrot.slane %v3414_v23, %v10330_v45 }
 0x450   : > { %v5123_v9 = vcombine.low %v8428_v53, %v8523_v43  ;;  %v5124_v19 = vcombine.high %v8428_v53, %v8523_v43  ;;  %v8568_v51 = vrot.slane %v3430_v29, %v10330_v45  ;;  %v4206_v48 = vor.u32 %v4205_v60, %v3409_v38 }
 0x451   : > { %3637 = vrot.lane.b32.xlu0 %v8412_v49, %s6280_s11  ;;  %3635 = vrot.lane.b32.xlu1 %v8394_v58, %s6280_s11  ;;  %v3482_v49 = vcombine.high %v8385_v34, %v8458_v15  ;;  %v5039_v58 = vcombine.low %v8378_v32, %v8521_v61  ;;  %v3498_v30 = vcombine.high %v8434_v2, %v3411_v20  ;;  %v4210_v33 = vrot.slane %v4208_v36, 1 }
 0x452   : > { %v4220_v56 = vrot.slane %v4218_v35, 1  ;;  %v3462_v32 = vcombine.high %v8565_v39, %v8568_v51  ;;  %v3413_v16 = vcombine.low %v8365_v55, %v3399_v26  ;;  %v3429_v47 = vcombine.low %v8409_v11, %v3407_v52 }
 0x453   : > { %v8576_v14 = vrot.slane %v3482_v49, %v10330_v45  ;;  %v8581_v12 = vrot.slane %v3498_v30, %v10330_v45  ;;  %v3481_v38 = vcombine.low %v8385_v34, %v8458_v15  ;;  %v5055_v41 = vcombine.low %v5017_v28, %v5033_v4 }
 0x454   : > { %v8586_v61 = vsel %vm4141_vm5, %v4216_v18, %v4220_v56  ;;  %v8595_v27 = vrot.slane %v3413_v16, %v10330_v45  ;;  %v8598_v55 = vrot.slane %v3429_v47, %v10330_v45  ;;  %v4227_v11 = vshrl.u32 %v8498_v21, 16 }
 0x455   : > { %3641 = vrot.lane.b32.xlu0 %v8451_v1, %s6280_s11  ;;  %3639 = vrot.lane.b32.xlu1 %v8437_v31, %s6280_s11  ;;  %v5056_v1 = vcombine.high %v5017_v28, %v5033_v4  ;;  %v3461_v31 = vcombine.low %v8565_v39, %v8568_v51  ;;  %v3529_v62 = vcombine.low %v8576_v14, %v8581_v12  ;;  %v4235_v34 = vshrl.u32 %v8560_v13, 16 }
 0x456   : > { %v8607_v15 = vsel %vm4141_vm5, %v4206_v48, %v4210_v33  ;;  %v3497_v26 = vcombine.low %v8434_v2, %v3411_v20  ;;  %v4251_v52 = vshrl.u32 %v8586_v61, 16  ;;  %v3446_v60 = vcombine.high %v8595_v27, %v8598_v55 }
 0x457   : > { %v8614_v36 = vrot.slane %v3481_v38, %v10330_v45  ;;  %v8622_v28 = vrot.slane %v5040_v63, %v10330_v45  ;;  %v8625_v23 = vrot.slane %v5056_v1, %v10330_v45  ;;  %v3530_v2 = vcombine.high %v8576_v14, %v8581_v12 }
 0x458   : > { %v8619_v35 = vrot.slane %v3497_v26, %v10330_v45  ;;  %v4226_v20 = vshrl.u32 %v8492_v25, 16  ;;  %v4234_v29 = vshrl.u32 %v8495_v10, 16  ;;  %v8632_v49 = vrot.slane %v5039_v58, %v10330_v45 }
 0x459   : > { %5503 = vrot.lane.b32.xlu0 %v8357_v54, %s6279_s10  ;;  %3643 = vrot.lane.b32.xlu1 %v8473_v0, %s6280_s11  ;;  %v3445_v0 = vcombine.low %v8595_v27, %v8598_v55  ;;  %v8635_v4 = vrot.slane %v5055_v41, %v10330_v45  ;;  %v4250_v18 = vshrl.u32 %v8607_v15, 16  ;;  %v5088_v58 = vcombine.high %v8622_v28, %v8625_v23 }
 0x45a   : > { %v3513_v63 = vcombine.low %v8614_v36, %v8619_v35  ;;  %v3514_v30 = vcombine.high %v8614_v36, %v8619_v35  ;;  %v4224_v48 = vpack.i.b16 %v8498_v21, %v8492_v25  ;;  %v4248_v33 = vpack.i.b16 %v8586_v61, %v8607_v15 }
 0x45b   : > { %v5072_v56 = vcombine.high %v8632_v49, %v8635_v4  ;;  %v4228_v16 = vpack.i.b16 %v4227_v11, %v4226_v20  ;;  %v4232_v47 = vpack.i.b16 %v8560_v13, %v8495_v10  ;;  %v4236_v1 = vpack.i.b16 %v4235_v34, %v4234_v29 }
 0x45c   : > { %v4252_v38 = vpack.i.b16 %v4251_v52, %v4250_v18  ;;  %v8660_v41 = vrot.slane %v5108_v5, %v10330_v45  ;;  %v8666_v26 = vrot.slane %v5124_v19, %v10330_v45  ;;  %v8672_v11 = vrot.slane %v5107_v57, %v10330_v45 }
 0x45d   : > { %5507 = vrot.lane.b32.xlu0 %v8401_v50, %s6279_s10  ;;  %5505 = vrot.lane.b32.xlu1 %v8373_v8, %s6279_s10  ;;  %v8678_v34 = vrot.slane %v5123_v9, %v10330_v45  ;;  %v4254_v5 = vcombine.low %v4224_v48, %v8532_v44  ;;  %v5087_v19 = vcombine.low %v8622_v28, %v8625_v23 }
 0x45e   : > { %v4270_v17 = vcombine.low %v4232_v47, %v4248_v33  ;;  %v5155_v53 = vcombine.low %v8660_v41, %v8666_v26  ;;  %v4255_v9 = vcombine.high %v4224_v48, %v8532_v44  ;;  %v4322_v52 = vcombine.low %v4228_v16, %v8546_v3 }
 0x45f   : > { %v4338_v20 = vcombine.low %v4236_v1, %v4252_v38  ;;  %v4323_v18 = vcombine.high %v4228_v16, %v8546_v3  ;;  %v4271_v24 = vcombine.high %v4232_v47, %v4248_v33  ;;  %v4339_v57 = vcombine.high %v4236_v1, %v4252_v38 }
 0x460   : > { %v8705_v43 = vrot.slane %v4254_v5, %v10330_v45  ;;  %v8708_v44 = vrot.slane %v4270_v17, %v10330_v45  ;;  %v8711_v48 = vrot.slane %v4322_v52, %v10330_v45  ;;  %v8717_v3 = vrot.slane %v4255_v9, %v10330_v45 }
 0x461   : > { %5511 = vrot.lane.b32.xlu0 %v8445_v22, %s6279_s10  ;;  %5509 = vrot.lane.b32.xlu1 %v8417_v37, %s6279_s10  ;;  %v8714_v29 = vrot.slane %v4338_v20, %v10330_v45  ;;  %v8722_v16 = vrot.slane %v4271_v24, %v10330_v45  ;;  %v8727_v1 = vrot.slane %v4323_v18, %v10330_v45 }
 0x462   : > { %v4287_v33 = vcombine.high %v8705_v43, %v8708_v44  ;;  %v4286_v47 = vcombine.low %v8705_v43, %v8708_v44  ;;  %v8736_v5 = vrot.slane %v4339_v57, %v10330_v45  ;;  %v5086_v39 = vrot.slane %v5072_v56, %v10331_v7 }
 0x463   : > { %v4354_v38 = vcombine.low %v8711_v48, %v8714_v29  ;;  %v4355_v24 = vcombine.high %v8711_v48, %v8714_v29  ;;  %v4303_v17 = vcombine.high %v8717_v3, %v8722_v16  ;;  %v4302_v9 = vcombine.low %v8717_v3, %v8722_v16 }
 0x464   : > { %v4371_v52 = vcombine.high %v8727_v1, %v8736_v5  ;;  %v10340_v55 = vcombine.low %v8672_v11, %v8678_v34  ;;  %v10341_v36 = vcombine.low %v8632_v49, %v8635_v4  ;;  %v10343_v23 = vcombine.high %v8672_v11, %v8678_v34 }
 0x465   : > { %5515 = vrot.lane.b32.xlu0 %v8479_v40, %s6279_s10  ;;  %5513 = vrot.lane.b32.xlu1 %v8456_v46, %s6279_s10  ;;  %v8983_v43 = vrot.slane %v4302_v9, %v10331_v7 }
 0x469   : > { %5247 = vrot.lane.b32.xlu0 %v8357_v54, %s6280_s11  ;;  %5517 = vrot.lane.b32.xlu1 %v8502_v59, %s6279_s10  ;;  %v4370_v54 = vcombine.low %v8727_v1, %v8736_v5 }
 0x46d   : > { %5251 = vrot.lane.b32.xlu0 %v8401_v50, %s6280_s11  ;;  %5249 = vrot.lane.b32.xlu1 %v8373_v8, %s6280_s11  ;;  %v8796_v8 = vrot.slane %v3462_v32, %v10331_v7  ;;  %v3537_v50 = vrot.slane %v3529_v62, %v10331_v7 }
 0x46f   : > { %10332 = vst [vmem:[#allocation47_spill] sm:$0xff] %v8796_v8 }
 0x471   : > { %5255 = vrot.lane.b32.xlu0 %v8445_v22, %s6280_s11  ;;  %5253 = vrot.lane.b32.xlu1 %v8417_v37, %s6280_s11  ;;  %v8810_v37 = vrot.slane %v3446_v60, %v10331_v7  ;;  %v8816_v22 = vrot.slane %v3461_v31, %v10331_v7  ;;  %v8881_v31 = vrot.slane %v5087_v19, %v10331_v7 }
 0x473   : > { %10333 = vst [vmem:[#allocation26_spill] sm:$0xff] %v8810_v37  ;;  %10334 = vst [vmem:[#allocation49_spill] sm:$0xff] %v8816_v22 }
 0x474   : > { %10339 = vst [vmem:[#allocation31_spill] sm:$0xff] %v8881_v31 }
 0x475   : > { %5259 = vrot.lane.b32.xlu0 %v8479_v40, %s6280_s11  ;;  %5257 = vrot.lane.b32.xlu1 %v8456_v46, %s6280_s11  ;;  %v10335_v46 = vmov 0  }
 0x476   : > { %v3479_v40 = vcombine.high %v8816_v22, %v10335_v46  ;;  %v3547_v12 = vcombine.high %v3537_v50, %v10335_v46  ;;  %v5105_v60 = vcombine.high %v8881_v31, %v10335_v46  ;;  %v4320_v16 = vcombine.high %v8983_v43, %v10335_v46 }
 0x479   : > { %4718 = vrot.lane.b32.xlu0 %v8492_v25, %s6279_s10  ;;  %5261 = vrot.lane.b32.xlu1 %v8502_v59, %s6280_s11 }
 0x47d   : > { %4722 = vrot.lane.b32.xlu0 %v8495_v10, %s6279_s10  ;;  %4720 = vrot.lane.b32.xlu1 %v8498_v21, %s6279_s10 }
 0x481   : > { %4726 = vrot.lane.b32.xlu0 %v8505_v42, %s6279_s10  ;;  %4724 = vrot.lane.b32.xlu1 %v8560_v13, %s6279_s10 }
 0x485   : > { %4730 = vrot.lane.b32.xlu0 %v8607_v15, %s6279_s10  ;;  %4728 = vrot.lane.b32.xlu1 %v8527_v6, %s6279_s10 }
 0x489   : > { %4462 = vrot.lane.b32.xlu0 %v8492_v25, %s6280_s11  ;;  %4732 = vrot.lane.b32.xlu1 %v8586_v61, %s6279_s10  ;;  %v3521_v25 = vrot.slane %v3513_v63, %v10331_v7 }
 0x48b   : > { %v3545_v51 = vcombine.high %v3521_v25, %v10335_v46 }
 0x48d   : > { %4466 = vrot.lane.b32.xlu0 %v8495_v10, %s6280_s11  ;;  %4464 = vrot.lane.b32.xlu1 %v8498_v21, %s6280_s11  ;;  %v8831_v10 = vrot.slane %v3445_v0, %v10331_v7  ;;  %v8839_v21 = vrot.slane %v3514_v30, %v10331_v7  ;;  %v8899_v0 = vrot.slane %v10341_v36, %v10331_v7 }
 0x48e   : > { %v5104_v30 = vcombine.high %v5086_v39, %v10335_v46 }
 0x48f   : > { %10336 = vst [vmem:[#allocation36_spill] sm:$0xff] %v8831_v10  ;;  %10337 = vst [vmem:[#allocation22_spill] sm:$0xff] %v8839_v21  ;;  %v3477_v59 = vcombine.high %v8831_v10, %v10335_v46  ;;  %v5103_v63 = vcombine.high %v8899_v0, %v10335_v46 }
 0x490   : > { %10342 = vst [vmem:[#allocation9_spill] sm:$0xff] %v8899_v0 }
 0x491   : > { %4470 = vrot.lane.b32.xlu0 %v8505_v42, %s6280_s11  ;;  %4468 = vrot.lane.b32.xlu1 %v8560_v13, %s6280_s11  ;;  %v5102_v42 = vrot.slane %v5088_v58, %v10331_v7  ;;  %v10344_v58 = vcombine.high %v8660_v41, %v8666_v26 }
 0x493   : > { %v5170_v56 = vrot.slane %v10344_v58, %v10331_v7 }
 0x495   : > { %4474 = vrot.lane.b32.xlu0 %v8607_v15, %s6280_s11  ;;  %4472 = vrot.lane.b32.xlu1 %v8527_v6, %s6280_s11  ;;  %v8854_v6 = vrot.slane %v3530_v2, %v10331_v7  ;;  %v5147_v15 = vrot.slane %v10340_v55, %v10331_v7  ;;  %v5154_v2 = vrot.slane %v10343_v23, %v10331_v7 }
 0x497   : > { %10338 = vst [vmem:[#allocation6_spill] sm:$0xff] %v8854_v6  ;;  %v5172_v26 = vcombine.high %v5154_v2, %v10335_v46  ;;  %v5171_v20 = vcombine.high %v5147_v15, %v10335_v46 }
 0x499   : > { %4476 = vrot.lane.b32.xlu1 %v8586_v61, %s6280_s11  ;;  %3580 = vrot.lane.b32.xlu0 %v8796_v8, %s6286_s15  ;;  %v5163_v61 = vrot.slane %v5155_v53, %v10331_v7  ;;  %v5106_v53 = vcombine.high %v5102_v42, %v10335_v46 }
 0x49b   : > { %v5173_v19 = vcombine.high %v5163_v61, %v10335_v46 }
 0x49d   : > { %3571 = vrot.lane.b32.xlu1 %v3537_v50, %s6283_s12  ;;  %3559 = vrot.lane.b32.xlu0 %v8810_v37, %s6286_s15 }
 0x49f   : > { %v8859_v13 = vpop.permute.xlu0 %3885 }
 0x4a0   : > { %v3905_v58 = vshrl.u32 %v8859_v13, 16 }
 0x4a1   : > { %3574 = vrot.lane.b32.xlu1 %v3479_v40, %s6284_s13  ;;  %3550 = vrot.lane.b32.xlu0 %v3521_v25, %s6283_s12  ;;  %v4301_v40 = vrot.slane %v4287_v33, %v10331_v7  ;;  %v5174_v25 = vcombine.high %v5170_v56, %v10335_v46  ;;  %v4317_v33 = vrot.slane %v4303_v17, %v10331_v7 }
 0x4a2   : > { %v4378_v17 = vrot.slane %v4370_v54, %v10331_v7  ;;  %v4369_v54 = vrot.slane %v4355_v24, %v10331_v7 }
 0x4a3   : > { %v8868_v14 = vpop.permute.xlu1 %3887  ;;  %v4319_v24 = vcombine.high %v4301_v40, %v10335_v46 }
 0x4a4   : > { %v3903_v29 = vpack.i.b16 %v8868_v14, %v8859_v13  ;;  %v3906_v48 = vshrl.u32 %v8868_v14, 16  ;;  %v4385_v14 = vrot.slane %v4371_v52, %v10331_v7 }
 0x4a5   : > { %3562 = vrot.lane.b32.xlu0 %v8839_v21, %s6288_s17  ;;  %3553 = vrot.lane.b32.xlu1 %v3477_v59, %s6284_s13 }
 0x4a6   : > { %v9035_v1 = vpack.i.b16 %v3906_v48, %v3905_v58 }
 0x4a7   : > { %v8870_v32 = vpop.permute.xlu0 %3889 }
 0x4a9   : > { %5206 = vrot.lane.b32.xlu0 %v5102_v42, %s6286_s15  ;;  %3583 = vrot.lane.b32.xlu1 %v8854_v6, %s6288_s17 }
 0x4ab   : > { %v8885_v62 = vpop.permute.xlu1 %3891 }
 0x4ac   : > { %v3911_v9 = vpack.i.b16 %v8885_v62, %v8870_v32 }
 0x4ad   : > { %5185 = vrot.lane.b32.xlu0 %v5086_v39, %s6286_s15  ;;  %3556 = vrot.lane.b32.xlu1 %v3545_v51, %s6285_s14  ;;  %v4362_v39 = vrot.slane %v4354_v38, %v10331_v7  ;;  %v8965_v51 = vrot.slane %v4286_v47, %v10331_v7 }
 0x4af   : > { %v8887_v27 = vpop.permute.xlu0 %3893  ;;  %v4318_v38 = vcombine.high %v8965_v51, %v10335_v46 }
 0x4b1   : > { %3577 = vrot.lane.b32.xlu0 %v3547_v12, %s6285_s14  ;;  %5197 = vrot.lane.b32.xlu1 %v5163_v61, %s6283_s12 }
 0x4b3   : > { %v8903_v35 = vpop.permute.xlu1 %3895 }
 0x4b4   : > { %v8997_v3 = vpack.i.b16 %v8903_v35, %v8887_v27  ;;  %v3922_v36 = vshrl.u32 %v8903_v35, 16 }
 0x4b5   : > { %5176 = vrot.lane.b32.xlu0 %v5147_v15, %s6283_s12  ;;  %5200 = vrot.lane.b32.xlu1 %v5105_v60, %s6284_s13  ;;  %v3914_v60 = vshrl.u32 %v8885_v62, 16 }
 0x4b7   : > { %v3898_v28 = vpop.permute.xlu0 %3897 }
 0x4b8   : > { %v3929_v23 = vshrl.u32 %v3898_v28, 16 }
 0x4b9   : > { %5188 = vrot.lane.b32.xlu0 %v5154_v2, %s6288_s17  ;;  %5179 = vrot.lane.b32.xlu1 %v5103_v63, %s6284_s13  ;;  %v3913_v2 = vshrl.u32 %v8870_v32, 16  ;;  %v3921_v63 = vshrl.u32 %v8887_v27, 16  ;;  %v4386_v27 = vcombine.high %v4362_v39, %v10335_v46 }
 0x4bb   : > { %v8913_v49 = vpop.permute.xlu0 %3629  ;;  %v3900_v4 = vpop.permute.xlu1 %3899  ;;  %v9027_v32 = vpack.i.b16 %v3922_v36, %v3921_v63 }
 0x4bc   : > { %v3927_v44 = vpack.i.b16 %v3900_v4, %v3898_v28  ;;  %v3930_v47 = vshrl.u32 %v3900_v4, 16 }
 0x4bd   : > { %5191 = vrot.lane.b32.xlu0 %v5104_v30, %s6287_s16  ;;  %5209 = vrot.lane.b32.xlu1 %v5170_v56, %s6288_s17  ;;  %v3933_v30 = vcombine.low %v3903_v29, %v8997_v3  ;;  %v9025_v56 = vpack.i.b16 %v3914_v60, %v3913_v2 }
 0x4be   : > { %v9013_v4 = vpack.i.b16 %v3930_v47, %v3929_v23  ;;  %v3949_v62 = vcombine.low %v3911_v9, %v3927_v44 }
 0x4bf   : > { %v8922_v11 = vpop.permute.xlu0 %3633  ;;  %v8924_v34 = vpop.permute.xlu1 %3631 }
 0x4c0   : > { %v3957_v5 = vrot.slane %v3949_v62, %v10330_v45  ;;  %v4017_v52 = vcombine.low %v9025_v56, %v9013_v4  ;;  %v3657_v60 = vshrl.u32 %v8922_v11, 16 }
 0x4c1   : > { %5203 = vrot.lane.b32.xlu0 %v5173_v19, %s6285_s14  ;;  %5212 = vrot.lane.b32.xlu1 %v5106_v53, %s6287_s16  ;;  %v4321_v19 = vcombine.high %v4317_v33, %v10335_v46  ;;  %v4387_v53 = vcombine.high %v4369_v54, %v10335_v46 }
 0x4c3   : > { %v8930_v57 = vpop.permute.xlu0 %3637  ;;  %v8932_v41 = vpop.permute.xlu1 %3635 }
 0x4c4   : > { %v3658_v47 = vshrl.u32 %v8932_v41, 16 }
 0x4c5   : > { %5194 = vrot.lane.b32.xlu0 %v5172_v26, %s6289_s23  ;;  %5182 = vrot.lane.b32.xlu1 %v5171_v20, %s6285_s14  ;;  %v4388_v26 = vcombine.high %v4378_v17, %v10335_v46 }
 0x4c7   : > { %v8938_v18 = vpop.permute.xlu0 %3641  ;;  %v8940_v50 = vpop.permute.xlu1 %3639 }
 0x4c9   : > { %4400 = vrot.lane.b32.xlu0 %v4301_v40, %s6286_s15  ;;  %5215 = vrot.lane.b32.xlu1 %v5174_v25, %s6289_s23  ;;  %v3934_v25 = vcombine.high %v3903_v29, %v8997_v3  ;;  %v3650_v3 = vshrl.u32 %v8924_v34, 16 }
 0x4cb   : > { %v8949_v59 = vpop.permute.xlu0 %5503  ;;  %v8951_v42 = vpop.permute.xlu1 %3643  ;;  %v3948_v62 = vrot.slane %v3934_v25, %v10330_v45 }
 0x4cc   : > { %v3674_v13 = vshrl.u32 %v8951_v42, 16 }
 0x4cd   : > { %4391 = vrot.lane.b32.xlu0 %v4362_v39, %s6283_s12  ;;  %4421 = vrot.lane.b32.xlu1 %v4317_v33, %s6286_s15  ;;  %v3941_v39 = vrot.slane %v3933_v30, %v10330_v45  ;;  %v3950_v33 = vcombine.high %v3911_v9, %v3927_v44  ;;  %v3655_v44 = vpack.i.b16 %v8932_v41, %v8922_v11 }
 0x4ce   : > { %v9063_v9 = vrot.slane %v4017_v52, %v10330_v45  ;;  %v3647_v41 = vpack.i.b16 %v8924_v34, %v8913_v49 }
 0x4cf   : > { %v8969_v12 = vpop.permute.xlu0 %5507  ;;  %v8971_v61 = vpop.permute.xlu1 %5505  ;;  %v3966_v48 = vcombine.high %v3941_v39, %v3957_v5  ;;  %v9074_v11 = vrot.slane %v3950_v33, %v10330_v45  ;;  %v3965_v30 = vcombine.low %v3941_v39, %v3957_v5  ;;  %v4389_v5 = vcombine.high %v4385_v14, %v10335_v46 }
 0x4d1   : > { %4394 = vrot.lane.b32.xlu0 %v4318_v38, %s6284_s13  ;;  %4412 = vrot.lane.b32.xlu1 %v4378_v17, %s6283_s12  ;;  %v3671_v38 = vpack.i.b16 %v8951_v42, %v8938_v18  ;;  %v4001_v17 = vcombine.low %v9035_v1, %v9027_v32  ;;  %v3663_v42 = vpack.i.b16 %v8940_v50, %v8930_v57 }
 0x4d3   : > { %v8987_v55 = vpop.permute.xlu0 %5511  ;;  %v8989_v15 = vpop.permute.xlu1 %5509  ;;  %v9079_v2 = vrot.slane %v4001_v17, %v10330_v45  ;;  %v3677_v39 = vcombine.low %v3647_v41, %v3663_v42 }
 0x4d5   : > { %4403 = vrot.lane.b32.xlu0 %v4369_v54, %s6288_s17  ;;  %4415 = vrot.lane.b32.xlu1 %v4320_v16, %s6284_s13  ;;  %v3673_v54 = vshrl.u32 %v8938_v18, 16  ;;  %v3666_v16 = vshrl.u32 %v8940_v50, 16  ;;  %v3665_v18 = vshrl.u32 %v8930_v57, 16  ;;  %v3694_v50 = vcombine.high %v3655_v44, %v3671_v38 }
 0x4d6   : > { %v3659_v57 = vpack.i.b16 %v3658_v47, %v3657_v60  ;;  %v9120_v60 = vrot.slane %v3965_v30, %v10331_v7 }
 0x4d7   : > { %v9015_v35 = vpop.permute.xlu0 %5515  ;;  %v9017_v28 = vpop.permute.xlu1 %5513  ;;  %v9066_v36 = vpack.i.b16 %v3674_v13, %v3673_v54  ;;  %v9081_v63 = vpack.i.b16 %v3666_v16, %v3665_v18  ;;  %v9092_v13 = vrot.slane %v3966_v48, %v10331_v7  ;;  %v9097_v25 = vrot.slane %v3694_v50, %v10330_v45 }
 0x4d8   : > { %v3685_v18 = vrot.slane %v3677_v39, %v10330_v45  ;;  %v3997_v50 = vcombine.high %v9120_v60, %v10335_v46 }
 0x4d9   : > { %4406 = vrot.lane.b32.xlu0 %v4319_v24, %s6287_s16  ;;  %4424 = vrot.lane.b32.xlu1 %v4385_v14, %s6288_s17  ;;  %v3649_v24 = vshrl.u32 %v8913_v49, 16  ;;  %v3761_v52 = vcombine.low %v3659_v57, %v9066_v36 }
 0x4db   : > { %v9041_v20 = vpop.permute.xlu0 %5247  ;;  %v9043_v40 = vpop.permute.xlu1 %5517  ;;  %v3651_v58 = vpack.i.b16 %v3650_v3, %v3649_v24  ;;  %v9110_v47 = vrot.slane %v3761_v52, %v10330_v45  ;;  %v4018_v3 = vcombine.high %v9025_v56, %v9013_v4  ;;  %v4002_v24 = vcombine.high %v9035_v1, %v9027_v32 }
 0x4dc   : > { %v3762_v52 = vcombine.high %v3659_v57, %v9066_v36 }
 0x4dd   : > { %4397 = vrot.lane.b32.xlu0 %v4386_v27, %s6285_s14  ;;  %4427 = vrot.lane.b32.xlu1 %v4321_v19, %s6287_s16  ;;  %v3678_v27 = vcombine.high %v3647_v41, %v3663_v42  ;;  %v3693_v19 = vcombine.low %v3655_v44, %v3671_v38  ;;  %v3745_v33 = vcombine.low %v3651_v58, %v9081_v63 }
 0x4de   : > { %v4016_v1 = vrot.slane %v4002_v24, %v10330_v45  ;;  %v3776_v36 = vrot.slane %v3762_v52, %v10330_v45 }
 0x4df   : > { %v9068_v23 = vpop.permute.xlu0 %5251  ;;  %v9070_v29 = vpop.permute.xlu1 %5249  ;;  %v9105_v38 = vrot.slane %v3678_v27, %v10330_v45  ;;  %v3701_v17 = vrot.slane %v3693_v19, %v10330_v45  ;;  %v9131_v48 = vrot.slane %v3745_v33, %v10330_v45  ;;  %v9148_v27 = vrot.slane %v4018_v3, %v10330_v45 }
 0x4e0   : > { %v3981_v33 = vcombine.low %v3948_v62, %v9074_v11 }
 0x4e1   : > { %4409 = vrot.lane.b32.xlu0 %v4387_v53, %s6289_s23  ;;  %4418 = vrot.lane.b32.xlu1 %v4388_v26, %s6285_s14  ;;  %v4033_v53 = vcombine.low %v9079_v2, %v9063_v9  ;;  %v3982_v26 = vcombine.high %v3948_v62, %v9074_v11  ;;  %v3726_v42 = vcombine.high %v9105_v38, %v9097_v25 }
 0x4e2   : > { %v3709_v4 = vcombine.low %v3685_v18, %v3701_v17  ;;  %v3777_v30 = vcombine.low %v9131_v48, %v9110_v47  ;;  %v3710_v32 = vcombine.high %v3685_v18, %v3701_v17  ;;  %v4049_v3 = vcombine.low %v4016_v1, %v9148_v27 }
 0x4e3   : > { %v9087_v49 = vpop.permute.xlu0 %5255  ;;  %v9089_v34 = vpop.permute.xlu1 %5253  ;;  %v9117_v16 = vrot.slane %v4033_v53, %v10331_v7  ;;  %v9125_v44 = vrot.slane %v3982_v26, %v10331_v7  ;;  %v3740_v19 = vrot.slane %v3726_v42, %v10331_v7  ;;  %v3746_v42 = vcombine.high %v3651_v58, %v9081_v63 }
 0x4e4   : > { %v9160_v26 = vrot.slane %v3777_v30, %v10331_v7  ;;  %v9163_v39 = vrot.slane %v3709_v4, %v10331_v7  ;;  %v3724_v17 = vrot.slane %v3710_v32, %v10331_v7  ;;  %v4034_v62 = vcombine.high %v9079_v2, %v9063_v9 }
 0x4e5   : > { %4079 = vrot.lane.b32.xlu0 %v9092_v13, %s6286_s15  ;;  %4430 = vrot.lane.b32.xlu1 %v4389_v5, %s6289_s23  ;;  %v9182_v24 = vrot.slane %v4049_v3, %v10331_v7  ;;  %v9185_v63 = vrot.slane %v3981_v33, %v10331_v7  ;;  %v3760_v58 = vrot.slane %v3746_v42, %v10330_v45 }
 0x4e6   : > { %10345 = vst [vmem:[#allocation25_spill] sm:$0xff] %v9163_v39  ;;  %v3741_v11 = vcombine.high %v9163_v39, %v10335_v46  ;;  %v9193_v4 = vpack.i.b16 %v9043_v40, %v9015_v35  ;;  %v9200_v2 = vrot.slane %v4034_v62, %v10331_v7  ;;  %v3725_v32 = vcombine.low %v9105_v38, %v9097_v25 }
 0x4e7   : > { %v9112_v54 = vpop.permute.xlu0 %5259  ;;  %v9114_v14 = vpop.permute.xlu1 %5257  ;;  %10346 = vst [vmem:[#allocation42_spill] sm:$0xff] %v9185_v63  ;;  %v3794_v30 = vcombine.high %v3760_v58, %v3776_v36  ;;  %v3999_v52 = vcombine.high %v9185_v63, %v10335_v46  ;;  %v3793_v33 = vcombine.low %v3760_v58, %v3776_v36  ;;  %v9208_v3 = vpack.i.b16 %v8989_v15, %v8969_v12 }
 0x4e8   : > { %v9212_v42 = vpack.i.b16 %v9017_v28, %v8987_v55  ;;  %v9219_v25 = vpack.i.b16 %v8971_v61, %v8949_v59  ;;  %v9234_v10 = vrot.slane %v3725_v32, %v10331_v7  ;;  %v4050_v0 = vcombine.high %v4016_v1, %v9148_v27 }
 0x4e9   : > { %4070 = vrot.lane.b32.xlu0 %v9117_v16, %s6283_s12  ;;  %4100 = vrot.lane.b32.xlu1 %v9125_v44, %s6286_s15  ;;  %v5567_v38 = vcombine.low %v9208_v3, %v9193_v4  ;;  %v9228_v62 = vrot.slane %v3794_v30, %v10331_v7  ;;  %v9231_v58 = vrot.slane %v3793_v33, %v10331_v7  ;;  %v5524_v27 = vshrl.u32 %v8971_v61, 16 }
 0x4ea   : > { %10347 = vst [vmem:[#allocation34_spill] sm:$0xff] %v9234_v10  ;;  %v3744_v33 = vcombine.high %v3740_v19, %v10335_v46  ;;  %v3743_v32 = vcombine.high %v9234_v10, %v10335_v46  ;;  %v5532_v1 = vshrl.u32 %v8989_v15, 16  ;;  %v5531_v10 = vshrl.u32 %v8969_v12, 16 }
 0x4eb   : > { %v9139_v56 = vpop.permute.xlu0 %4718  ;;  %v9141_v41 = vpop.permute.xlu1 %5261  ;;  %v9243_v22 = vrot.slane %v5567_v38, %v10330_v45  ;;  %v5548_v38 = vshrl.u32 %v9043_v40, 16  ;;  %v5540_v40 = vshrl.u32 %v9017_v28, 16  ;;  %v4065_v61 = vcombine.high %v9117_v16, %v10335_v46 }
 0x4ec   : > { %v5539_v15 = vshrl.u32 %v8987_v55, 16  ;;  %v5292_v28 = vshrl.u32 %v9141_v41, 16  ;;  %v9297_v63 = vpack.i.b16 %v5532_v1, %v5531_v10  ;;  %v5289_v55 = vpack.i.b16 %v9141_v41, %v9112_v54 }
 0x4ed   : > { %4073 = vrot.lane.b32.xlu0 %v3997_v50, %s6284_s13  ;;  %3844 = vrot.lane.b32.xlu1 %v3740_v19, %s6286_s15  ;;  %v3742_v19 = vcombine.high %v3724_v17, %v10335_v46  ;;  %v5284_v39 = vshrl.u32 %v9114_v14, 16  ;;  %v5275_v10 = vshrl.u32 %v9068_v23, 16  ;;  %v5281_v41 = vpack.i.b16 %v9114_v14, %v9087_v49 }
 0x4ee   : > { %v9303_v16 = vpack.i.b16 %v5540_v40, %v5539_v15  ;;  %v3778_v40 = vcombine.high %v9131_v48, %v9110_v47 }
 0x4ef   : > { %v9155_v53 = vpop.permute.xlu0 %4722  ;;  %v9157_v5 = vpop.permute.xlu1 %4720 }
 0x4f1   : > { %3814 = vrot.lane.b32.xlu0 %v9160_v26, %s6283_s12  ;;  %3823 = vrot.lane.b32.xlu1 %v3724_v17, %s6286_s15  ;;  %v5523_v17 = vshrl.u32 %v8949_v59, 16 }
 0x4f3   : > { %v9173_v57 = vpop.permute.xlu0 %4726  ;;  %v9175_v18 = vpop.permute.xlu1 %4724 }
 0x4f5   : > { %3817 = vrot.lane.b32.xlu0 %v3741_v11, %s6284_s13  ;;  %4091 = vrot.lane.b32.xlu1 %v9182_v24, %s6283_s12 }
 0x4f7   : > { %v9195_v50 = vpop.permute.xlu0 %4730  ;;  %v9197_v9 = vpop.permute.xlu1 %4728 }
 0x4f9   : > { %4082 = vrot.lane.b32.xlu0 %v9200_v2, %s6288_s17  ;;  %4094 = vrot.lane.b32.xlu1 %v3999_v52, %s6284_s13  ;;  %v5551_v52 = vcombine.low %v9219_v25, %v9212_v42 }
 0x4fb   : > { %v9223_v36 = vpop.permute.xlu0 %4462  ;;  %v9225_v11 = vpop.permute.xlu1 %4732  ;;  %v9254_v21 = vrot.slane %v5551_v52, %v10330_v45  ;;  %v9269_v52 = vrot.slane %v4050_v0, %v10331_v7  ;;  %v3998_v0 = vcombine.high %v9092_v13, %v10335_v46  ;;  %v5568_v13 = vcombine.high %v9208_v3, %v9193_v4 }
 0x4fc   : > { %v5273_v4 = vpack.i.b16 %v9089_v34, %v9068_v23  ;;  %v5268_v3 = vshrl.u32 %v9070_v29, 16 }
 0x4fd   : > { %3847 = vrot.lane.b32.xlu0 %v9228_v62, %s6288_s17  ;;  %3835 = vrot.lane.b32.xlu1 %v9231_v58, %s6283_s12  ;;  %v5584_v8 = vcombine.high %v9254_v21, %v9243_v22  ;;  %v5582_v23 = vrot.slane %v5568_v13, %v10330_v45 }
 0x4fe   : > { %v5312_v14 = vcombine.high %v5273_v4, %v5289_v55 }
 0x4ff   : > { %v9245_v30 = vpop.permute.xlu0 %4466  ;;  %v9247_v31 = vpop.permute.xlu1 %4464  ;;  %v9293_v12 = vrot.slane %v5584_v8, %v10331_v7  ;;  %v5552_v8 = vcombine.high %v9219_v25, %v9212_v42 }
 0x501   : > { %3850 = vrot.lane.b32.xlu0 %v3744_v33, %s6287_s16  ;;  %3838 = vrot.lane.b32.xlu1 %v3743_v32, %s6284_s13  ;;  %v5547_v33 = vshrl.u32 %v9015_v35, 16  ;;  %v4000_v32 = vcombine.high %v9125_v44, %v10335_v46 }
 0x503   : > { %v9259_v37 = vpop.permute.xlu0 %4470  ;;  %v9261_v6 = vpop.permute.xlu1 %4468  ;;  %v9285_v35 = vpack.i.b16 %v5548_v38, %v5547_v33  ;;  %v5276_v38 = vshrl.u32 %v9089_v34, 16  ;;  %v5291_v33 = vshrl.u32 %v9112_v54, 16  ;;  %v5265_v34 = vpack.i.b16 %v9070_v29, %v9041_v20 }
 0x505   : > { %3829 = vrot.lane.b32.xlu0 %v3742_v19, %s6287_s16  ;;  %4103 = vrot.lane.b32.xlu1 %v9269_v52, %s6288_s17  ;;  %v9295_v19 = vpack.i.b16 %v5524_v27, %v5523_v17  ;;  %v5635_v54 = vcombine.low %v9297_v63, %v9285_v35  ;;  %v5283_v27 = vshrl.u32 %v9087_v49, 16  ;;  %v9322_v1 = vpack.i.b16 %v5292_v28, %v5291_v33 }
 0x506   : > { %v5267_v49 = vshrl.u32 %v9041_v20, 16  ;;  %v9336_v17 = vpack.i.b16 %v5276_v38, %v5275_v10  ;;  %v5566_v28 = vrot.slane %v5552_v8, %v10330_v45  ;;  %v5296_v13 = vcombine.high %v5265_v34, %v5281_v41 }
 0x507   : > { %v9288_v44 = vpop.permute.xlu0 %4474  ;;  %v9290_v59 = vpop.permute.xlu1 %4472  ;;  %v9338_v15 = vpack.i.b16 %v5284_v39, %v5283_v27  ;;  %v9344_v29 = vrot.slane %v5635_v54, %v10330_v45  ;;  %v3809_v39 = vcombine.high %v9160_v26, %v10335_v46  ;;  %v5326_v33 = vrot.slane %v5312_v14, %v10330_v45 }
 0x508   : > { %v9346_v47 = vpack.i.b16 %v5268_v3, %v5267_v49  ;;  %v5380_v48 = vcombine.high %v9336_v17, %v9322_v1  ;;  %v5600_v8 = vcombine.high %v5566_v28, %v5582_v23  ;;  %v5295_v3 = vcombine.low %v5265_v34, %v5281_v41 }
 0x509   : > { %5697 = vrot.lane.b32.xlu0 %v9293_v12, %s6286_s15  ;;  %4106 = vrot.lane.b32.xlu1 %v4000_v32, %s6287_s16  ;;  %v5619_v32 = vcombine.low %v9295_v19, %v9303_v16  ;;  %v5310_v27 = vrot.slane %v5296_v13, %v10330_v45  ;;  %v4068_v14 = vcombine.high %v9269_v52, %v10335_v46 }
 0x50a   : > { %v5364_v54 = vcombine.high %v9346_v47, %v9338_v15  ;;  %v9370_v26 = vrot.slane %v5380_v48, %v10330_v45  ;;  %v9382_v34 = vrot.slane %v5600_v8, %v10331_v7  ;;  %v5303_v13 = vrot.slane %v5295_v3, %v10330_v45 }
 0x50b   : > { %v9324_v42 = vpop.permute.xlu0 %3580  ;;  %v9326_v25 = vpop.permute.xlu1 %4476  ;;  %v9361_v10 = vrot.slane %v5619_v32, %v10330_v45  ;;  %v5344_v32 = vcombine.high %v5310_v27, %v5326_v33  ;;  %v5599_v48 = vcombine.low %v5566_v28, %v5582_v23  ;;  %v5343_v23 = vcombine.low %v5310_v27, %v5326_v33 }
 0x50c   : > { %10348 = vst [vmem:[#allocation8_spill] sm:$0xff] %v9324_v42  ;;  %v5378_v49 = vrot.slane %v5364_v54, %v10330_v45 }
 0x50d   : > { %4076 = vrot.lane.b32.xlu0 %v4065_v61, %s6285_s14  ;;  %4085 = vrot.lane.b32.xlu1 %v3998_v0, %s6287_s16  ;;  %v5311_v61 = vcombine.low %v5273_v4, %v5289_v55  ;;  %v9358_v0 = vrot.slane %v3778_v40, %v10331_v7  ;;  %v5651_v40 = vcombine.low %v9361_v10, %v9344_v29 }
 0x50e   : > { %v5411_v8 = vcombine.low %v5378_v49, %v9370_v26 }
 0x50f   : > { %v9350_v20 = vpop.permute.xlu0 %3559  ;;  %v9352_v38 = vpop.permute.xlu1 %3571  ;;  %v5319_v41 = vrot.slane %v5311_v61, %v10330_v45  ;;  %v9394_v61 = vrot.slane %v5651_v40, %v10331_v7  ;;  %v9412_v40 = vrot.slane %v5599_v48, %v10331_v7  ;;  %v9428_v48 = vrot.slane %v5343_v23, %v10331_v7 }
 0x510   : > { %10349 = vst [vmem:[#allocation38_spill] sm:$0xff] %v9350_v20  ;;  %10350 = vst [vmem:[#allocation35_spill] sm:$0xff] %v9352_v38  ;;  %v9398_v20 = vrot.slane %v5344_v32, %v10331_v7  ;;  %v5636_v23 = vcombine.high %v9297_v63, %v9285_v35  ;;  %v5652_v63 = vcombine.high %v9361_v10, %v9344_v29 }
 0x511   : > { %3820 = vrot.lane.b32.xlu0 %v3809_v39, %s6285_s14  ;;  %3826 = vrot.lane.b32.xlu1 %v9358_v0, %s6288_s17  ;;  %v5328_v54 = vcombine.high %v5303_v13, %v5319_v41  ;;  %v5327_v33 = vcombine.low %v5303_v13, %v5319_v41  ;;  %v5361_v13 = vcombine.high %v9428_v48, %v10335_v46 }
 0x512   : > { %v5650_v35 = vrot.slane %v5636_v23, %v10330_v45  ;;  %v5412_v29 = vcombine.high %v5378_v49, %v9370_v26  ;;  %v5583_v10 = vcombine.low %v9254_v21, %v9243_v22  ;;  %v3812_v23 = vcombine.high %v9228_v62, %v10335_v46 }
 0x513   : > { %v9372_v55 = vpop.permute.xlu0 %3550  ;;  %v9374_v4 = vpop.permute.xlu1 %3574  ;;  %v9415_v32 = vrot.slane %v5328_v54, %v10331_v7  ;;  %v4067_v54 = vcombine.high %v9182_v24, %v10335_v46  ;;  %v3811_v24 = vcombine.high %v9231_v58, %v10335_v46  ;;  %v4066_v58 = vcombine.high %v9200_v2, %v10335_v46 }
 0x514   : > { %10351 = vst [vmem:[#allocation23_spill] sm:$0xff] %v9372_v55  ;;  %10352 = vst [vmem:[#allocation48_spill] sm:$0xff] %v9374_v4  ;;  %v5379_v2 = vcombine.low %v9336_v17, %v9322_v1  ;;  %v9489_v22 = vrot.slane %v5412_v29, %v10331_v7  ;;  %v9494_v1 = vrot.slane %v5583_v10, %v10331_v7  ;;  %v4739_v4 = vshrl.u32 %v9157_v5, 16 }
 0x515   : > { %4109 = vrot.lane.b32.xlu0 %v4068_v14, %s6289_s23  ;;  %5718 = vrot.lane.b32.xlu1 %v9382_v34, %s6286_s15  ;;  %v9409_v14 = vrot.slane %v5411_v8, %v10331_v7  ;;  %v5617_v8 = vcombine.high %v9412_v40, %v10335_v46  ;;  %v5618_v49 = vcombine.high %v9382_v34, %v10335_v46 }
 0x516   : > { %v5387_v21 = vrot.slane %v5379_v2, %v10330_v45 }
 0x517   : > { %v9389_v52 = vpop.permute.xlu0 %3562  ;;  %v9391_v39 = vpop.permute.xlu1 %3553 }
 0x518   : > { %10353 = vst [vmem:[#allocation7_spill] sm:$0xff] %v9389_v52  ;;  %10354 = vst [vmem:[#allocation29_spill] sm:$0xff] %v9391_v39 }
 0x519   : > { %5688 = vrot.lane.b32.xlu0 %v9394_v61, %s6283_s12  ;;  %5462 = vrot.lane.b32.xlu1 %v9398_v20, %s6286_s15 }
 0x51b   : > { %v9404_v28 = vpop.permute.xlu0 %5206  ;;  %v9406_v3 = vpop.permute.xlu1 %3583 }
 0x51c   : > { %10355 = vst [vmem:[#allocation45_spill] sm:$0xff] %v9406_v3 }
 0x51d   : > { %5453 = vrot.lane.b32.xlu0 %v9409_v14, %s6283_s12  ;;  %5441 = vrot.lane.b32.xlu1 %v9415_v32, %s6286_s15 }
 0x51f   : > { %v9421_v27 = vpop.permute.xlu0 %5185  ;;  %v9423_v52 = vpop.permute.xlu1 %3556 }
 0x520   : > { %10356 = vst [vmem:[#allocation27_spill] sm:$0xff] %v9423_v52  ;;  %v9441_v52 = vrot.slane %v5327_v33, %v10331_v7 }
 0x521   : > { %5712 = vrot.lane.b32.xlu0 %v5617_v8, %s6284_s13  ;;  %4097 = vrot.lane.b32.xlu1 %v4067_v54, %s6285_s14  ;;  %v5620_v8 = vcombine.high %v9295_v19, %v9303_v16 }
 0x522   : > { %v5359_v33 = vcombine.high %v9441_v52, %v10335_v46 }
 0x523   : > { %v9434_v3 = vpop.permute.xlu0 %3577  ;;  %v9436_v41 = vpop.permute.xlu1 %5197  ;;  %v5634_v19 = vrot.slane %v5620_v8, %v10330_v45 }
 0x524   : > { %10357 = vst [vmem:[#allocation33_spill] sm:$0xff] %v9434_v3  ;;  %v4736_v3 = vpack.i.b16 %v9157_v5, %v9139_v56  ;;  %v4762_v5 = vshrl.u32 %v9195_v50, 16 }
 0x525   : > { %5456 = vrot.lane.b32.xlu0 %v5361_v13, %s6284_s13  ;;  %3841 = vrot.lane.b32.xlu1 %v3811_v24, %s6285_s14  ;;  %v9470_v24 = vrot.slane %v5652_v63, %v10331_v7  ;;  %v5667_v8 = vcombine.low %v5634_v19, %v5650_v35 }
 0x527   : > { %v9451_v54 = vpop.permute.xlu0 %5176  ;;  %v9453_v39 = vpop.permute.xlu1 %5200  ;;  %v5675_v62 = vrot.slane %v5667_v8, %v10331_v7 }
 0x529   : > { %5435 = vrot.lane.b32.xlu0 %v5359_v33, %s6284_s13  ;;  %4088 = vrot.lane.b32.xlu1 %v4066_v58, %s6289_s23  ;;  %v5363_v33 = vcombine.low %v9346_v47, %v9338_v15  ;;  %v5615_v58 = vcombine.high %v9494_v1, %v10335_v46 }
 0x52b   : > { %v9465_v16 = vpop.permute.xlu0 %5188  ;;  %v9467_v13 = vpop.permute.xlu1 %5179  ;;  %v5371_v17 = vrot.slane %v5363_v33, %v10330_v45  ;;  %v5668_v33 = vcombine.high %v5634_v19, %v5650_v35 }
 0x52c   : > { %10358 = vst [vmem:[#allocation28_spill] sm:$0xff] %v9465_v16 }
 0x52d   : > { %5700 = vrot.lane.b32.xlu0 %v9470_v24, %s6288_s17  ;;  %3853 = vrot.lane.b32.xlu1 %v3812_v23, %s6289_s23  ;;  %v5395_v29 = vcombine.low %v5371_v17, %v5387_v21  ;;  %v5362_v23 = vcombine.high %v9398_v20, %v10335_v46  ;;  %v4760_v20 = vpack.i.b16 %v9225_v11, %v9195_v50 }
 0x52e   : > { %v5396_v55 = vcombine.high %v5371_v17, %v5387_v21  ;;  %v9551_v17 = vpack.i.b16 %v9326_v25, %v9288_v44 }
 0x52f   : > { %v9484_v63 = vpop.permute.xlu0 %5191  ;;  %v9486_v26 = vpop.permute.xlu1 %5209  ;;  %v5403_v8 = vrot.slane %v5395_v29, %v10331_v7  ;;  %v5685_v29 = vcombine.high %v5675_v62, %v10335_v46 }
 0x530   : > { %10359 = vst [vmem:[#allocation37_spill] sm:$0xff] %v9484_v63  ;;  %10360 = vst [vmem:[#allocation17_spill] sm:$0xff] %v9486_v26 }
 0x531   : > { %5465 = vrot.lane.b32.xlu0 %v9489_v22, %s6288_s17  ;;  %5709 = vrot.lane.b32.xlu1 %v5675_v62, %s6283_s12  ;;  %v4763_v62 = vshrl.u32 %v9225_v11, 16  ;;  %v5410_v11 = vrot.slane %v5396_v55, %v10331_v7 }
 0x533   : > { %v9500_v15 = vpop.permute.xlu0 %5203  ;;  %v9502_v47 = vpop.permute.xlu1 %5212 }
 0x534   : > { %10361 = vst [vmem:[#allocation21_spill] sm:$0xff] %v9502_v47  ;;  %v9564_v47 = vpack.i.b16 %v9261_v6, %v9245_v30 }
 0x535   : > { %5724 = vrot.lane.b32.xlu0 %v5618_v49, %s6287_s16  ;;  %5691 = vrot.lane.b32.xlu1 %v5615_v58, %s6284_s13  ;;  %v5360_v49 = vcombine.high %v9415_v32, %v10335_v46  ;;  %v5682_v58 = vrot.slane %v5668_v33, %v10331_v7  ;;  %v4744_v32 = vpack.i.b16 %v9175_v18, %v9155_v53 }
 0x536   : > { %v4752_v33 = vpack.i.b16 %v9197_v9, %v9173_v57 }
 0x537   : > { %v9510_v10 = vpop.permute.xlu0 %5194  ;;  %v9512_v2 = vpop.permute.xlu1 %5182  ;;  %v4782_v21 = vcombine.low %v4744_v32, %v4760_v20  ;;  %v5686_v50 = vcombine.high %v5682_v58, %v10335_v46 }
 0x538   : > { %10362 = vst [vmem:[#allocation20_spill] sm:$0xff] %v9510_v10  ;;  %v4747_v10 = vshrl.u32 %v9175_v18, 16  ;;  %v9572_v18 = vpack.i.b16 %v4763_v62, %v4762_v5  ;;  %v4767_v62 = vcombine.high %v4736_v3, %v4752_v33  ;;  %v4783_v5 = vcombine.high %v4744_v32, %v4760_v20 }
 0x539   : > { %5468 = vrot.lane.b32.xlu0 %v5362_v23, %s6287_s16  ;;  %5432 = vrot.lane.b32.xlu1 %v5403_v8, %s6283_s12  ;;  %v5616_v23 = vcombine.high %v9293_v12, %v10335_v46  ;;  %v4754_v12 = vshrl.u32 %v9173_v57, 16  ;;  %v4766_v57 = vcombine.low %v4736_v3, %v4752_v33  ;;  %v5428_v20 = vcombine.high %v5410_v11, %v10335_v46 }
 0x53a   : > { %v5684_v33 = vcombine.high %v9470_v24, %v10335_v46  ;;  %v4482_v24 = vshrl.u32 %v9223_v36, 16 }
 0x53b   : > { %v9519_v34 = vpop.permute.xlu0 %4400  ;;  %v9521_v42 = vpop.permute.xlu1 %5215 }
 0x53c   : > { %10363 = vst [vmem:[#allocation11_spill] sm:$0xff] %v9521_v42 }
 0x53d   : > { %5447 = vrot.lane.b32.xlu0 %v5360_v49, %s6287_s16  ;;  %5721 = vrot.lane.b32.xlu1 %v5682_v58, %s6288_s17  ;;  %v4755_v49 = vshrl.u32 %v9197_v9, 16  ;;  %v5427_v9 = vcombine.high %v5403_v8, %v10335_v46  ;;  %v9568_v8 = vpack.i.b16 %v9290_v59, %v9259_v37  ;;  %v9592_v58 = vrot.slane %v4766_v57, %v10330_v45 }
 0x53e   : > { %v9611_v57 = vrot.slane %v4767_v62, %v10330_v45 }
 0x53f   : > { %v9530_v35 = vpop.permute.xlu0 %4391  ;;  %v9532_v19 = vpop.permute.xlu1 %4421 }
 0x541   : > { %5715 = vrot.lane.b32.xlu0 %v5685_v29, %s6285_s14  ;;  %5703 = vrot.lane.b32.xlu1 %v5616_v23, %s6287_s16  ;;  %v4738_v29 = vshrl.u32 %v9139_v56, 16  ;;  %v9560_v23 = vpack.i.b16 %v4755_v49, %v4754_v12  ;;  %v4746_v56 = vshrl.u32 %v9155_v53, 16  ;;  %v9579_v49 = vrot.slane %v4782_v21, %v10330_v45 }
 0x542   : > { %v9583_v12 = vpack.i.b16 %v9247_v31, %v9223_v36  ;;  %v4507_v36 = vshrl.u32 %v9326_v25, 16 }
 0x543   : > { %v4395_v38 = vpop.permute.xlu0 %4394  ;;  %v9557_v42 = vpop.permute.xlu1 %4412  ;;  %v9576_v55 = vpack.i.b16 %v4739_v4, %v4738_v29  ;;  %v9587_v53 = vpack.i.b16 %v4747_v10, %v4746_v56  ;;  %v5683_v4 = vcombine.high %v9394_v61, %v10335_v46  ;;  %v4799_v32 = vcombine.high %v9592_v58, %v9579_v49 }
 0x544   : > { %v4510_v29 = vcombine.low %v9583_v12, %v9568_v8  ;;  %v9614_v56 = vrot.slane %v4783_v5, %v10330_v45 }
 0x545   : > { %5438 = vrot.lane.b32.xlu0 %v5427_v9, %s6285_s14  ;;  %5444 = vrot.lane.b32.xlu1 %v5410_v11, %s6288_s17  ;;  %v4526_v9 = vcombine.low %v9564_v47, %v9551_v17  ;;  %v4835_v21 = vcombine.high %v9576_v55, %v9560_v23  ;;  %v4851_v10 = vcombine.high %v9587_v53, %v9572_v18 }
 0x546   : > { %v9627_v62 = vrot.slane %v4510_v29, %v10330_v45  ;;  %v4434_v11 = vsel %vm466_vm6, %v8965_v51, %v9530_v35  ;;  %v4527_v51 = vcombine.high %v9564_v47, %v9551_v17  ;;  %v4511_v47 = vcombine.high %v9583_v12, %v9568_v8 }
 0x547   : > { %v4404_v63 = vpop.permute.xlu0 %4403  ;;  %v4416_v26 = vpop.permute.xlu1 %4415  ;;  %v9603_v3 = vrot.slane %v4526_v9, %v10330_v45  ;;  %v5429_v9 = vcombine.high %v9409_v14, %v10335_v46  ;;  %v9623_v16 = vrot.slane %v4835_v21, %v10330_v45  ;;  %v9631_v5 = vrot.slane %v4851_v10, %v10330_v45 }
 0x548   : > { %v4490_v14 = vshrl.u32 %v9245_v30, 16  ;;  %v4436_v21 = vsel %vm470_vm7, %v4434_v11, %v4395_v38  ;;  %v4850_v30 = vcombine.low %v9587_v53, %v9572_v18  ;;  %v4491_v38 = vshrl.u32 %v9261_v6, 16 }
 0x549   : > { %5727 = vrot.lane.b32.xlu0 %v5686_v50, %s6289_s23  ;;  %5694 = vrot.lane.b32.xlu1 %v5683_v4, %s6285_s14  ;;  %v5430_v4 = vcombine.high %v9489_v22, %v10335_v46  ;;  %v4483_v22 = vshrl.u32 %v9247_v31, 16  ;;  %v4543_v10 = vcombine.high %v9627_v62, %v9603_v3  ;;  %v4814_v31 = vcombine.low %v9611_v57, %v9614_v56 }
 0x54a   : > { %v4498_v18 = vshrl.u32 %v9259_v37, 16  ;;  %v4882_v6 = vcombine.low %v9623_v16, %v9631_v5  ;;  %v4541_v8 = vrot.slane %v4527_v51, %v10330_v45 }
 0x54b   : > { %v4407_v61 = vpop.permute.xlu0 %4406  ;;  %v4425_v50 = vpop.permute.xlu1 %4424  ;;  %v9672_v37 = vrot.slane %v4543_v10, %v10331_v7  ;;  %v4525_v10 = vrot.slane %v4511_v47, %v10330_v45 }
 0x54d   : > { %5450 = vrot.lane.b32.xlu0 %v5428_v20, %s6289_s23  ;;  %5459 = vrot.lane.b32.xlu1 %v5429_v9, %s6285_s14  ;;  %v9642_v20 = vrot.slane %v4799_v32, %v10331_v7  ;;  %v4506_v32 = vshrl.u32 %v9288_v44, 16  ;;  %v4499_v9 = vshrl.u32 %v9290_v59, 16  ;;  %v4449_v59 = vsel %vm466_vm6, %v8983_v43, %v9557_v42 }
 0x54e   : > { %v4451_v12 = vsel %vm470_vm7, %v4449_v59, %v4416_v26  ;;  %v9687_v26 = vrot.slane %v4850_v30, %v10330_v45  ;;  %v4542_v59 = vcombine.low %v9627_v62, %v9603_v3 }
 0x54f   : > { %v4398_v29 = vpop.permute.xlu0 %4397  ;;  %v4428_v35 = vpop.permute.xlu1 %4427  ;;  %v4508_v44 = vpack.i.b16 %v4507_v36, %v4506_v32  ;;  %v4815_v36 = vcombine.high %v9611_v57, %v9614_v56  ;;  %v4500_v43 = vpack.i.b16 %v4499_v9, %v4498_v18 }
 0x550   : > { %v4438_v25 = vsel %vm473_vm9, %v4436_v21, %v4398_v29  ;;  %v4484_v21 = vpack.i.b16 %v4483_v22, %v4482_v24  ;;  %v4492_v29 = vpack.i.b16 %v4491_v38, %v4490_v14  ;;  %v9697_v14 = vrot.slane %v4882_v6, %v10331_v7 }
 0x551   : > { %v4440_v11 = vsel %vm476_vm8, %v4438_v25, %v9519_v34  ;;  %4912 = vrot.lane.b32.xlu0 %v9642_v20, %s6286_s15  ;;  %5706 = vrot.lane.b32.xlu1 %v5684_v33, %s6289_s23  ;;  %v4829_v25 = vrot.slane %v4815_v36, %v10331_v7  ;;  %v4558_v36 = vcombine.low %v4525_v10, %v4541_v8 }
 0x552   : > { %v4442_v17 = vsel %vm479_vm10, %v4440_v11, %v4404_v63  ;;  %v4594_v57 = vcombine.low %v4492_v29, %v4508_v44  ;;  %v4578_v38 = vcombine.low %v4484_v21, %v4500_v43  ;;  %v4579_v32 = vcombine.high %v4484_v21, %v4500_v43 }
 0x553   : > { %v4444_v34 = vsel %vm482_vm11, %v4442_v17, %v4407_v61  ;;  %v4410_v53 = vpop.permute.xlu0 %4409  ;;  %v4419_v33 = vpop.permute.xlu1 %4418  ;;  %v4798_v61 = vcombine.low %v9592_v58, %v9579_v49  ;;  %v9700_v49 = vrot.slane %v4814_v31, %v10331_v7  ;;  %v4595_v58 = vcombine.high %v4492_v29, %v4508_v44 }
 0x554   : > { %v9677_v63 = vsel %vm485_vm12, %v4444_v34, %v4410_v53  ;;  %v4453_v42 = vsel %vm473_vm9, %v4451_v12, %v4419_v33  ;;  %v4593_v44 = vrot.slane %v4579_v32, %v10330_v45  ;;  %v9748_v62 = vrot.slane %v4542_v59, %v10331_v7 }
 0x555   : > { %4656 = vrot.lane.b32.xlu0 %v9672_v37, %s6286_s15  ;;  %v4455_v51 = vsel %vm476_vm8, %v4453_v42, %v9532_v19  ;;  %5471 = vrot.lane.b32.xlu1 %v5430_v4, %s6289_s23  ;;  %v4559_v19 = vcombine.high %v4525_v10, %v4541_v8  ;;  %v4832_v11 = vcombine.high %v9700_v49, %v10335_v46  ;;  %v10365_v10 = vld [vmem:[#allocation25_spill] sm:$0xff] }
 0x556   : > { %v4457_v24 = vsel %vm479_vm10, %v4455_v51, %v4425_v50  ;;  %v10364_v50 = vcombine.low %v9576_v55, %v9560_v23  ;;  %v9718_v18 = vrot.slane %v4798_v61, %v10331_v7  ;;  %v4609_v47 = vrot.slane %v4595_v58, %v10330_v45 }
 0x557   : > { %v9693_v56 = vpop.permute.xlu0 %4079  ;;  %v4459_v22 = vsel %vm482_vm11, %v4457_v24, %v4428_v35  ;;  %v4431_v30 = vpop.permute.xlu1 %4430  ;;  %v4602_v35 = vrot.slane %v4594_v57, %v10330_v45  ;;  %v9724_v6 = vrot.slane %v4559_v19, %v10331_v7  ;;  %v4586_v55 = vrot.slane %v4578_v38, %v10330_v45 }
 0x558   : > { %v9705_v4 = vsel %vm485_vm12, %v4459_v22, %v4431_v30  ;;  %v4842_v31 = vrot.slane %v10364_v50, %v10330_v45  ;;  %v4830_v12 = vcombine.high %v9718_v18, %v10335_v46  ;;  %v4626_v43 = vcombine.low %v4593_v44, %v4609_v47 }
 0x559   : > { %4924 = vrot.lane.b32.xlu0 %v9697_v14, %s6283_s12  ;;  %4933 = vrot.lane.b32.xlu1 %v4829_v25, %s6286_s15  ;;  %v4610_v33 = vcombine.low %v4586_v55, %v4602_v35  ;;  %v9754_v61 = vrot.slane %v4558_v36, %v10331_v7  ;;  %v4574_v24 = vcombine.high %v9748_v62, %v10335_v46 }
 0x55a   : > { %v4866_v23 = vcombine.low %v4842_v31, %v9687_v26  ;;  %v4634_v8 = vrot.slane %v4626_v43, %v10331_v7  ;;  %v4867_v58 = vcombine.high %v4842_v31, %v9687_v26  ;;  %v4883_v38 = vcombine.high %v9623_v16, %v9631_v5  ;;  %v10367_v43 = vld [vmem:[#allocation34_spill] sm:$0xff] }
 0x55b   : > { %v4071_v9 = vpop.permute.xlu0 %4070  ;;  %v9721_v17 = vpop.permute.xlu1 %4100  ;;  %v4576_v19 = vcombine.high %v9754_v61, %v10335_v46  ;;  %v4831_v5 = vcombine.high %v9642_v20, %v10335_v46  ;;  %v4611_v59 = vcombine.high %v4586_v55, %v4602_v35  ;;  %v4575_v35 = vcombine.high %v9672_v37, %v10335_v46 }
 0x55c   : > { %v4113_v34 = vsel %vm466_vm6, %v9120_v60, %v4071_v9  ;;  %v4874_v45 = vrot.slane %v4866_v23, %v10331_v7  ;;  %v4618_v60 = vrot.slane %v4610_v33, %v10331_v7  ;;  %v4881_v32 = vrot.slane %v4867_v58, %v10331_v7  ;;  %v10366_v9 = vld [vmem:[#allocation42_spill] sm:$0xff] }
 0x55d   : > { %4927 = vrot.lane.b32.xlu0 %v4832_v11, %s6284_s13  ;;  %4677 = vrot.lane.b32.xlu1 %v9724_v6, %s6286_s15  ;;  %v4897_v31 = vrot.slane %v4883_v38, %v10331_v7  ;;  %v4625_v36 = vrot.slane %v4611_v59, %v10331_v7  ;;  %v4577_v55 = vcombine.high %v9724_v6, %v10335_v46 }
 0x55e   : > { %v4642_v58 = vcombine.high %v4618_v60, %v10335_v46 }
 0x55f   : > { %v4074_v53 = vpop.permute.xlu0 %4073  ;;  %v9741_v29 = vpop.permute.xlu1 %3844 }
 0x560   : > { %v9739_v21 = vsel %vm470_vm7, %v4113_v34, %v4074_v53  ;;  %v4833_v53 = vcombine.high %v4829_v25, %v10335_v46 }
 0x561   : > { %4906 = vrot.lane.b32.xlu0 %v4830_v12, %s6284_s13  ;;  %4903 = vrot.lane.b32.xlu1 %v4874_v45, %s6283_s12  ;;  %v4627_v12 = vcombine.high %v4593_v44, %v4609_v47  ;;  %v4898_v44 = vcombine.high %v4874_v45, %v10335_v46 }
 0x563   : > { %v3815_v3 = vpop.permute.xlu0 %3814  ;;  %v9750_v42 = vpop.permute.xlu1 %3823 }
 0x564   : > { %v3857_v51 = vsel %vm466_vm6, %v10365_v10, %v3815_v3 }
 0x565   : > { %4647 = vrot.lane.b32.xlu0 %v4618_v60, %s6283_s12  ;;  %4668 = vrot.lane.b32.xlu1 %v4634_v8, %s6283_s12  ;;  %v4899_v60 = vcombine.high %v4881_v32, %v10335_v46  ;;  %s215_s12 = sand.u32 1, %s6269_s19  }
 0x566   : > { %s5863_s26 = scalar_lea.sflag [#allocation4], %s215_s12 }
 0x567   : > { %v3818_v57 = vpop.permute.xlu0 %3817  ;;  %v4092_v30 = vpop.permute.xlu1 %4091 }
 0x568   : > { %v3859_v22 = vsel %vm470_vm7, %v3857_v51, %v3818_v57  ;;  %v4128_v11 = vsel %vm466_vm6, %v10366_v9, %v4092_v30  ;;  %v4641_v51 = vrot.slane %v4627_v12, %v10331_v7 }
 0x569   : > { %4650 = vrot.lane.b32.xlu0 %v4574_v24, %s6284_s13  ;;  %4671 = vrot.lane.b32.xlu1 %v4576_v19, %s6284_s13  ;;  %v4900_v24 = vcombine.high %v9697_v14, %v10335_v46  ;;  %v4644_v19 = vcombine.high %v4634_v8, %v10335_v46  ;;  %s5940_s13 = sshll.u32 %s215_s12, 3 }
 0x56a   : > { %s217_s15 = scalar_lea.vmem [#allocation3], %s5940_s13 }
 0x56b   : > { %v4083_v50 = vpop.permute.xlu0 %4082  ;;  %v4095_v26 = vpop.permute.xlu1 %4094 }
 0x56c   : > { %v9775_v23 = vsel %vm470_vm7, %v4128_v11, %v4095_v26  ;;  %v4901_v26 = vcombine.high %v4897_v31, %v10335_v46 }
 0x56d   : > { %4915 = vrot.lane.b32.xlu0 %v4881_v32, %s6288_s17  ;;  %4936 = vrot.lane.b32.xlu1 %v4897_v31, %s6288_s17  ;;  %v3810_v31 = vcombine.high %v9358_v0, %v10335_v46  ;;  %v5800_v0 = vld [vmem:[%s10064_s4] sm:$0xf] }
 0x56f   : > { %v9779_v16 = vpop.permute.xlu0 %3847  ;;  %v3836_v34 = vpop.permute.xlu1 %3835 }
 0x570   : > { %v3872_v3 = vsel %vm466_vm6, %v10367_v43, %v3836_v34  ;;  %v10369_v43 = vld [vmem:[#allocation6_spill] sm:$0xff] }
 0x571   : > { %4918 = vrot.lane.b32.xlu0 %v4831_v5, %s6287_s16  ;;  %4939 = vrot.lane.b32.xlu1 %v4833_v53, %s6287_s16  ;;  %v4643_v5 = vcombine.high %v4625_v36, %v10335_v46  ;;  %v10368_v53 = vld [vmem:[#allocation47_spill] sm:$0xff] }
 0x572   : > { %v3480_v12 = vcombine.high %v10368_v53, %v10335_v46 }
 0x573   : > { %v9786_v33 = vpop.permute.xlu0 %3850  ;;  %v3839_v10 = vpop.permute.xlu1 %3838 }
 0x574   : > { %v9793_v20 = vsel %vm470_vm7, %v3872_v3, %v3839_v10  ;;  %v3548_v3 = vcombine.high %v10369_v43, %v10335_v46 }
 0x575   : > { %4659 = vrot.lane.b32.xlu0 %v4625_v36, %s6288_s17  ;;  %4680 = vrot.lane.b32.xlu1 %v4641_v51, %s6288_s17 }
 0x577   : > { %v3830_v25 = vpop.permute.xlu0 %3829  ;;  %v4104_v47 = vpop.permute.xlu1 %4103 }
 0x579   : > { %4662 = vrot.lane.b32.xlu0 %v4575_v35, %s6287_s16  ;;  %4683 = vrot.lane.b32.xlu1 %v4577_v55, %s6287_s16 }
 0x57b   : > { %v9803_v7 = vpop.permute.xlu0 %5697  ;;  %v4107_v57 = vpop.permute.xlu1 %4106 }
 0x57d   : > { %4909 = vrot.lane.b32.xlu0 %v4898_v44, %s6285_s14  ;;  %4930 = vrot.lane.b32.xlu1 %v4900_v24, %s6285_s14  ;;  %v10371_v44 = vld [vmem:[#allocation22_spill] sm:$0xff] }
 0x57e   : > { %v3546_v24 = vcombine.high %v10371_v44, %v10335_v46 }
 0x57f   : > { %v4077_v37 = vpop.permute.xlu0 %4076  ;;  %v4086_v30 = vpop.permute.xlu1 %4085 }
 0x580   : > { %v4117_v6 = vsel %vm473_vm9, %v9739_v21, %v4077_v37 }
 0x581   : > { %v4119_v45 = vsel %vm476_vm8, %v4117_v6, %v9693_v56  ;;  %4653 = vrot.lane.b32.xlu0 %v4642_v58, %s6285_s14  ;;  %4674 = vrot.lane.b32.xlu1 %v4644_v19, %s6285_s14  ;;  %v5766_v19 = vrot.slane %v9705_v4, 4  ;;  %v5765_v4 = vrot.slane %v9677_v63, 4  ;;  %s6153_s14 = sshll.u32 %s6345_s22, 7  ;;  %s6221_s22 = sshll.u32 %s6293_s6, 4  ;;  %s6222_s22 = int_to_ptr.vmem [resolvable:$false] %s6221_s22 }
 0x582   : > { %v4121_v14 = vsel %vm479_vm10, %v4119_v45, %v4083_v50  ;;  %s5875_s25 = scalar_lea.hbm %s10065_s5, %s6153_s14  ;;  %s6223_s7 = scalar_lea.vmem %s6222_s22, 256 }
 0x583   : > { %v4123_v38 = vsel %vm482_vm11, %v4121_v14, %v4086_v30  ;;  %v3821_v9 = vpop.permute.xlu0 %3820  ;;  %v3827_v21 = vpop.permute.xlu1 %3826 }
 0x584   : > { %v3861_v11 = vsel %vm473_vm9, %v3859_v22, %v3821_v9  ;;  %v4645_v22 = vcombine.high %v4641_v51, %v10335_v46  ;;  %v10370_v51 = vld [vmem:[#allocation26_spill] sm:$0xff] }
 0x585   : > { %v3863_v8 = vsel %vm476_vm8, %v3861_v11, %v9750_v42  ;;  %4921 = vrot.lane.b32.xlu0 %v4899_v60, %s6289_s23  ;;  %4942 = vrot.lane.b32.xlu1 %v4901_v26, %s6289_s23 }
 0x586   : > { %v3865_v56 = vsel %vm479_vm10, %v3863_v8, %v3827_v21 }
 0x587   : > { %v4110_v50 = vpop.permute.xlu0 %4109  ;;  %v9830_v59 = vsel %vm482_vm11, %v3865_v56, %v3830_v25  ;;  %v5719_v32 = vpop.permute.xlu1 %5718  ;;  %v3478_v25 = vcombine.high %v10370_v51, %v10335_v46 }
 0x589   : > { %4665 = vrot.lane.b32.xlu0 %v4643_v5, %s6289_s23  ;;  %4686 = vrot.lane.b32.xlu1 %v4645_v22, %s6289_s23 }
 0x58b   : > { %v5689_v42 = vpop.permute.xlu0 %5688  ;;  %v9837_v34 = vpop.permute.xlu1 %5462 }
 0x58d   : > { %3832 = vrot.lane.b32.xlu0 %v3810_v31, %s6289_s23  ;;  %3586 = vrot.lane.b32.xlu1 %v3480_v12, %s6287_s16 }
 0x58f   : > { %v9843_v36 = vpop.permute.xlu0 %5453  ;;  %v9847_v10 = vpop.permute.xlu1 %5441 }
 0x591   : > { %3589 = vrot.lane.b32.xlu0 %v3548_v3, %s6289_s23  ;;  %3565 = vrot.lane.b32.xlu1 %v3478_v25, %s6287_s16  ;;  %s5877_s16 = sshll.u32 %s217_s15, 4  ;;  %s5878_s16 = int_to_ptr.vmem [resolvable:$true] %s5877_s16 }
 0x592   : > { %s6217_s30 = scalar_lea.vmem %s5878_s16, 128  ;;  %p6224_p0 = scmp.lt.s32.totalorder %s5878_s16, %s6222_s22 }
 0x593   : > { %v5713_v35 = vpop.permute.xlu0 %5712  ;;  %v4098_v55 = vpop.permute.xlu1 %4097  ;;  %p6218_p11 = scmp.ne.s32.totalorder %s5878_s16, %s6217_s30  ;;  %p6225_p1 = scmp.lt.s32.totalorder %s6223_s7, %s6217_s30 }
 0x594   : > { %v4132_v37 = vsel %vm473_vm9, %v9775_v23, %v4098_v55 }
 0x595   : > { %5803 = vperm.xlu0 %6208, %v5800_v0   ;;  %v4134_v58 = vsel %vm476_vm8, %v4132_v37, %v9721_v17  ;;  %3568 = vrot.lane.b32.xlu1 %v3546_v24, %s6289_s23  ;;  %v5731_v24 = vsel %vm466_vm6, %v9494_v1, %v5689_v42  ;;  %p6219_p12 = pnand %p6218_p11, %p6362_p5  ;;  %p6226_p2 = por %p6225_p1, %p6224_p0 }
 0x596   : > { %v4136_v6 = vsel %vm479_vm10, %v4134_v58, %v4104_v47 }
 0x597   : > { %v5457_v30 = vpop.permute.xlu0 %5456  ;;  %v3842_v45 = vpop.permute.xlu1 %3841  ;;  %v4138_v14 = vsel %vm482_vm11, %v4136_v6, %v4107_v57  ;;  %p6220_p13 = pneg %p6219_p12 }
 0x598   : > { %v3876_v46 = vsel %vm473_vm9, %v9793_v20, %v3842_v45  ;;  %v4140_v9 = vsel %vm485_vm12, %v4138_v14, %v4110_v50  ;;  %v10372_v45 = vld [vmem:[#allocation9_spill] sm:$0xff]  ;;  %v10373_v14 = vld [vmem:[#allocation31_spill] sm:$0xff] }
 0x599   : > { %v3878_v23 = vsel %vm476_vm8, %v3876_v46, %v9741_v29  ;;  %v9872_v17 = vsel %vm2834_vm14, %v4140_v9, %v5766_v19  ;;  %v5219_v1 = vsel %vm466_vm6, %v10372_v45, %v9451_v54  ;;  %v5234_v46 = vsel %vm466_vm6, %v10373_v14, %v9436_v41  ;;  %p6227_p3 = pnand %p6226_p2, %p6220_p13 }
 0x59a   : > { %v3880_v47 = vsel %vm479_vm10, %v3878_v23, %v9779_v16  ;;  %v5221_v9 = vsel %vm470_vm7, %v5219_v1, %v9467_v13  ;;  %v5490_v23 = vsel %vm466_vm6, %v9428_v48, %v9843_v36  ;;  %v5236_v54 = vsel %vm470_vm7, %v5234_v46, %v9453_v39 }
 0x59b   : > { %v5436_v60 = vpop.permute.xlu0 %5435  ;;  %v4089_v11 = vpop.permute.xlu1 %4088  ;;  %v3882_v57 = vsel %vm482_vm11, %v3880_v47, %v9786_v33  ;;  %v5238_v13 = vsel %vm473_vm9, %v5236_v54, %v9500_v15 }
 0x59c   : > { %v4125_v20 = vsel %vm485_vm12, %v4123_v38, %v4089_v11 }
 0x59d   : > { %v9881_v21 = vsel %vm2834_vm14, %v4125_v20, %v5765_v4  ;;  %v5492_v4 = vsel %vm470_vm7, %v5490_v23, %v5457_v30 }
 0x59f   : > { %v5701_v26 = vpop.permute.xlu0 %5700  ;;  %v3854_v29 = vpop.permute.xlu1 %3853 }
 0x5a0   : > { %v9884_v8 = vsel %vm485_vm12, %v3882_v57, %v3854_v29 }
 0x5a3   : > { %v5466_v56 = vpop.permute.xlu0 %5465  ;;  %v5710_v50 = vpop.permute.xlu1 %5709 }
 0x5a4   : > { %v5746_v33 = vsel %vm466_vm6, %v9412_v40, %v5710_v50  ;;  %v10374_v50 = vld [vmem:[#allocation28_spill] sm:$0xff] }
 0x5a5   : > { %v5748_v12 = vsel %vm470_vm7, %v5746_v33, %v5713_v35 }
 0x5a7   : > { %v5725_v5 = vpop.permute.xlu0 %5724  ;;  %v5692_v16 = vpop.permute.xlu1 %5691 }
 0x5a8   : > { %v5733_v58 = vsel %vm470_vm7, %v5731_v24, %v5692_v16  ;;  %v10375_v16 = vld [vmem:[#allocation17_spill] sm:$0xff] }
 0x5ab   : > { %v5469_v22 = vpop.permute.xlu0 %5468  ;;  %v5433_v63 = vpop.permute.xlu1 %5432 }
 0x5ac   : > { %v5475_v0 = vsel %vm466_vm6, %v9441_v52, %v5433_v63 }
 0x5ad   : > { %v5477_v40 = vsel %vm470_vm7, %v5475_v0, %v5436_v60 }
 0x5af   : > { %v5448_v31 = vpop.permute.xlu0 %5447  ;;  %v5722_v53 = vpop.permute.xlu1 %5721 }
 0x5b3   : > { %v5716_v38 = vpop.permute.xlu0 %5715  ;;  %v5704_v3 = vpop.permute.xlu1 %5703 }
 0x5b4   : > { %v5750_v43 = vsel %vm473_vm9, %v5748_v12, %v5716_v38  ;;  %v10376_v12 = vld [vmem:[#allocation37_spill] sm:$0xff] }
 0x5b5   : > { %v5752_v51 = vsel %vm476_vm8, %v5750_v43, %v5719_v32  ;;  %v10377_v43 = vld [vmem:[#allocation21_spill] sm:$0xff] }
 0x5b6   : > { %v5754_v44 = vsel %vm479_vm10, %v5752_v51, %v5722_v53 }
 0x5b7   : > { %v5439_v25 = vpop.permute.xlu0 %5438  ;;  %v5445_v55 = vpop.permute.xlu1 %5444  ;;  %v5756_v35 = vsel %vm482_vm11, %v5754_v44, %v5725_v5 }
 0x5b8   : > { %v5479_v6 = vsel %vm473_vm9, %v5477_v40, %v5439_v25  ;;  %v10378_v25 = vld [vmem:[#allocation11_spill] sm:$0xff]  ;;  %v10379_v40 = vld [vmem:[#allocation20_spill] sm:$0xff] }
 0x5b9   : > { %v5481_v60 = vsel %vm476_vm8, %v5479_v6, %v9847_v10 }
 0x5ba   : > { %v5483_v36 = vsel %vm479_vm10, %v5481_v60, %v5445_v55 }
 0x5bb   : > { %v5728_v37 = vpop.permute.xlu0 %5727  ;;  %v5695_v32 = vpop.permute.xlu1 %5694  ;;  %v5485_v15 = vsel %vm482_vm11, %v5483_v36, %v5448_v31 }
 0x5bc   : > { %v5758_v19 = vsel %vm485_vm12, %v5756_v35, %v5728_v37  ;;  %v5735_v52 = vsel %vm473_vm9, %v5733_v58, %v5695_v32 }
 0x5bd   : > { %6074 = vmatprep.subr.msk.bf16.mxu1 %vm2834_vm14, %v5758_v19  ;;  %v5737_v42 = vsel %vm476_vm8, %v5735_v52, %v9803_v7  ;;  %v5223_v7 = vsel %vm473_vm9, %v5221_v9, %v9512_v2  ;;  %v5240_v2 = vsel %vm476_vm8, %v5238_v13, %v9404_v28 }
 0x5be   : > { %v5739_v48 = vsel %vm479_vm10, %v5737_v42, %v5701_v26  ;;  %v5225_v39 = vsel %vm476_vm8, %v5223_v7, %v9421_v27  ;;  %v5242_v63 = vsel %vm479_vm10, %v5240_v2, %v10375_v16 }
 0x5bf   : > { %v5451_v47 = vpop.permute.xlu0 %5450  ;;  %v5460_v41 = vpop.permute.xlu1 %5459  ;;  %v5741_v20 = vsel %vm482_vm11, %v5739_v48, %v5704_v3  ;;  %v5227_v5 = vsel %vm479_vm10, %v5225_v39, %v10374_v50  ;;  %v5244_v3 = vsel %vm482_vm11, %v5242_v63, %v10377_v43  ;;  %v10382_v43 = vld [vmem:[#allocation48_spill] sm:$0xff] }
 0x5c0   : > { %v5494_v11 = vsel %vm473_vm9, %v5492_v4, %v5460_v41  ;;  %v5246_v0 = vsel %vm485_vm12, %v5244_v3, %v10378_v25 }
 0x5c1   : > { %v5496_v10 = vsel %vm476_vm8, %v5494_v11, %v9837_v34  ;;  %v5487_v34 = vsel %vm485_vm12, %v5485_v15, %v5451_v47 }
 0x5c2   : > { %v5498_v26 = vsel %vm479_vm10, %v5496_v10, %v5466_v56  ;;  %v5773_v31 = vrot.slane %v5487_v34, 4  ;;  %v5229_v56 = vsel %vm482_vm11, %v5227_v5, %v10376_v12  ;;  %v10381_v12 = vld [vmem:[#allocation49_spill] sm:$0xff] }
 0x5c3   : > { %v4913_v57 = vpop.permute.xlu0 %4912  ;;  %v5707_v30 = vpop.permute.xlu1 %5706  ;;  %v5500_v33 = vsel %vm482_vm11, %v5498_v26, %v5469_v22  ;;  %v5231_v22 = vsel %vm485_vm12, %v5229_v56, %v10379_v40 }
 0x5c4   : > { %v5743_v29 = vsel %vm485_vm12, %v5741_v20, %v5707_v30  ;;  %v5794_v37 = vsel %vm2834_vm14, %v5231_v22, %v5773_v31 }
 0x5c5   : > { %v5810_v27 = vsel %vm2834_vm14, %v5743_v29, 0 }
 0x5c6   : > { %5821 = vmatpush1.bf16.msra.mxu1 %v5810_v27 }
 0x5c7   : > { %v4657_v28 = vpop.permute.xlu0 %4656  ;;  %v5472_v53 = vpop.permute.xlu1 %5471 }
 0x5c8   : > { %v5502_v38 = vsel %vm485_vm12, %v5500_v33, %v5472_v53 }
 0x5c9   : > { %v5774_v51 = vrot.slane %v5502_v38, 4  ;;  %v10380_v38 = vld [vmem:[#allocation35_spill] sm:$0xff] }
 0x5ca   : > { %v3608_v56 = vsel %vm466_vm6, %v10381_v12, %v10380_v38 }
 0x5cb   : > { %v4925_v55 = vpop.permute.xlu0 %4924  ;;  %v4934_v44 = vpop.permute.xlu1 %4933  ;;  %v5797_v24 = vsel %vm2834_vm14, %v5246_v0, %v5774_v51  ;;  %v3610_v3 = vsel %vm470_vm7, %v3608_v56, %v10382_v43 }
 0x5cc   : > { %5822 = vmatprep.subr.bf16.mxu1 %v5797_v24  ;;  %v4961_v4 = vsel %vm466_vm6, %v9700_v49, %v4925_v55  ;;  %v10383_v55 = vld [vmem:[#allocation33_spill] sm:$0xff] }
 0x5cd   : > { %5823 = vmatpush1.bf16.msra.mxu1 %v5794_v37 }
 0x5cf   : > { %v4928_v35 = vpop.permute.xlu0 %4927  ;;  %v4678_v58 = vpop.permute.xlu1 %4677 }
 0x5d0   : > { %v4963_v11 = vsel %vm470_vm7, %v4961_v4, %v4928_v35 }
 0x5d3   : > { %v4907_v6 = vpop.permute.xlu0 %4906  ;;  %v4904_v32 = vpop.permute.xlu1 %4903 }
 0x5d4   : > { %v4946_v54 = vsel %vm466_vm6, %v9718_v18, %v4904_v32  ;;  %v10384_v32 = vld [vmem:[#allocation23_spill] sm:$0xff] }
 0x5d5   : > { %v4948_v13 = vsel %vm470_vm7, %v4946_v54, %v4907_v6 }
 0x5d7   : > { %v4648_v19 = vpop.permute.xlu0 %4647  ;;  %v4669_v52 = vpop.permute.xlu1 %4668 }
 0x5d8   : > { %v4690_v2 = vsel %vm466_vm6, %v9748_v62, %v4648_v19  ;;  %v4705_v49 = vsel %vm466_vm6, %v9754_v61, %v4669_v52  ;;  %v10385_v19 = vld [vmem:[#allocation36_spill] sm:$0xff] }
 0x5d9   : > { %v3593_v52 = vsel %vm466_vm6, %v10385_v19, %v10384_v32  ;;  %vm5806_vm6 = vcmask 588800  }
 0x5db   : > { %v4651_v45 = vpop.permute.xlu0 %4650  ;;  %v4672_v1 = vpop.permute.xlu1 %4671 }
 0x5dc   : > { %v4692_v30 = vsel %vm470_vm7, %v4690_v2, %v4651_v45  ;;  %v4707_v15 = vsel %vm470_vm7, %v4705_v49, %v4672_v1  ;;  %v10386_v45 = vld [vmem:[#allocation8_spill] sm:$0xff] }
 0x5df   : > { %v4916_v42 = vpop.permute.xlu0 %4915  ;;  %v4937_v14 = vpop.permute.xlu1 %4936 }
 0x5e3   : > { %v4919_v46 = vpop.permute.xlu0 %4918  ;;  %v4940_v9 = vpop.permute.xlu1 %4939 }
 0x5e7   : > { %v4660_v23 = vpop.permute.xlu0 %4659  ;;  %v4681_v60 = vpop.permute.xlu1 %4680 }
 0x5eb   : > { %v4663_v47 = vpop.permute.xlu0 %4662  ;;  %v4684_v7 = vpop.permute.xlu1 %4683 }
 0x5ef   : > { %v4910_v41 = vpop.permute.xlu0 %4909  ;;  %v4931_v36 = vpop.permute.xlu1 %4930 }
 0x5f0   : > { %v4950_v48 = vsel %vm473_vm9, %v4948_v13, %v4910_v41  ;;  %v4965_v39 = vsel %vm473_vm9, %v4963_v11, %v4931_v36  ;;  %v10390_v13 = vld [vmem:[#allocation38_spill] sm:$0xff] }
 0x5f1   : > { %v4952_v10 = vsel %vm476_vm8, %v4950_v48, %v4913_v57  ;;  %v4967_v18 = vsel %vm476_vm8, %v4965_v39, %v4934_v44  ;;  %v3612_v44 = vsel %vm473_vm9, %v3610_v3, %v10383_v55  ;;  %v10391_v39 = vld [vmem:[#allocation7_spill] sm:$0xff] }
 0x5f2   : > { %v4954_v57 = vsel %vm479_vm10, %v4952_v10, %v4916_v42  ;;  %v4969_v62 = vsel %vm479_vm10, %v4967_v18, %v4937_v14  ;;  %v3614_v1 = vsel %vm476_vm8, %v3612_v44, %v10386_v45  ;;  %v10387_v14 = vld [vmem:[#allocation29_spill] sm:$0xff] }
 0x5f3   : > { %v4654_v20 = vpop.permute.xlu0 %4653  ;;  %v4675_v26 = vpop.permute.xlu1 %4674  ;;  %v4956_v61 = vsel %vm482_vm11, %v4954_v57, %v4919_v46  ;;  %v4971_v63 = vsel %vm482_vm11, %v4969_v62, %v4940_v9  ;;  %v3595_v46 = vsel %vm470_vm7, %v3593_v52, %v10387_v14 }
 0x5f4   : > { %v4694_v29 = vsel %vm473_vm9, %v4692_v30, %v4654_v20  ;;  %v4709_v5 = vsel %vm473_vm9, %v4707_v15, %v4675_v26 }
 0x5f5   : > { %v4696_v50 = vsel %vm476_vm8, %v4694_v29, %v4657_v28  ;;  %v4711_v34 = vsel %vm476_vm8, %v4709_v5, %v4678_v58 }
 0x5f6   : > { %v4698_v53 = vsel %vm479_vm10, %v4696_v50, %v4660_v23  ;;  %v4713_v28 = vsel %vm479_vm10, %v4711_v34, %v4681_v60  ;;  %v10388_v23 = vld [vmem:[#allocation27_spill] sm:$0xff] }
 0x5f7   : > { %v4922_v27 = vpop.permute.xlu0 %4921  ;;  %v4943_v33 = vpop.permute.xlu1 %4942  ;;  %v4700_v25 = vsel %vm482_vm11, %v4698_v53, %v4663_v47  ;;  %v4715_v22 = vsel %vm482_vm11, %v4713_v28, %v4684_v7  ;;  %v3597_v60 = vsel %vm473_vm9, %v3595_v46, %v10388_v23  ;;  %v10389_v47 = vld [vmem:[#allocation45_spill] sm:$0xff]  ;;  %v5762_v7 = vrot.slane %v9884_v8, 4 }
 0x5f8   : > { %v4958_v16 = vsel %vm485_vm12, %v4956_v61, %v4922_v27  ;;  %v4973_v31 = vsel %vm485_vm12, %v4971_v63, %v4943_v33  ;;  %v3616_v54 = vsel %vm479_vm10, %v3614_v1, %v10389_v47  ;;  %v3599_v11 = vsel %vm476_vm8, %v3597_v60, %v10390_v13 }
 0x5f9   : > { %v5769_v51 = vrot.slane %v4958_v16, 4  ;;  %v5770_v24 = vrot.slane %v4973_v31, 4  ;;  %v3601_v8 = vsel %vm479_vm10, %v3599_v11, %v10391_v39 }
 0x5fb   : > { %v4666_v0 = vpop.permute.xlu0 %4665  ;;  %v4687_v37 = vpop.permute.xlu1 %4686 }
 0x5fc   : > { %v4702_v40 = vsel %vm485_vm12, %v4700_v25, %v4666_v0  ;;  %v4717_v35 = vsel %vm485_vm12, %v4715_v22, %v4687_v37 }
 0x5fd   : > { %v5788_v58 = vsel %vm2834_vm14, %v4702_v40, %v5769_v51  ;;  %v5791_v6 = vsel %vm2834_vm14, %v4717_v35, %v5770_v24 }
 0x5fe   : > { %5824 = vmatprep.subr.bf16.mxu1 %v5791_v6 }
 0x5ff   : > { %v3833_v42 = vpop.permute.xlu0 %3832  ;;  %5825 = vmatpush1.bf16.msra.mxu1 %v5788_v58  ;;  %v3587_v9 = vpop.permute.xlu1 %3586 }
 0x600   : > { %5826 = vmatprep.subr.bf16.mxu1 %v9872_v17  ;;  %v3618_v4 = vsel %vm482_vm11, %v3616_v54, %v3587_v9  ;;  %v3869_v17 = vsel %vm485_vm12, %v9830_v59, %v3833_v42  ;;  %v5799_v59 = vld [vmem:[%s10063_s3] sm:$0x3] }
 0x601   : > { %v5761_v2 = vrot.slane %v3869_v17, 4 }
 0x603   : > { %v3590_v41 = vpop.permute.xlu0 %3589  ;;  %5827 = vmatpush1.bf16.msra.mxu1 %v9881_v21  ;;  %v3566_v36 = vpop.permute.xlu1 %3565 }
 0x604   : > { %v3620_v48 = vsel %vm485_vm12, %v3618_v4, %v3590_v41  ;;  %v3603_v18 = vsel %vm482_vm11, %v3601_v8, %v3566_v36 }
 0x605   : > { %v5779_v10 = vsel %vm2834_vm14, %v3620_v48, %v5762_v7 }
 0x606   : > { %5828 = vmatprep.subr.bf16.mxu1 %v5779_v10 }
 0x607   : > { %v3569_v49 = vpop.permute.xlu1 %3568 }
 0x608   : > { %v3605_v30 = vsel %vm485_vm12, %v3603_v18, %v3569_v49 }
 0x609   : > { %v5776_v20 = vsel %vm2834_vm14, %v3605_v30, %v5761_v2 }
 0x60a   : > { %5829 = vmatpush1.bf16.msra.mxu1 %v5776_v20 }
 0x60d   : > { %6075 = vmatmul.mubr.msk.bf16.vlgmr.msra.gmra.mxu1 %vm5806_vm6, %v5799_v59 }
 0x610   : > { %v5804_v21 = vpop.permute.xlu0 %5803 }
 0x6cd   : > { %v5848_v15 = vpop.f32.mrf.mxu1 }
 0x6ce   : > { %v5849_v29 = vadd.f32 %v5848_v15, %v5804_v21 }
 0x6cf   : > { %v5850_v26 = vpop.f32.mrf.mxu1 }
 0x6d0   : > { %v5851_v57 = vadd.f32 %v5850_v26, %v5804_v21  ;;  %v5855_v5 = vmax.f32 %v5849_v29, 0.0 }
 0x6d1   : > { %v5852_v50 = vpop.f32.mrf.mxu1 }
 0x6d2   : > { %v5856_v62 = vmax.f32 %v5851_v57, 0.0 }
 0x6d3   : > { %v5853_v34 = vpop.f32.mrf.mxu1 }
 0x6d4   : > { %v5859_v27 = vcombine.low %v5855_v5, %v5856_v62 }
 0x6d6   : > { %5861 = vst [vmem:[%s217_s15] sm:$0xff] %v5859_v27 }
 0x6d7   : > { %6230 = shalt.err (!%p6227_p3)
}
 0x6d8   : > { %s6231_s8 = scalar_lea.hbm %s5875_s25, 128  ;;  %s6235_s11 = scalar_lea.hbm %s10065_s5, 256 }
 0x6d9   : > { %p6232_p4 = scmp.ne.s32.totalorder %s5875_s25, %s6231_s8  ;;  %p6236_p9 = scmp.lt.s32.totalorder %s5875_s25, %s10065_s5 }
 0x6da   : > { %p6237_p10 = scmp.lt.s32.totalorder %s6235_s11, %s6231_s8 }
 0x6db   : > { %p6233_p7 = pnand %p6232_p4, %p6362_p5 }
 0x6dc   : > { %p6238_p11 = por %p6237_p10, %p6236_p9 }
 0x6dd   : > { %p6234_p8 = pneg %p6233_p7 }
 0x6df   : > { %p6239_p12 = pnand %p6238_p11, %p6234_p8 }
 0x6e1   : > { %6242 = shalt.err (!%p6239_p12)
}
 0x6e2   : > { %6155 = dma.vmem_to_hbm [thread:$0]  (%p6362_p5), %s5878_s16, 128, %s5875_s25, %s5863_s26  }
 0x6e3 PF: > { %p6161_p13 = scmp.ge.s32.totalorder %s6277_s21, 2  ;;  %s5889_s14 = sand.u32 1, %s6265_s18  }
 0x6e4   : > { %s5890_s15 = scalar_lea.sflag [#allocation4], %s5889_s14 }
 0x6e5   : > { %p6158_p0 = pnand %p6161_p13, %p6366_p6 }
 0x6e7   : > { %p6159_p1 = pneg %p6158_p0 }
 0x6e9   : > { %6260 = dma.done.wait (%p6159_p1), %s5890_s15, 128  }
 0x6ea   : > { %6262 = vsyncadd (%p6159_p1), %s5890_s15, 4294967168  ;;  %p15_p2 = scmp.ge.s32.totalorder %s6349_s24, 4   ;;  %s10392_s18 = smov %s6269_s19 }
 0x6eb   : > { %s10393_s19 = smov %s6273_s20  ;;  %s10394_s20 = smov %s6360_s27 }
 0x6ec   : > { %s10395_s21 = smov %s6349_s24  ;;  %17 = sbr.rel (!%p15_p2) target bundleno = 3 (0x3), region = 75 }
 0x6f1   :  { %5895 = vsyncpa [#allocation4], 1 }
 0x6f2   :  { %5897 = vsyncpa [#allocation4 + $0x1], 1 }

</bundles_post_ra>
